<compile_context>
chip_gen: v7x
topology: tpu7x:2x2x1
jax: 0.10.0
libtpu: 0.0.40
codegen_flags: <defaults>
</compile_context>

<pallas_src>
import functools

import jax
import jax.numpy as jnp
from jax import lax
from jax.experimental import pallas as pl
from jax.experimental.pallas import tpu as pltpu

EPS = 1e-5


# ------------------------------- helpers ----------------------------------- #

def _nbytes(shape, dtype):
    n = 1
    for d in shape:
        n *= int(d)
    return n * jnp.dtype(dtype).itemsize


def _vmem_limit_bytes(working_set_bytes):
    """Per-stage VMEM limit derived from the block working set.

    ~2x for double buffering plus headroom for Mosaic internal scratch; clamped so we
    stay well inside v7x's 64 MiB/TC while remaining generous on v5e/v6e.
    """
    est = 2 * int(working_set_bytes) + (4 << 20)
    return int(min(max(est, 16 << 20), 40 << 20))


def _compiler_params(num_grid_axes, vmem_bytes):
    return pltpu.CompilerParams(
        dimension_semantics=("parallel",) * num_grid_axes,
        vmem_limit_bytes=vmem_bytes,
    )


def _pick_m_tile(m, target=1024):
    """Largest multiple-of-8 divisor of m that is <= target (fallback: m itself)."""
    best = None
    t = 8
    while t <= min(m, target):
        if m % t == 0:
            best = t
        t += 8
    return best if best is not None else m


def _pick_band_rows(h, w, cin, cout, target_rows=None):
    """Row-band height for the 3x3 stage: largest divisor of H whose per-step
    working set stays small (or <= target_rows when given)."""
    best = 1
    for th in range(1, h + 1):
        if h % th:
            continue
        if target_rows is not None:
            if th <= target_rows:
                best = th
            continue
        work = ((th + 2) * (w + 2) * cin * 2      # padded bf16 activation scratch
                + th * w * cout * 4               # f32 accumulator
                + 2 * th * w * (cin + cout) * 2)  # double-buffered band in/out (bf16)
        if work <= (4 << 20):
            best = th
    return best


# ----------------------------- Pallas kernels ------------------------------ #

def _conv1x1_stats_kernel(x_ref, w_ref, o_ref, stats_ref):
    # x: (TM, Cin) bf16, w: (Cin, Cout) bf16 -> raw conv tile + packed BN partials.
    y = jnp.dot(x_ref[...], w_ref[...], preferred_element_type=jnp.float32)
    yb = y.astype(o_ref.dtype)
    o_ref[...] = yb
    yf = yb.astype(jnp.float32)          # stats on the values BN will actually see
    cout = yf.shape[1]
    s = jnp.sum(yf, axis=0, keepdims=True)
    q = jnp.sum(yf * yf, axis=0, keepdims=True)
    stats_ref[...] = jnp.concatenate([s, q], axis=0).reshape(1, 2, cout)


def _bn_relu_conv1x1_stats_kernel(x_ref, sc_ref, sh_ref, w_ref, o_ref, stats_ref):
    # Fused relu(bn(x)) @ w with f32 accumulation, plus packed BN partials.
    act = jnp.maximum(x_ref[...].astype(jnp.float32) * sc_ref[...] + sh_ref[...], 0.0)
    y = jnp.dot(act.astype(jnp.bfloat16), w_ref[...], preferred_element_type=jnp.float32)
    yb = y.astype(o_ref.dtype)
    o_ref[...] = yb
    yf = yb.astype(jnp.float32)
    cout = yf.shape[1]
    s = jnp.sum(yf, axis=0, keepdims=True)
    q = jnp.sum(yf * yf, axis=0, keepdims=True)
    stats_ref[...] = jnp.concatenate([s, q], axis=0).reshape(1, 2, cout)


def _bn_relu_conv3x3_stats_kernel(band_ref, o1_any, sc_ref, sh_ref, w_ref,
                                  o_ref, stats_ref,
                                  act_ref, halo_ref, acc_ref, sem,
                                  *, th, H, W, n_bands):
    """One (image, row-band) step of relu(bn1(conv1_out)) -> 3x3 conv (pad=1).

    band_ref : (th, W, C)      this band's raw conv1 rows (auto-pipelined, bf16)
    o1_any   : (N*H, W, C)     raw conv1 output in HBM (halo-row source, manual DMA)
    act_ref  : (th+2, W+2, C)  bf16 scratch: zero-padded bn1+relu activation
    halo_ref : (2, W, C)       bf16 scratch for the two halo rows
    acc_ref  : (th*W, Cout)    f32 MXU accumulator
    """
    n = pl.program_id(0)
    i = pl.program_id(1)
    C = band_ref.shape[-1]
    cout = o_ref.shape[-1]
    base = n * H + i * th

    # Kick off the two tiny halo-row DMAs immediately (row indices clamped in-bounds;
    # rows that fall outside the image are zero-masked after bn+relu below).
    top_src = jnp.maximum(base - 1, n * H)
    bot_src = jnp.minimum(base + th, n * H + H - 1)
    top_cp = pltpu.make_async_copy(o1_any.at[top_src], halo_ref.at[0], sem.at[0])
    bot_cp = pltpu.make_async_copy(o1_any.at[bot_src], halo_ref.at[1], sem.at[1])
    top_cp.start()
    bot_cp.start()

    sc = sc_ref[...]                                    # (1, C) f32
    sh = sh_ref[...]

    # Zero the left/right halo columns (cheap; redone every step so it is megacore
    # safe) and fill the interior with bn1+relu of this band, stored as bf16.
    zcol = jnp.zeros((th + 2, 1, C), act_ref.dtype)
    act_ref[:, 0:1, :] = zcol
    act_ref[:, W + 1:W + 2, :] = zcol
    band = band_ref[...].astype(jnp.float32)            # (th, W, C)
    act_ref[1:th + 1, 1:W + 1, :] = jnp.maximum(band * sc + sh, 0.0).astype(act_ref.dtype)

    # Halo rows: bn1+relu, then zero outside the image (the BN shift must not leak
    # into the padded ring).
    top_cp.wait()
    bot_cp.wait()
    hact = jnp.maximum(halo_ref[...].astype(jnp.float32) * sc + sh, 0.0)   # (2, W, C)
    top_row = jnp.where(i > 0, hact[0:1], 0.0)
    bot_row = jnp.where(i < n_bands - 1, hact[1:2], 0.0)
    act_ref[0:1, 1:W + 1, :] = top_row.astype(act_ref.dtype)
    act_ref[th + 1:th + 2, 1:W + 1, :] = bot_row.astype(act_ref.dtype)

    # 3x3 conv as three MXU matmuls with K = 3*C: for each dy the three dx taps are
    # concatenated along channels, so small widths fill much more of the MXU.
    def tap(dy):
        a = act_ref[dy:dy + th, :, :]                   # (th, W+2, C) bf16
        patch = jnp.concatenate(
            [a[:, 0:W, :], a[:, 1:W + 1, :], a[:, 2:W + 2, :]], axis=-1)
        return jnp.dot(patch.reshape(th * W, 3 * C), w_ref[dy],
                       preferred_element_type=jnp.float32)

    acc_ref[...] = tap(0)
    acc_ref[...] += tap(1)
    acc_ref[...] += tap(2)

    yb = acc_ref[...].astype(o_ref.dtype)
    o_ref[...] = yb
    yf = yb.astype(jnp.float32)
    s = jnp.sum(yf, axis=0, keepdims=True)
    q = jnp.sum(yf * yf, axis=0, keepdims=True)
    stats_ref[...] = jnp.concatenate([s, q], axis=0).reshape(1, 2, cout)


def _bn_add_relu_kernel(y_ref, sc_ref, sh_ref, res_ref, o_ref):
    y = y_ref[...].astype(jnp.float32) * sc_ref[...] + sh_ref[...]
    o_ref[...] = jnp.maximum(y + res_ref[...].astype(jnp.float32), 0.0).astype(o_ref.dtype)


# ------------------------------- wrappers ---------------------------------- #

def _fold_bn(stats, count, gamma, beta):
    """Fold packed (tiles, 2, C) batch-stat partials + affine params into scale/shift."""
    s = jnp.sum(stats[:, 0, :], axis=0)
    ss = jnp.sum(stats[:, 1, :], axis=0)
    mean = s / count
    # TODO(synk): E[x^2]-E[x]^2 can cancel for large means; shifted/Welford if needed.
    var = jnp.maximum(ss / count - mean * mean, 0.0)   # biased batch variance
    scale = gamma.reshape(-1) * lax.rsqrt(var + EPS)
    shift = beta.reshape(-1) - mean * scale
    return scale.reshape(1, -1), shift.reshape(1, -1)


def bottleneck_forward_nhwc(x_nhwc, params, *, m_tile=1024, band_rows=None,
                            out_dtype=None):
    """Bottleneck forward in NHWC (stride=1, groups=1, dilation=1, no downsample)."""
    N, H, W, cin = x_nhwc.shape
    width = params["w1"].shape[1]
    cout = params["w3"].shape[1]
    assert cin == cout, "identity path requires inplanes == planes * expansion"
    out_dtype = x_nhwc.dtype if out_dtype is None else out_dtype

    M = N * H * W
    tm = _pick_m_tile(M, m_tile)
    n_t = M // tm
    th = _pick_band_rows(H, W, width, width, band_rows)
    n_bands = H // th

    # bf16 at the kernel boundary (f32 accumulation inside the kernels).
    x_bf = x_nhwc.astype(jnp.bfloat16).reshape(M, cin)
    w1 = params["w1"].astype(jnp.bfloat16)
    w2r = params["w2"].astype(jnp.bfloat16).reshape(3, 3 * width, width)  # (dy, dx*cin, cout)
    w3 = params["w3"].astype(jnp.bfloat16)

    # ---- stage 1: conv1 (1x1) + packed partial stats for bn1 -----------------
    ws1 = (_nbytes((tm, cin), jnp.bfloat16) + _nbytes((tm, width), jnp.bfloat16)
           + _nbytes((cin, width), jnp.bfloat16))
    o1, st1 = pl.pallas_call(
        _conv1x1_stats_kernel,
        grid=(n_t,),
        in_specs=[
            pl.BlockSpec((tm, cin), lambda i: (i, 0)),
            pl.BlockSpec((cin, width), lambda i: (0, 0)),
        ],
        out_specs=(
            pl.BlockSpec((tm, width), lambda i: (i, 0)),
            pl.BlockSpec((1, 2, width), lambda i: (i, 0, 0)),
        ),
        out_shape=(
            jax.ShapeDtypeStruct((M, width), jnp.bfloat16),
            jax.ShapeDtypeStruct((n_t, 2, width), jnp.float32),
        ),
        compiler_params=_compiler_params(1, _vmem_limit_bytes(ws1)),
        cost_estimate=pl.CostEstimate(
            flops=2 * M * cin * width, transcendentals=0,
            bytes_accessed=2 * M * cin + 2 * M * width + 2 * cin * width),
    )(x_bf, w1)
    scale1, shift1 = _fold_bn(st1, M, params["g1"], params["b1"])

    # ---- stage 2: bn1+relu -> conv2 (3x3, pad=1) + packed stats for bn2 -------
    # Row-band tiling; halo rows come from tiny in-kernel DMAs against the unpadded
    # conv1 output, so no XLA pad pass over the largest intermediate is needed.
    o1_img = o1.reshape(N * H, W, width)
    ws2 = (_nbytes((th, W, width), jnp.bfloat16)
           + _nbytes((th * W, width), jnp.bfloat16)
           + _nbytes((3, 3 * width, width), jnp.bfloat16)
           + _nbytes((th + 2, W + 2, width), jnp.bfloat16)
           + _nbytes((2, W, width), jnp.bfloat16)
           + _nbytes((th * W, width), jnp.float32))
    o2, st2 = pl.pallas_call(
        functools.partial(_bn_relu_conv3x3_stats_kernel,
                          th=th, H=H, W=W, n_bands=n_bands),
        grid=(N, n_bands),
        in_specs=[
            pl.BlockSpec((th, W, width), lambda n, i: (n * n_bands + i, 0, 0)),
            pl.BlockSpec(memory_space=pl.ANY),     # halo-row source (manual DMA)
            pl.BlockSpec((1, width), lambda n, i: (0, 0)),
            pl.BlockSpec((1, width), lambda n, i: (0, 0)),
            pl.BlockSpec((3, 3 * width, width), lambda n, i: (0, 0, 0)),
        ],
        out_specs=(
            pl.BlockSpec((th * W, width), lambda n, i: (n * n_bands + i, 0)),
            pl.BlockSpec((1, 2, width), lambda n, i: (n * n_bands + i, 0, 0)),
        ),
        out_shape=(
            jax.ShapeDtypeStruct((M, width), jnp.bfloat16),
            jax.ShapeDtypeStruct((N * n_bands, 2, width), jnp.float32),
        ),
        scratch_shapes=[
            pltpu.VMEM((th + 2, W + 2, width), jnp.bfloat16),   # padded activation band
            pltpu.VMEM((2, W, width), jnp.bfloat16),            # halo rows (top, bottom)
            pltpu.VMEM((th * W, width), jnp.float32),           # MXU accumulator
            pltpu.SemaphoreType.DMA((2,)),
        ],
        compiler_params=_compiler_params(2, _vmem_limit_bytes(ws2)),
        cost_estimate=pl.CostEstimate(
            flops=2 * M * 9 * width * width, transcendentals=0,
            bytes_accessed=4 * M * width + 2 * 9 * width * width),
    )(o1_img, o1_img, scale1, shift1, w2r)
    scale2, shift2 = _fold_bn(st2, M, params["g2"], params["b2"])

    # ---- stage 3: bn2+relu -> conv3 (1x1) + packed stats for bn3 --------------
    ws3 = (_nbytes((tm, width), jnp.bfloat16) + _nbytes((tm, cout), jnp.bfloat16)
           + _nbytes((width, cout), jnp.bfloat16))
    o3, st3 = pl.pallas_call(
        _bn_relu_conv1x1_stats_kernel,
        grid=(n_t,),
        in_specs=[
            pl.BlockSpec((tm, width), lambda i: (i, 0)),
            pl.BlockSpec((1, width), lambda i: (0, 0)),
            pl.BlockSpec((1, width), lambda i: (0, 0)),
            pl.BlockSpec((width, cout), lambda i: (0, 0)),
        ],
        out_specs=(
            pl.BlockSpec((tm, cout), lambda i: (i, 0)),
            pl.BlockSpec((1, 2, cout), lambda i: (i, 0, 0)),
        ),
        out_shape=(
            jax.ShapeDtypeStruct((M, cout), jnp.bfloat16),
            jax.ShapeDtypeStruct((n_t, 2, cout), jnp.float32),
        ),
        compiler_params=_compiler_params(1, _vmem_limit_bytes(ws3)),
        cost_estimate=pl.CostEstimate(
            flops=2 * M * width * cout, transcendentals=0,
            bytes_accessed=2 * M * width + 2 * M * cout + 2 * width * cout),
    )(o2, scale2, shift2, w3)
    scale3, shift3 = _fold_bn(st3, M, params["g3"], params["b3"])

    # ---- stage 4: bn3 + residual add + relu ------------------------------------
    ws4 = 2 * _nbytes((tm, cout), jnp.bfloat16) + _nbytes((tm, cout), out_dtype)
    out_flat = pl.pallas_call(
        _bn_add_relu_kernel,
        grid=(n_t,),
        in_specs=[
            pl.BlockSpec((tm, cout), lambda i: (i, 0)),
            pl.BlockSpec((1, cout), lambda i: (0, 0)),
            pl.BlockSpec((1, cout), lambda i: (0, 0)),
            pl.BlockSpec((tm, cout), lambda i: (i, 0)),
        ],
        out_specs=pl.BlockSpec((tm, cout), lambda i: (i, 0)),
        out_shape=jax.ShapeDtypeStruct((M, cout), out_dtype),
        compiler_params=_compiler_params(1, _vmem_limit_bytes(ws4)),
        cost_estimate=pl.CostEstimate(
            flops=4 * M * cout, transcendentals=0,
            bytes_accessed=8 * M * cout),
    )(o3, scale3, shift3, x_bf)

    return out_flat.reshape(N, H, W, cout)


def bottleneck_forward(x_nchw, params, *, m_tile=1024, band_rows=None, out_dtype=None):
    """NCHW wrapper matching the PyTorch module convention.

    Use bottleneck_forward_nhwc directly (and out_dtype=bf16) to drop the two layout
    transposes / f32 store when the surrounding model already runs NHWC.
    """
    x_nhwc = jnp.transpose(x_nchw, (0, 2, 3, 1))
    out = bottleneck_forward_nhwc(x_nhwc, params, m_tile=m_tile, band_rows=band_rows,
                                  out_dtype=out_dtype)
    return jnp.transpose(out, (0, 3, 1, 2))  # back to NCHW


def init_params(key, inplanes, planes, base_width=64, groups=1):
    expansion = 4
    width = int(planes * (base_width / 64.0)) * groups
    out_planes = planes * expansion
    ks = jax.random.split(key, 3)
    # Conv weights in matmul layout: 1x1 -> (Cin, Cout); 3x3 -> (kH, kW, Cin, Cout)
    w1 = 0.1 * jax.random.normal(ks[0], (inplanes, width), jnp.float32)
    w2 = 0.1 * jax.random.normal(ks[1], (3, 3, width, width), jnp.float32)
    w3 = 0.1 * jax.random.normal(ks[2], (width, out_planes), jnp.float32)
    return {
        "w1": w1, "g1": jnp.ones((1, width), jnp.float32), "b1": jnp.zeros((1, width), jnp.float32),
        "w2": w2, "g2": jnp.ones((1, width), jnp.float32), "b2": jnp.zeros((1, width), jnp.float32),
        "w3": w3, "g3": jnp.ones((1, out_planes), jnp.float32), "b3": jnp.zeros((1, out_planes), jnp.float32),
    }


def _reference_forward(x_nchw, params):
    """Pure-JAX f32 reference mirroring the PyTorch module (training-mode BN)."""
    x = jnp.transpose(x_nchw, (0, 2, 3, 1)).astype(jnp.float32)
    _, H, W, _ = x.shape

    def bn(y, g, b):
        m = jnp.mean(y, axis=(0, 1, 2), keepdims=True)
        v = jnp.mean((y - m) ** 2, axis=(0, 1, 2), keepdims=True)
        return g.reshape(1, 1, 1, -1) * (y - m) * lax.rsqrt(v + EPS) + b.reshape(1, 1, 1, -1)

    a1 = jnp.maximum(bn(jnp.einsum("nhwc,cd->nhwd", x, params["w1"]),
                        params["g1"], params["b1"]), 0.0)
    a1p = jnp.pad(a1, ((0, 0), (1, 1), (1, 1), (0, 0)))
    y2 = sum(jnp.einsum("nhwc,cd->nhwd", a1p[:, dy:dy + H, dx:dx + W, :], params["w2"][dy, dx])
             for dy in range(3) for dx in range(3))
    a2 = jnp.maximum(bn(y2, params["g2"], params["b2"]), 0.0)
    y3 = bn(jnp.einsum("nhwc,cd->nhwd", a2, params["w3"]), params["g3"], params["b3"])
    out = jnp.maximum(y3 + x, 0.0)
    return jnp.transpose(out, (0, 3, 1, 2))


if __name__ == "__main__":
    key = jax.random.PRNGKey(0)
    k_x, k_p = jax.random.split(key)

    # Small Bottleneck-consistent shapes: inplanes = planes * expansion so the
    # identity branch needs no downsample (stride=1, downsample=None).
    N, planes, H, W = 2, 16, 16, 16
    inplanes = planes * 4  # 64

    x = jax.random.normal(k_x, (N, inplanes, H, W), jnp.float32)  # NCHW
    params = init_params(k_p, inplanes, planes)

    # band_rows=8 -> two row bands per image, exercising the halo-row DMA path;
    # m_tile=256 -> two M-tiles for the 1x1 stages, exercising partial-stat folding.
    fwd = jax.jit(functools.partial(bottleneck_forward, m_tile=256, band_rows=8))
    out = jax.block_until_ready(fwd(x, params))

    assert out.shape == (N, planes * 4, H, W)
    assert out.dtype == x.dtype
    assert bool(jnp.all(out >= 0.0))  # final ReLU

    ref = jax.block_until_ready(jax.jit(_reference_forward)(x, params))
    max_err = float(jnp.max(jnp.abs(out - ref)))
    assert max_err < 0.5, f"kernel deviates from f32 reference: max_err={max_err}"

    print("KERNEL_OK")
</pallas_src>

<mosaic_0001>
module attributes {stable_mosaic.version = 11 : i64} {
  func.func @_conv1x1_stats_kernel(%arg0: i32, %arg1: memref<256x64xbf16, #tpu.memory_space<vmem>>, %arg2: memref<64x16xbf16, #tpu.memory_space<vmem>>, %arg3: memref<256x16xbf16, #tpu.memory_space<vmem>>, %arg4: memref<1x2x16xf32, #tpu.memory_space<vmem>>) attributes {dimension_semantics = [#tpu.dimension_semantics<parallel>], iteration_bounds = array<i64: 2>, scalar_prefetch = 0 : i64, scratch_operands = 0 : i64, tpu.core_type = #tpu.core_type<tc>, window_params = [{transform_indices = @transform_0, window_bounds = array<i64: 256, 64>}, {pipeline_mode = #tpu.pipeline_mode<synchronous>, transform_indices = @transform_1, window_bounds = array<i64: 64, 16>}, {transform_indices = @transform_2, window_bounds = array<i64: 256, 16>}, {transform_indices = @transform_3, window_bounds = array<i64: 1, 2, 16>}]} {
    %c0 = arith.constant 0 : index
    %c0_0 = arith.constant 0 : index
    %0 = vector.load %arg1[%c0, %c0_0] : memref<256x64xbf16, #tpu.memory_space<vmem>>, vector<256x64xbf16>
    %c0_1 = arith.constant 0 : index
    %c0_2 = arith.constant 0 : index
    %1 = vector.load %arg2[%c0_1, %c0_2] : memref<64x16xbf16, #tpu.memory_space<vmem>>, vector<64x16xbf16>
    %cst = arith.constant dense<0.000000e+00> : vector<256x16xf32>
    %2 = tpu.matmul %0, %1, %cst {dimension_numbers = #tpu.dot_dimension_numbers<[1], [0], [0], [1], [0, 0, 1, 1], [], []>} : vector<256x64xbf16>, vector<64x16xbf16>, vector<256x16xf32> -> vector<256x16xf32>
    %3 = arith.truncf %2 : vector<256x16xf32> to vector<256x16xbf16>
    %c0_3 = arith.constant 0 : index
    %c0_4 = arith.constant 0 : index
    %4 = vector.load %arg3[%c0_3, %c0_4] : memref<256x16xbf16, #tpu.memory_space<vmem>>, vector<256x16xbf16>
    tpu.vector_store %arg3[%c0_3, %c0_4], %3 {strides = array<i32>} : memref<256x16xbf16, #tpu.memory_space<vmem>>, vector<256x16xbf16>,
    %5 = arith.extf %3 : vector<256x16xbf16> to vector<256x16xf32>
    %cst_5 = arith.constant dense<0.000000e+00> : vector<16xf32>
    %6 = vector.multi_reduction <add>, %5, %cst_5 [0] : vector<256x16xf32> to vector<16xf32>
    %7 = vector.shape_cast %6 : vector<16xf32> to vector<1x16xf32>
    %8 = arith.mulf %5, %5 : vector<256x16xf32>
    %cst_6 = arith.constant dense<0.000000e+00> : vector<16xf32>
    %9 = vector.multi_reduction <add>, %8, %cst_6 [0] : vector<256x16xf32> to vector<16xf32>
    %10 = vector.shape_cast %9 : vector<16xf32> to vector<1x16xf32>
    %11 = tpu.concatenate %7, %10 in 0 : vector<1x16xf32>, vector<1x16xf32> -> vector<2x16xf32>
    %12 = vector.shape_cast %11 : vector<2x16xf32> to vector<1x2x16xf32>
    %c0_7 = arith.constant 0 : index
    %c0_8 = arith.constant 0 : index
    %c0_9 = arith.constant 0 : index
    %13 = vector.load %arg4[%c0_7, %c0_8, %c0_9] : memref<1x2x16xf32, #tpu.memory_space<vmem>>, vector<1x2x16xf32>
    tpu.vector_store %arg4[%c0_7, %c0_8, %c0_9], %12 {strides = array<i32>} : memref<1x2x16xf32, #tpu.memory_space<vmem>>, vector<1x2x16xf32>,
    return
  }
  func.func @transform_0(%arg0: i32) -> (i32, i32) {
    %c0_i32 = arith.constant 0 : i32
    %c0_i32_0 = arith.constant 0 : i32
    return %arg0, %c0_i32 : i32, i32
  }
  func.func @transform_1(%arg0: i32) -> (i32, i32) {
    %c0_i32 = arith.constant 0 : i32
    %c0_i32_0 = arith.constant 0 : i32
    %c0_i32_1 = arith.constant 0 : i32
    return %c0_i32, %c0_i32_0 : i32, i32
  }
  func.func @transform_2(%arg0: i32) -> (i32, i32) {
    %c0_i32 = arith.constant 0 : i32
    %c0_i32_0 = arith.constant 0 : i32
    return %arg0, %c0_i32 : i32, i32
  }
  func.func @transform_3(%arg0: i32) -> (i32, i32, i32) {
    %c0_i32 = arith.constant 0 : i32
    %c0_i32_0 = arith.constant 0 : i32
    %c0_i32_1 = arith.constant 0 : i32
    return %arg0, %c0_i32, %c0_i32_0 : i32, i32, i32
  }
}

module attributes {stable_mosaic.version = 11 : i64} {
  func.func @_bn_relu_conv3x3_stats_kernel(%arg0: i32, %arg1: i32, %arg2: memref<8x16x16xbf16, #tpu.memory_space<vmem>>, %arg3: memref<32x16x16xbf16, #tpu.memory_space<any>>, %arg4: memref<1x16xf32, #tpu.memory_space<vmem>>, %arg5: memref<1x16xf32, #tpu.memory_space<vmem>>, %arg6: memref<3x48x16xbf16, #tpu.memory_space<vmem>>, %arg7: memref<128x16xbf16, #tpu.memory_space<vmem>>, %arg8: memref<1x2x16xf32, #tpu.memory_space<vmem>>, %arg9: memref<10x18x16xbf16, #tpu.memory_space<vmem>>, %arg10: memref<2x16x16xbf16, #tpu.memory_space<vmem>>, %arg11: memref<128x16xf32, #tpu.memory_space<vmem>>, %arg12: memref<2x!tpu.dma_semaphore, #tpu.memory_space<semaphore_mem>>) attributes {dimension_semantics = [#tpu.dimension_semantics<parallel>, #tpu.dimension_semantics<parallel>], iteration_bounds = array<i64: 2, 2>, scalar_prefetch = 0 : i64, scratch_operands = 4 : i64, tpu.core_type = #tpu.core_type<tc>, window_params = [{transform_indices = @transform_0, window_bounds = array<i64: 8, 16, 16>}, {}, {pipeline_mode = #tpu.pipeline_mode<synchronous>, transform_indices = @transform_2, window_bounds = array<i64: 1, 16>}, {pipeline_mode = #tpu.pipeline_mode<synchronous>, transform_indices = @transform_3, window_bounds = array<i64: 1, 16>}, {pipeline_mode = #tpu.pipeline_mode<synchronous>, transform_indices = @transform_4, window_bounds = array<i64: 3, 48, 16>}, {transform_indices = @transform_5, window_bounds = array<i64: 128, 16>}, {transform_indices = @transform_6, window_bounds = array<i64: 1, 2, 16>}]} {
    %c16_i32 = arith.constant 16 : i32
    %0 = arith.muli %arg0, %c16_i32 : i32
    %c8_i32 = arith.constant 8 : i32
    %1 = arith.muli %arg1, %c8_i32 : i32
    %2 = arith.addi %0, %1 : i32
    %c1_i32 = arith.constant 1 : i32
    %3 = arith.subi %2, %c1_i32 : i32
    %c16_i32_0 = arith.constant 16 : i32
    %4 = arith.muli %arg0, %c16_i32_0 : i32
    %5 = arith.maxsi %3, %4 : i32
    %c8_i32_1 = arith.constant 8 : i32
    %6 = arith.addi %2, %c8_i32_1 : i32
    %c16_i32_2 = arith.constant 16 : i32
    %7 = arith.muli %arg0, %c16_i32_2 : i32
    %c16_i32_3 = arith.constant 16 : i32
    %8 = arith.addi %7, %c16_i32_3 : i32
    %c1_i32_4 = arith.constant 1 : i32
    %9 = arith.subi %8, %c1_i32_4 : i32
    %10 = arith.minsi %6, %9 : i32
    %c0_i32 = arith.constant 0 : i32
    %c0_i32_5 = arith.constant 0 : i32
    %c0_i32_6 = arith.constant 0 : i32
    %c0_i32_7 = arith.constant 0 : i32
    %11 = tpu.memref_slice %arg3[%5, %c0_i32_6, %c0_i32_7] : memref<32x16x16xbf16, #tpu.memory_space<any>> -> memref<1x16x16xbf16, #tpu.memory_space<any>>
    %12 = tpu.memref_squeeze %11 : memref<1x16x16xbf16, #tpu.memory_space<any>> -> memref<16x16xbf16, #tpu.memory_space<any>>
    %c0_i32_8 = arith.constant 0 : i32
    %c0_i32_9 = arith.constant 0 : i32
    %13 = tpu.memref_slice %arg10[%c0_i32, %c0_i32_8, %c0_i32_9] : memref<2x16x16xbf16, #tpu.memory_space<vmem>> -> memref<1x16x16xbf16, #tpu.memory_space<vmem>>
    %14 = tpu.memref_squeeze %13 : memref<1x16x16xbf16, #tpu.memory_space<vmem>> -> memref<16x16xbf16, #tpu.memory_space<vmem>>
    %15 = tpu.memref_slice %arg12[%c0_i32_5] : memref<2x!tpu.dma_semaphore, #tpu.memory_space<semaphore_mem>> -> memref<1x!tpu.dma_semaphore, #tpu.memory_space<semaphore_mem>>
    %16 = tpu.memref_squeeze %15 : memref<1x!tpu.dma_semaphore, #tpu.memory_space<semaphore_mem>> -> memref<!tpu.dma_semaphore, #tpu.memory_space<semaphore_mem>>
    tpu.enqueue_dma source(%12 : memref<16x16xbf16, #tpu.memory_space<any>>) target(%14 : memref<16x16xbf16, #tpu.memory_space<vmem>>) target_semaphore(%16 : memref<!tpu.dma_semaphore, #tpu.memory_space<semaphore_mem>>)
    %c1_i32_10 = arith.constant 1 : i32
    %c1_i32_11 = arith.constant 1 : i32
    %c0_i32_12 = arith.constant 0 : i32
    %c0_i32_13 = arith.constant 0 : i32
    %17 = tpu.memref_slice %arg3[%10, %c0_i32_12, %c0_i32_13] : memref<32x16x16xbf16, #tpu.memory_space<any>> -> memref<1x16x16xbf16, #tpu.memory_space<any>>
    %18 = tpu.memref_squeeze %17 : memref<1x16x16xbf16, #tpu.memory_space<any>> -> memref<16x16xbf16, #tpu.memory_space<any>>
    %c0_i32_14 = arith.constant 0 : i32
    %c0_i32_15 = arith.constant 0 : i32
    %19 = tpu.memref_slice %arg10[%c1_i32_10, %c0_i32_14, %c0_i32_15] : memref<2x16x16xbf16, #tpu.memory_space<vmem>> -> memref<1x16x16xbf16, #tpu.memory_space<vmem>>
    %20 = tpu.memref_squeeze %19 : memref<1x16x16xbf16, #tpu.memory_space<vmem>> -> memref<16x16xbf16, #tpu.memory_space<vmem>>
    %21 = tpu.memref_slice %arg12[%c1_i32_11] : memref<2x!tpu.dma_semaphore, #tpu.memory_space<semaphore_mem>> -> memref<1x!tpu.dma_semaphore, #tpu.memory_space<semaphore_mem>>
    %22 = tpu.memref_squeeze %21 : memref<1x!tpu.dma_semaphore, #tpu.memory_space<semaphore_mem>> -> memref<!tpu.dma_semaphore, #tpu.memory_space<semaphore_mem>>
    tpu.enqueue_dma source(%18 : memref<16x16xbf16, #tpu.memory_space<any>>) target(%20 : memref<16x16xbf16, #tpu.memory_space<vmem>>) target_semaphore(%22 : memref<!tpu.dma_semaphore, #tpu.memory_space<semaphore_mem>>)
    %c0 = arith.constant 0 : index
    %c0_16 = arith.constant 0 : index
    %23 = vector.load %arg4[%c0, %c0_16] : memref<1x16xf32, #tpu.memory_space<vmem>>, vector<1x16xf32>
    %c0_17 = arith.constant 0 : index
    %c0_18 = arith.constant 0 : index
    %24 = vector.load %arg5[%c0_17, %c0_18] : memref<1x16xf32, #tpu.memory_space<vmem>>, vector<1x16xf32>
    %cst = arith.constant 0.000000e+00 : bf16
    %25 = vector.broadcast %cst : bf16 to vector<10x1x16xbf16>
    %c0_19 = arith.constant 0 : index
    %c0_20 = arith.constant 0 : index
    %c0_21 = arith.constant 0 : index
    %26 = vector.load %arg9[%c0_19, %c0_20, %c0_21] : memref<10x18x16xbf16, #tpu.memory_space<vmem>>, vector<10x1x16xbf16>
    tpu.vector_store %arg9[%c0_19, %c0_20, %c0_21], %25 {strides = array<i32>} : memref<10x18x16xbf16, #tpu.memory_space<vmem>>, vector<10x1x16xbf16>,
    %c0_22 = arith.constant 0 : index
    %c17 = arith.constant 17 : index
    %c0_23 = arith.constant 0 : index
    %27 = vector.load %arg9[%c0_22, %c17, %c0_23] : memref<10x18x16xbf16, #tpu.memory_space<vmem>>, vector<10x1x16xbf16>
    tpu.vector_store %arg9[%c0_22, %c17, %c0_23], %25 {strides = array<i32>} : memref<10x18x16xbf16, #tpu.memory_space<vmem>>, vector<10x1x16xbf16>,
    %c0_24 = arith.constant 0 : index
    %c0_25 = arith.constant 0 : index
    %c0_26 = arith.constant 0 : index
    %28 = vector.load %arg2[%c0_24, %c0_25, %c0_26] : memref<8x16x16xbf16, #tpu.memory_space<vmem>>, vector<8x16x16xbf16>
    %29 = arith.extf %28 : vector<8x16x16xbf16> to vector<8x16x16xf32>
    %30 = vector.shape_cast %23 : vector<1x16xf32> to vector<1x1x16xf32>
    %31 = vector.broadcast %30 : vector<1x1x16xf32> to vector<8x16x16xf32>
    %32 = arith.mulf %29, %31 : vector<8x16x16xf32>
    %33 = vector.shape_cast %24 : vector<1x16xf32> to vector<1x1x16xf32>
    %34 = vector.broadcast %33 : vector<1x1x16xf32> to vector<8x16x16xf32>
    %35 = arith.addf %32, %34 : vector<8x16x16xf32>
    %cst_27 = arith.constant 0.000000e+00 : f32
    %36 = vector.broadcast %cst_27 : f32 to vector<8x16x16xf32>
    %37 = arith.maximumf %35, %36 : vector<8x16x16xf32>
    %38 = arith.truncf %37 : vector<8x16x16xf32> to vector<8x16x16xbf16>
    %c1 = arith.constant 1 : index
    %c1_28 = arith.constant 1 : index
    %c0_29 = arith.constant 0 : index
    %39 = vector.load %arg9[%c1, %c1_28, %c0_29] : memref<10x18x16xbf16, #tpu.memory_space<vmem>>, vector<8x16x16xbf16>
    tpu.vector_store %arg9[%c1, %c1_28, %c0_29], %38 {strides = array<i32>} : memref<10x18x16xbf16, #tpu.memory_space<vmem>>, vector<8x16x16xbf16>,
    %c0_i32_30 = arith.constant 0 : i32
    %c0_i32_31 = arith.constant 0 : i32
    %c0_i32_32 = arith.constant 0 : i32
    %c0_i32_33 = arith.constant 0 : i32
    %40 = tpu.memref_slice %arg3[%5, %c0_i32_32, %c0_i32_33] : memref<32x16x16xbf16, #tpu.memory_space<any>> -> memref<1x16x16xbf16, #tpu.memory_space<any>>
    %41 = tpu.memref_squeeze %40 : memref<1x16x16xbf16, #tpu.memory_space<any>> -> memref<16x16xbf16, #tpu.memory_space<any>>
    %c0_i32_34 = arith.constant 0 : i32
    %c0_i32_35 = arith.constant 0 : i32
    %42 = tpu.memref_slice %arg10[%c0_i32_30, %c0_i32_34, %c0_i32_35] : memref<2x16x16xbf16, #tpu.memory_space<vmem>> -> memref<1x16x16xbf16, #tpu.memory_space<vmem>>
    %43 = tpu.memref_squeeze %42 : memref<1x16x16xbf16, #tpu.memory_space<vmem>> -> memref<16x16xbf16, #tpu.memory_space<vmem>>
    %44 = tpu.memref_slice %arg12[%c0_i32_31] : memref<2x!tpu.dma_semaphore, #tpu.memory_space<semaphore_mem>> -> memref<1x!tpu.dma_semaphore, #tpu.memory_space<semaphore_mem>>
    %45 = tpu.memref_squeeze %44 : memref<1x!tpu.dma_semaphore, #tpu.memory_space<semaphore_mem>> -> memref<!tpu.dma_semaphore, #tpu.memory_space<semaphore_mem>>
    tpu.wait_dma2 semaphore(%45 : memref<!tpu.dma_semaphore, #tpu.memory_space<semaphore_mem>>) src(%41 : memref<16x16xbf16, #tpu.memory_space<any>>) dst(%43 : memref<16x16xbf16, #tpu.memory_space<vmem>>)
    %c1_i32_36 = arith.constant 1 : i32
    %c1_i32_37 = arith.constant 1 : i32
    %c0_i32_38 = arith.constant 0 : i32
    %c0_i32_39 = arith.constant 0 : i32
    %46 = tpu.memref_slice %arg3[%10, %c0_i32_38, %c0_i32_39] : memref<32x16x16xbf16, #tpu.memory_space<any>> -> memref<1x16x16xbf16, #tpu.memory_space<any>>
    %47 = tpu.memref_squeeze %46 : memref<1x16x16xbf16, #tpu.memory_space<any>> -> memref<16x16xbf16, #tpu.memory_space<any>>
    %c0_i32_40 = arith.constant 0 : i32
    %c0_i32_41 = arith.constant 0 : i32
    %48 = tpu.memref_slice %arg10[%c1_i32_36, %c0_i32_40, %c0_i32_41] : memref<2x16x16xbf16, #tpu.memory_space<vmem>> -> memref<1x16x16xbf16, #tpu.memory_space<vmem>>
    %49 = tpu.memref_squeeze %48 : memref<1x16x16xbf16, #tpu.memory_space<vmem>> -> memref<16x16xbf16, #tpu.memory_space<vmem>>
    %50 = tpu.memref_slice %arg12[%c1_i32_37] : memref<2x!tpu.dma_semaphore, #tpu.memory_space<semaphore_mem>> -> memref<1x!tpu.dma_semaphore, #tpu.memory_space<semaphore_mem>>
    %51 = tpu.memref_squeeze %50 : memref<1x!tpu.dma_semaphore, #tpu.memory_space<semaphore_mem>> -> memref<!tpu.dma_semaphore, #tpu.memory_space<semaphore_mem>>
    tpu.wait_dma2 semaphore(%51 : memref<!tpu.dma_semaphore, #tpu.memory_space<semaphore_mem>>) src(%47 : memref<16x16xbf16, #tpu.memory_space<any>>) dst(%49 : memref<16x16xbf16, #tpu.memory_space<vmem>>)
    %c0_42 = arith.constant 0 : index
    %c0_43 = arith.constant 0 : index
    %c0_44 = arith.constant 0 : index
    %52 = vector.load %arg10[%c0_42, %c0_43, %c0_44] : memref<2x16x16xbf16, #tpu.memory_space<vmem>>, vector<2x16x16xbf16>
    %53 = arith.extf %52 : vector<2x16x16xbf16> to vector<2x16x16xf32>
    %54 = vector.shape_cast %23 : vector<1x16xf32> to vector<1x1x16xf32>
    %55 = vector.broadcast %54 : vector<1x1x16xf32> to vector<2x16x16xf32>
    %56 = arith.mulf %53, %55 : vector<2x16x16xf32>
    %57 = vector.shape_cast %24 : vector<1x16xf32> to vector<1x1x16xf32>
    %58 = vector.broadcast %57 : vector<1x1x16xf32> to vector<2x16x16xf32>
    %59 = arith.addf %56, %58 : vector<2x16x16xf32>
    %cst_45 = arith.constant 0.000000e+00 : f32
    %60 = vector.broadcast %cst_45 : f32 to vector<2x16x16xf32>
    %61 = arith.maximumf %59, %60 : vector<2x16x16xf32>
    %c0_i32_46 = arith.constant 0 : i32
    %62 = arith.cmpi sgt, %arg1, %c0_i32_46 : i32
    %63 = vector.extract_strided_slice %61 {offsets = [0, 0, 0], sizes = [1, 16, 16], strides = [1, 1, 1]} : vector<2x16x16xf32> to vector<1x16x16xf32>
    %cst_47 = arith.constant 0.000000e+00 : f32
    %64 = vector.broadcast %cst_47 : f32 to vector<1x16x16xf32>
    %65 = arith.select %62, %63, %64 : vector<1x16x16xf32>
    %c1_i32_48 = arith.constant 1 : i32
    %66 = arith.cmpi slt, %arg1, %c1_i32_48 : i32
    %67 = vector.extract_strided_slice %61 {offsets = [1, 0, 0], sizes = [1, 16, 16], strides = [1, 1, 1]} : vector<2x16x16xf32> to vector<1x16x16xf32>
    %cst_49 = arith.constant 0.000000e+00 : f32
    %68 = vector.broadcast %cst_49 : f32 to vector<1x16x16xf32>
    %69 = arith.select %66, %67, %68 : vector<1x16x16xf32>
    %70 = arith.truncf %65 : vector<1x16x16xf32> to vector<1x16x16xbf16>
    %c0_50 = arith.constant 0 : index
    %c1_51 = arith.constant 1 : index
    %c0_52 = arith.constant 0 : index
    %71 = vector.load %arg9[%c0_50, %c1_51, %c0_52] : memref<10x18x16xbf16, #tpu.memory_space<vmem>>, vector<1x16x16xbf16>
    tpu.vector_store %arg9[%c0_50, %c1_51, %c0_52], %70 {strides = array<i32>} : memref<10x18x16xbf16, #tpu.memory_space<vmem>>, vector<1x16x16xbf16>,
    %72 = arith.truncf %69 : vector<1x16x16xf32> to vector<1x16x16xbf16>
    %c9 = arith.constant 9 : index
    %c1_53 = arith.constant 1 : index
    %c0_54 = arith.constant 0 : index
    %73 = vector.load %arg9[%c9, %c1_53, %c0_54] : memref<10x18x16xbf16, #tpu.memory_space<vmem>>, vector<1x16x16xbf16>
    tpu.vector_store %arg9[%c9, %c1_53, %c0_54], %72 {strides = array<i32>} : memref<10x18x16xbf16, #tpu.memory_space<vmem>>, vector<1x16x16xbf16>,
    %c0_55 = arith.constant 0 : index
    %c0_56 = arith.constant 0 : index
    %c0_57 = arith.constant 0 : index
    %74 = vector.load %arg9[%c0_55, %c0_56, %c0_57] : memref<10x18x16xbf16, #tpu.memory_space<vmem>>, vector<8x18x16xbf16>
    %75 = vector.extract_strided_slice %74 {offsets = [0, 0, 0], sizes = [8, 16, 16], strides = [1, 1, 1]} : vector<8x18x16xbf16> to vector<8x16x16xbf16>
    %76 = vector.extract_strided_slice %74 {offsets = [0, 1, 0], sizes = [8, 16, 16], strides = [1, 1, 1]} : vector<8x18x16xbf16> to vector<8x16x16xbf16>
    %77 = vector.extract_strided_slice %74 {offsets = [0, 2, 0], sizes = [8, 16, 16], strides = [1, 1, 1]} : vector<8x18x16xbf16> to vector<8x16x16xbf16>
    %78 = tpu.concatenate %75, %76, %77 in 2 : vector<8x16x16xbf16>, vector<8x16x16xbf16>, vector<8x16x16xbf16> -> vector<8x16x48xbf16>
    %79 = vector.shape_cast %78 : vector<8x16x48xbf16> to vector<128x48xbf16>
    %c0_58 = arith.constant 0 : index
    %c0_59 = arith.constant 0 : index
    %c0_60 = arith.constant 0 : index
    %80 = vector.load %arg6[%c0_58, %c0_59, %c0_60] : memref<3x48x16xbf16, #tpu.memory_space<vmem>>, vector<1x48x16xbf16>
    %81 = vector.shape_cast %80 : vector<1x48x16xbf16> to vector<48x16xbf16>
    %cst_61 = arith.constant dense<0.000000e+00> : vector<128x16xf32>
    %82 = tpu.matmul %79, %81, %cst_61 {dimension_numbers = #tpu.dot_dimension_numbers<[1], [0], [0], [1], [0, 0, 1, 1], [], []>} : vector<128x48xbf16>, vector<48x16xbf16>, vector<128x16xf32> -> vector<128x16xf32>
    %c0_62 = arith.constant 0 : index
    %c0_63 = arith.constant 0 : index
    %83 = vector.load %arg11[%c0_62, %c0_63] : memref<128x16xf32, #tpu.memory_space<vmem>>, vector<128x16xf32>
    tpu.vector_store %arg11[%c0_62, %c0_63], %82 {strides = array<i32>} : memref<128x16xf32, #tpu.memory_space<vmem>>, vector<128x16xf32>,
    %c0_64 = arith.constant 0 : index
    %c0_65 = arith.constant 0 : index
    %84 = vector.load %arg11[%c0_64, %c0_65] : memref<128x16xf32, #tpu.memory_space<vmem>>, vector<128x16xf32>
    %c1_66 = arith.constant 1 : index
    %c0_67 = arith.constant 0 : index
    %c0_68 = arith.constant 0 : index
    %85 = vector.load %arg9[%c1_66, %c0_67, %c0_68] : memref<10x18x16xbf16, #tpu.memory_space<vmem>>, vector<8x18x16xbf16>
    %86 = vector.extract_strided_slice %85 {offsets = [0, 0, 0], sizes = [8, 16, 16], strides = [1, 1, 1]} : vector<8x18x16xbf16> to vector<8x16x16xbf16>
    %87 = vector.extract_strided_slice %85 {offsets = [0, 1, 0], sizes = [8, 16, 16], strides = [1, 1, 1]} : vector<8x18x16xbf16> to vector<8x16x16xbf16>
    %88 = vector.extract_strided_slice %85 {offsets = [0, 2, 0], sizes = [8, 16, 16], strides = [1, 1, 1]} : vector<8x18x16xbf16> to vector<8x16x16xbf16>
    %89 = tpu.concatenate %86, %87, %88 in 2 : vector<8x16x16xbf16>, vector<8x16x16xbf16>, vector<8x16x16xbf16> -> vector<8x16x48xbf16>
    %90 = vector.shape_cast %89 : vector<8x16x48xbf16> to vector<128x48xbf16>
    %c1_69 = arith.constant 1 : index
    %c0_70 = arith.constant 0 : index
    %c0_71 = arith.constant 0 : index
    %91 = vector.load %arg6[%c1_69, %c0_70, %c0_71] : memref<3x48x16xbf16, #tpu.memory_space<vmem>>, vector<1x48x16xbf16>
    %92 = vector.shape_cast %91 : vector<1x48x16xbf16> to vector<48x16xbf16>
    %cst_72 = arith.constant dense<0.000000e+00> : vector<128x16xf32>
    %93 = tpu.matmul %90, %92, %cst_72 {dimension_numbers = #tpu.dot_dimension_numbers<[1], [0], [0], [1], [0, 0, 1, 1], [], []>} : vector<128x48xbf16>, vector<48x16xbf16>, vector<128x16xf32> -> vector<128x16xf32>
    %94 = arith.addf %84, %93 : vector<128x16xf32>
    %c0_73 = arith.constant 0 : index
    %c0_74 = arith.constant 0 : index
    %95 = vector.load %arg11[%c0_73, %c0_74] : memref<128x16xf32, #tpu.memory_space<vmem>>, vector<128x16xf32>
    tpu.vector_store %arg11[%c0_73, %c0_74], %94 {strides = array<i32>} : memref<128x16xf32, #tpu.memory_space<vmem>>, vector<128x16xf32>,
    %c0_75 = arith.constant 0 : index
    %c0_76 = arith.constant 0 : index
    %96 = vector.load %arg11[%c0_75, %c0_76] : memref<128x16xf32, #tpu.memory_space<vmem>>, vector<128x16xf32>
    %c2 = arith.constant 2 : index
    %c0_77 = arith.constant 0 : index
    %c0_78 = arith.constant 0 : index
    %97 = vector.load %arg9[%c2, %c0_77, %c0_78] : memref<10x18x16xbf16, #tpu.memory_space<vmem>>, vector<8x18x16xbf16>
    %98 = vector.extract_strided_slice %97 {offsets = [0, 0, 0], sizes = [8, 16, 16], strides = [1, 1, 1]} : vector<8x18x16xbf16> to vector<8x16x16xbf16>
    %99 = vector.extract_strided_slice %97 {offsets = [0, 1, 0], sizes = [8, 16, 16], strides = [1, 1, 1]} : vector<8x18x16xbf16> to vector<8x16x16xbf16>
    %100 = vector.extract_strided_slice %97 {offsets = [0, 2, 0], sizes = [8, 16, 16], strides = [1, 1, 1]} : vector<8x18x16xbf16> to vector<8x16x16xbf16>
    %101 = tpu.concatenate %98, %99, %100 in 2 : vector<8x16x16xbf16>, vector<8x16x16xbf16>, vector<8x16x16xbf16> -> vector<8x16x48xbf16>
    %102 = vector.shape_cast %101 : vector<8x16x48xbf16> to vector<128x48xbf16>
    %c2_79 = arith.constant 2 : index
    %c0_80 = arith.constant 0 : index
    %c0_81 = arith.constant 0 : index
    %103 = vector.load %arg6[%c2_79, %c0_80, %c0_81] : memref<3x48x16xbf16, #tpu.memory_space<vmem>>, vector<1x48x16xbf16>
    %104 = vector.shape_cast %103 : vector<1x48x16xbf16> to vector<48x16xbf16>
    %cst_82 = arith.constant dense<0.000000e+00> : vector<128x16xf32>
    %105 = tpu.matmul %102, %104, %cst_82 {dimension_numbers = #tpu.dot_dimension_numbers<[1], [0], [0], [1], [0, 0, 1, 1], [], []>} : vector<128x48xbf16>, vector<48x16xbf16>, vector<128x16xf32> -> vector<128x16xf32>
    %106 = arith.addf %96, %105 : vector<128x16xf32>
    %c0_83 = arith.constant 0 : index
    %c0_84 = arith.constant 0 : index
    %107 = vector.load %arg11[%c0_83, %c0_84] : memref<128x16xf32, #tpu.memory_space<vmem>>, vector<128x16xf32>
    tpu.vector_store %arg11[%c0_83, %c0_84], %106 {strides = array<i32>} : memref<128x16xf32, #tpu.memory_space<vmem>>, vector<128x16xf32>,
    %c0_85 = arith.constant 0 : index
    %c0_86 = arith.constant 0 : index
    %108 = vector.load %arg11[%c0_85, %c0_86] : memref<128x16xf32, #tpu.memory_space<vmem>>, vector<128x16xf32>
    %109 = arith.truncf %108 : vector<128x16xf32> to vector<128x16xbf16>
    %c0_87 = arith.constant 0 : index
    %c0_88 = arith.constant 0 : index
    %110 = vector.load %arg7[%c0_87, %c0_88] : memref<128x16xbf16, #tpu.memory_space<vmem>>, vector<128x16xbf16>
    tpu.vector_store %arg7[%c0_87, %c0_88], %109 {strides = array<i32>} : memref<128x16xbf16, #tpu.memory_space<vmem>>, vector<128x16xbf16>,
    %111 = arith.extf %109 : vector<128x16xbf16> to vector<128x16xf32>
    %cst_89 = arith.constant dense<0.000000e+00> : vector<16xf32>
    %112 = vector.multi_reduction <add>, %111, %cst_89 [0] : vector<128x16xf32> to vector<16xf32>
    %113 = vector.shape_cast %112 : vector<16xf32> to vector<1x16xf32>
    %114 = arith.mulf %111, %111 : vector<128x16xf32>
    %cst_90 = arith.constant dense<0.000000e+00> : vector<16xf32>
    %115 = vector.multi_reduction <add>, %114, %cst_90 [0] : vector<128x16xf32> to vector<16xf32>
    %116 = vector.shape_cast %115 : vector<16xf32> to vector<1x16xf32>
    %117 = tpu.concatenate %113, %116 in 0 : vector<1x16xf32>, vector<1x16xf32> -> vector<2x16xf32>
    %118 = vector.shape_cast %117 : vector<2x16xf32> to vector<1x2x16xf32>
    %c0_91 = arith.constant 0 : index
    %c0_92 = arith.constant 0 : index
    %c0_93 = arith.constant 0 : index
    %119 = vector.load %arg8[%c0_91, %c0_92, %c0_93] : memref<1x2x16xf32, #tpu.memory_space<vmem>>, vector<1x2x16xf32>
    tpu.vector_store %arg8[%c0_91, %c0_92, %c0_93], %118 {strides = array<i32>} : memref<1x2x16xf32, #tpu.memory_space<vmem>>, vector<1x2x16xf32>,
    return
  }
  func.func @transform_0(%arg0: i32, %arg1: i32) -> (i32, i32, i32) {
    %c2_i32 = arith.constant 2 : i32
    %0 = arith.muli %arg0, %c2_i32 : i32
    %1 = arith.addi %0, %arg1 : i32
    %c0_i32 = arith.constant 0 : i32
    %c0_i32_0 = arith.constant 0 : i32
    %c0_i32_1 = arith.constant 0 : i32
    return %1, %c0_i32, %c0_i32_0 : i32, i32, i32
  }
  func.func @transform_2(%arg0: i32, %arg1: i32) -> (i32, i32) {
    %c0_i32 = arith.constant 0 : i32
    %c0_i32_0 = arith.constant 0 : i32
    %c0_i32_1 = arith.constant 0 : i32
    return %c0_i32, %c0_i32_0 : i32, i32
  }
  func.func @transform_3(%arg0: i32, %arg1: i32) -> (i32, i32) {
    %c0_i32 = arith.constant 0 : i32
    %c0_i32_0 = arith.constant 0 : i32
    %c0_i32_1 = arith.constant 0 : i32
    return %c0_i32, %c0_i32_0 : i32, i32
  }
  func.func @transform_4(%arg0: i32, %arg1: i32) -> (i32, i32, i32) {
    %c0_i32 = arith.constant 0 : i32
    %c0_i32_0 = arith.constant 0 : i32
    %c0_i32_1 = arith.constant 0 : i32
    %c0_i32_2 = arith.constant 0 : i32
    return %c0_i32, %c0_i32_0, %c0_i32_1 : i32, i32, i32
  }
  func.func @transform_5(%arg0: i32, %arg1: i32) -> (i32, i32) {
    %c2_i32 = arith.constant 2 : i32
    %0 = arith.muli %arg0, %c2_i32 : i32
    %1 = arith.addi %0, %arg1 : i32
    %c0_i32 = arith.constant 0 : i32
    %c0_i32_0 = arith.constant 0 : i32
    return %1, %c0_i32 : i32, i32
  }
  func.func @transform_6(%arg0: i32, %arg1: i32) -> (i32, i32, i32) {
    %c2_i32 = arith.constant 2 : i32
    %0 = arith.muli %arg0, %c2_i32 : i32
    %1 = arith.addi %0, %arg1 : i32
    %c0_i32 = arith.constant 0 : i32
    %c0_i32_0 = arith.constant 0 : i32
    %c0_i32_1 = arith.constant 0 : i32
    return %1, %c0_i32, %c0_i32_0 : i32, i32, i32
  }
}

module attributes {stable_mosaic.version = 11 : i64} {
  func.func @_bn_relu_conv1x1_stats_kernel(%arg0: i32, %arg1: memref<256x16xbf16, #tpu.memory_space<vmem>>, %arg2: memref<1x16xf32, #tpu.memory_space<vmem>>, %arg3: memref<1x16xf32, #tpu.memory_space<vmem>>, %arg4: memref<16x64xbf16, #tpu.memory_space<vmem>>, %arg5: memref<256x64xbf16, #tpu.memory_space<vmem>>, %arg6: memref<1x2x64xf32, #tpu.memory_space<vmem>>) attributes {dimension_semantics = [#tpu.dimension_semantics<parallel>], iteration_bounds = array<i64: 2>, scalar_prefetch = 0 : i64, scratch_operands = 0 : i64, tpu.core_type = #tpu.core_type<tc>, window_params = [{transform_indices = @transform_0, window_bounds = array<i64: 256, 16>}, {pipeline_mode = #tpu.pipeline_mode<synchronous>, transform_indices = @transform_1, window_bounds = array<i64: 1, 16>}, {pipeline_mode = #tpu.pipeline_mode<synchronous>, transform_indices = @transform_2, window_bounds = array<i64: 1, 16>}, {pipeline_mode = #tpu.pipeline_mode<synchronous>, transform_indices = @transform_3, window_bounds = array<i64: 16, 64>}, {transform_indices = @transform_4, window_bounds = array<i64: 256, 64>}, {transform_indices = @transform_5, window_bounds = array<i64: 1, 2, 64>}]} {
    %c0 = arith.constant 0 : index
    %c0_0 = arith.constant 0 : index
    %0 = vector.load %arg1[%c0, %c0_0] : memref<256x16xbf16, #tpu.memory_space<vmem>>, vector<256x16xbf16>
    %1 = arith.extf %0 : vector<256x16xbf16> to vector<256x16xf32>
    %c0_1 = arith.constant 0 : index
    %c0_2 = arith.constant 0 : index
    %2 = vector.load %arg2[%c0_1, %c0_2] : memref<1x16xf32, #tpu.memory_space<vmem>>, vector<1x16xf32>
    %3 = vector.broadcast %2 : vector<1x16xf32> to vector<256x16xf32>
    %4 = arith.mulf %1, %3 : vector<256x16xf32>
    %c0_3 = arith.constant 0 : index
    %c0_4 = arith.constant 0 : index
    %5 = vector.load %arg3[%c0_3, %c0_4] : memref<1x16xf32, #tpu.memory_space<vmem>>, vector<1x16xf32>
    %6 = vector.broadcast %5 : vector<1x16xf32> to vector<256x16xf32>
    %7 = arith.addf %4, %6 : vector<256x16xf32>
    %cst = arith.constant 0.000000e+00 : f32
    %8 = vector.broadcast %cst : f32 to vector<256x16xf32>
    %9 = arith.maximumf %7, %8 : vector<256x16xf32>
    %10 = arith.truncf %9 : vector<256x16xf32> to vector<256x16xbf16>
    %c0_5 = arith.constant 0 : index
    %c0_6 = arith.constant 0 : index
    %11 = vector.load %arg4[%c0_5, %c0_6] : memref<16x64xbf16, #tpu.memory_space<vmem>>, vector<16x64xbf16>
    %cst_7 = arith.constant dense<0.000000e+00> : vector<256x64xf32>
    %12 = tpu.matmul %10, %11, %cst_7 {dimension_numbers = #tpu.dot_dimension_numbers<[1], [0], [0], [1], [0, 0, 1, 1], [], []>} : vector<256x16xbf16>, vector<16x64xbf16>, vector<256x64xf32> -> vector<256x64xf32>
    %13 = arith.truncf %12 : vector<256x64xf32> to vector<256x64xbf16>
    %c0_8 = arith.constant 0 : index
    %c0_9 = arith.constant 0 : index
    %14 = vector.load %arg5[%c0_8, %c0_9] : memref<256x64xbf16, #tpu.memory_space<vmem>>, vector<256x64xbf16>
    tpu.vector_store %arg5[%c0_8, %c0_9], %13 {strides = array<i32>} : memref<256x64xbf16, #tpu.memory_space<vmem>>, vector<256x64xbf16>,
    %15 = arith.extf %13 : vector<256x64xbf16> to vector<256x64xf32>
    %cst_10 = arith.constant dense<0.000000e+00> : vector<64xf32>
    %16 = vector.multi_reduction <add>, %15, %cst_10 [0] : vector<256x64xf32> to vector<64xf32>
    %17 = vector.shape_cast %16 : vector<64xf32> to vector<1x64xf32>
    %18 = arith.mulf %15, %15 : vector<256x64xf32>
    %cst_11 = arith.constant dense<0.000000e+00> : vector<64xf32>
    %19 = vector.multi_reduction <add>, %18, %cst_11 [0] : vector<256x64xf32> to vector<64xf32>
    %20 = vector.shape_cast %19 : vector<64xf32> to vector<1x64xf32>
    %21 = tpu.concatenate %17, %20 in 0 : vector<1x64xf32>, vector<1x64xf32> -> vector<2x64xf32>
    %22 = vector.shape_cast %21 : vector<2x64xf32> to vector<1x2x64xf32>
    %c0_12 = arith.constant 0 : index
    %c0_13 = arith.constant 0 : index
    %c0_14 = arith.constant 0 : index
    %23 = vector.load %arg6[%c0_12, %c0_13, %c0_14] : memref<1x2x64xf32, #tpu.memory_space<vmem>>, vector<1x2x64xf32>
    tpu.vector_store %arg6[%c0_12, %c0_13, %c0_14], %22 {strides = array<i32>} : memref<1x2x64xf32, #tpu.memory_space<vmem>>, vector<1x2x64xf32>,
    return
  }
  func.func @transform_0(%arg0: i32) -> (i32, i32) {
    %c0_i32 = arith.constant 0 : i32
    %c0_i32_0 = arith.constant 0 : i32
    return %arg0, %c0_i32 : i32, i32
  }
  func.func @transform_1(%arg0: i32) -> (i32, i32) {
    %c0_i32 = arith.constant 0 : i32
    %c0_i32_0 = arith.constant 0 : i32
    %c0_i32_1 = arith.constant 0 : i32
    return %c0_i32, %c0_i32_0 : i32, i32
  }
  func.func @transform_2(%arg0: i32) -> (i32, i32) {
    %c0_i32 = arith.constant 0 : i32
    %c0_i32_0 = arith.constant 0 : i32
    %c0_i32_1 = arith.constant 0 : i32
    return %c0_i32, %c0_i32_0 : i32, i32
  }
  func.func @transform_3(%arg0: i32) -> (i32, i32) {
    %c0_i32 = arith.constant 0 : i32
    %c0_i32_0 = arith.constant 0 : i32
    %c0_i32_1 = arith.constant 0 : i32
    return %c0_i32, %c0_i32_0 : i32, i32
  }
  func.func @transform_4(%arg0: i32) -> (i32, i32) {
    %c0_i32 = arith.constant 0 : i32
    %c0_i32_0 = arith.constant 0 : i32
    return %arg0, %c0_i32 : i32, i32
  }
  func.func @transform_5(%arg0: i32) -> (i32, i32, i32) {
    %c0_i32 = arith.constant 0 : i32
    %c0_i32_0 = arith.constant 0 : i32
    %c0_i32_1 = arith.constant 0 : i32
    return %arg0, %c0_i32, %c0_i32_0 : i32, i32, i32
  }
}

module attributes {stable_mosaic.version = 11 : i64} {
  func.func @_bn_add_relu_kernel(%arg0: i32, %arg1: memref<256x64xbf16, #tpu.memory_space<vmem>>, %arg2: memref<1x64xf32, #tpu.memory_space<vmem>>, %arg3: memref<1x64xf32, #tpu.memory_space<vmem>>, %arg4: memref<256x64xbf16, #tpu.memory_space<vmem>>, %arg5: memref<256x64xf32, #tpu.memory_space<vmem>>) attributes {dimension_semantics = [#tpu.dimension_semantics<parallel>], iteration_bounds = array<i64: 2>, scalar_prefetch = 0 : i64, scratch_operands = 0 : i64, tpu.core_type = #tpu.core_type<tc>, window_params = [{transform_indices = @transform_0, window_bounds = array<i64: 256, 64>}, {pipeline_mode = #tpu.pipeline_mode<synchronous>, transform_indices = @transform_1, window_bounds = array<i64: 1, 64>}, {pipeline_mode = #tpu.pipeline_mode<synchronous>, transform_indices = @transform_2, window_bounds = array<i64: 1, 64>}, {transform_indices = @transform_3, window_bounds = array<i64: 256, 64>}, {transform_indices = @transform_4, window_bounds = array<i64: 256, 64>}]} {
    %c0 = arith.constant 0 : index
    %c0_0 = arith.constant 0 : index
    %0 = vector.load %arg1[%c0, %c0_0] : memref<256x64xbf16, #tpu.memory_space<vmem>>, vector<256x64xbf16>
    %1 = arith.extf %0 : vector<256x64xbf16> to vector<256x64xf32>
    %c0_1 = arith.constant 0 : index
    %c0_2 = arith.constant 0 : index
    %2 = vector.load %arg2[%c0_1, %c0_2] : memref<1x64xf32, #tpu.memory_space<vmem>>, vector<1x64xf32>
    %3 = vector.broadcast %2 : vector<1x64xf32> to vector<256x64xf32>
    %4 = arith.mulf %1, %3 : vector<256x64xf32>
    %c0_3 = arith.constant 0 : index
    %c0_4 = arith.constant 0 : index
    %5 = vector.load %arg3[%c0_3, %c0_4] : memref<1x64xf32, #tpu.memory_space<vmem>>, vector<1x64xf32>
    %6 = vector.broadcast %5 : vector<1x64xf32> to vector<256x64xf32>
    %7 = arith.addf %4, %6 : vector<256x64xf32>
    %c0_5 = arith.constant 0 : index
    %c0_6 = arith.constant 0 : index
    %8 = vector.load %arg4[%c0_5, %c0_6] : memref<256x64xbf16, #tpu.memory_space<vmem>>, vector<256x64xbf16>
    %9 = arith.extf %8 : vector<256x64xbf16> to vector<256x64xf32>
    %10 = arith.addf %7, %9 : vector<256x64xf32>
    %cst = arith.constant 0.000000e+00 : f32
    %11 = vector.broadcast %cst : f32 to vector<256x64xf32>
    %12 = arith.maximumf %10, %11 : vector<256x64xf32>
    %c0_7 = arith.constant 0 : index
    %c0_8 = arith.constant 0 : index
    %13 = vector.load %arg5[%c0_7, %c0_8] : memref<256x64xf32, #tpu.memory_space<vmem>>, vector<256x64xf32>
    tpu.vector_store %arg5[%c0_7, %c0_8], %12 {strides = array<i32>} : memref<256x64xf32, #tpu.memory_space<vmem>>, vector<256x64xf32>,
    return
  }
  func.func @transform_0(%arg0: i32) -> (i32, i32) {
    %c0_i32 = arith.constant 0 : i32
    %c0_i32_0 = arith.constant 0 : i32
    return %arg0, %c0_i32 : i32, i32
  }
  func.func @transform_1(%arg0: i32) -> (i32, i32) {
    %c0_i32 = arith.constant 0 : i32
    %c0_i32_0 = arith.constant 0 : i32
    %c0_i32_1 = arith.constant 0 : i32
    return %c0_i32, %c0_i32_0 : i32, i32
  }
  func.func @transform_2(%arg0: i32) -> (i32, i32) {
    %c0_i32 = arith.constant 0 : i32
    %c0_i32_0 = arith.constant 0 : i32
    %c0_i32_1 = arith.constant 0 : i32
    return %c0_i32, %c0_i32_0 : i32, i32
  }
  func.func @transform_3(%arg0: i32) -> (i32, i32) {
    %c0_i32 = arith.constant 0 : i32
    %c0_i32_0 = arith.constant 0 : i32
    return %arg0, %c0_i32 : i32, i32
  }
  func.func @transform_4(%arg0: i32) -> (i32, i32) {
    %c0_i32 = arith.constant 0 : i32
    %c0_i32_0 = arith.constant 0 : i32
    return %arg0, %c0_i32 : i32, i32
  }
}

</mosaic_0001>

<bundles_post_ra>
// kernel: bottleneck_forward.7
= control target key start
LH: loop header
LB: loop body
LE: loop exit
PB: predicated region body
PF: predicated region fallthrough
CT: control target
= control target key end

     0   :  { %9 = vsyncpa [#allocation3], 0  ;;  %s1206_s0 = inlined_call_operand.vmem [shape: bf16[512,64], index: 0, kind: input, shape index: {}]   ;;  %s1207_s1 = inlined_call_operand.vmem [shape: f32[1,64], index: 1, kind: input, shape index: {}]   ;;  %s1208_s2 = inlined_call_operand.vmem [shape: f32[1,64], index: 2, kind: input, shape index: {}]   ;;  %s1209_s3 = inlined_call_operand.vmem [shape: bf16[512,64], index: 3, kind: input, shape index: {}]   ;;  %s1210_s4 = inlined_call_operand.hbm [shape: f32[512,64], index: 4, kind: output, shape index: {}]  }
   0x1   :  { %11 = vsyncpa [#allocation3 + $0x1], 0  ;;  %s920_s15 = smov 0   ;;  %s922_s16 = smov 0  }
   0x2   :  { %s924_s17 = smov 0   ;;  %s926_s18 = smov 0  }
   0x3 LB: > { %s941_s19 = sadd.s32 4294967295, %s890_s18   ;;  %s612_s20 = sadd.s32 4294967294, %s890_s18   ;;  %s890_s18 = sphi %s926_s18, %s1216_s18   ;;  %s886_s17 = sphi %s924_s17, %s1215_s17   ;;  %s882_s16 = sphi %s922_s16, %s1214_s16   ;;  %s878_s15 = sphi %s920_s15, %s1213_s15  }
   0x4   : > { %s945_s21 = sadd.s32 1, %s890_s18   ;;  %s118_s22 = sadd.s32 1, %s886_s17 }
   0x5   : > { %s115_s23 = ssub.s32 %s890_s18, %s945_s21  ;;  %p128_p0 = scmp.ne.s32.totalorder %s886_s17, %s882_s16 }
   0x6   : > { %p116_p1 = scmp.eq.s32.totalorder %s115_s23, 0  ;;  %p129_p2 = scmp.eq.s32.totalorder %s941_s19, 1 }
   0x7   : > { %p134_p3 = scmp.ne.s32.totalorder %s882_s16, %s878_s15  ;;  %p135_p4 = scmp.eq.s32.totalorder %s612_s20, 1 }
   0x8   : > { %s956_s24 = scalar_select %p116_p1, %s886_s17, %s118_s22  }
   0x9   : > { %p958_p5 = por %p129_p2, %p128_p0  ;;  %p962_p6 = por %p135_p4, %p134_p3 }
   0xa   : > { %p615_p7 = scmp.ge.s32.totalorder %s890_s18, 1  ;;  %p177_p8 = scmp.lt.s32.totalorder %s890_s18, 3 }
   0xc   : > { %p178_p9 = pnand %p615_p7, %p177_p8 }
   0xd   : > { %s617_s27 = sshll.u32 (!%p178_p9), %s941_s19, 5  ;;  %v982_v0 = vld [vmem:[%s1207_s1] ss:$0 sm:$0xff] (!%p178_p9)  ;;  %vm491_vm0 = vcmask (!%p178_p9), 523264   ;;  %s205_s11 = sand.u32 (!%p178_p9), 1, %s882_s16  }
   0xe   : > { %181 = sbr.rel (%p178_p9) target bundleno = 93 (0x5d), region = 36  ;;  %p209_p10 = scmp.lt.s32.totalorder (!%p178_p9), %s617_s27, 63  ;;  %v994_v11 = vld [vmem:[%s1208_s2] ss:$0 sm:$0xff] (!%p178_p9) }
   0xf   : > { %s616_s14 = sshll.u32 (!%p178_p9), %s205_s11, 8  ;;  %s628_s22 = sshll.u32 (!%p178_p9), %s941_s19, 12 }
  0x10   : > { %s1018_s20 = scalar_lea.vmem (!%p178_p9), [#allocation2], %s616_s14  ;;  %s1155_s29 = scalar_lea.hbm (!%p178_p9), %s1210_s4, %s628_s22 }
  0x11   : > { %s538_s23 = sshll.u32 (!%p178_p9), %s1018_s20, 4  ;;  %s1165_s19 = scalar_lea.sflag (!%p178_p9), [#allocation3], %s205_s11  ;;  %s1157_s23 = int_to_ptr.vmem [resolvable:$true] %s538_s23 }
  0x12   : > { %s828_s30 = scalar_lea.vmem (!%p178_p9), %s1157_s23, 4096 }
  0x13   : > { %p829_p11 = scmp.ne.s32.totalorder (!%p178_p9), %s1157_s23, %s828_s30 }
  0x15   : > { %s1218_s27 = smov (!%p209_p10, %s617_s27), 63  ;;  %p830_p12 = pnand %p829_p11, %p958_p5 }
  0x16   : > { %s618_s28 = sshll.u32 %s1218_s27, 2 }
  0x17   : > { %s972_s5 = scalar_lea.vmem %s1206_s0, %s618_s28  ;;  %s977_s8 = scalar_lea.vmem %s1209_s3, %s618_s28 }
  0x18   : > { %v630_v1 = vld [vmem:[%s972_s5] sm:$0xff]   ;;  %v757_v3 = vld [vmem:[%s972_s5 + $0x8] sm:$0xff]   ;;  %v758_v9 = vld [vmem:[%s972_s5 + $0x10] sm:$0xff]   ;;  %p831_p13 = pneg %p830_p12 }
  0x19   : > { %v694_v2 = vld [vmem:[%s977_s8] sm:$0xff]   ;;  %v631_v4 = vunpack.c.l.bf16 %v630_v1  ;;  %v632_v6 = vunpack.c.h.bf16 %v630_v1  ;;  %v772_v8 = vld [vmem:[%s977_s8 + $0x8] sm:$0xff]   ;;  %v773_v10 = vld [vmem:[%s977_s8 + $0x10] sm:$0xff]   ;;  %v635_v12 = vunpack.c.l.bf16 %v757_v3  ;;  %v636_v14 = vunpack.c.h.bf16 %v757_v3 }
  0x1a   : > { %v695_v5 = vunpack.c.l.bf16 %v694_v2  ;;  %v696_v7 = vunpack.c.h.bf16 %v694_v2  ;;  %v699_v13 = vunpack.c.l.bf16 %v772_v8  ;;  %v700_v15 = vunpack.c.h.bf16 %v772_v8  ;;  %v759_v16 = vld [vmem:[%s972_s5 + $0x18] sm:$0xff]   ;;  %v760_v42 = vld [vmem:[%s972_s5 + $0x20] sm:$0xff]   ;;  %v761_v52 = vld [vmem:[%s972_s5 + $0x28] sm:$0xff]  }
  0x1b   : > { %v292_v17 = vmul.f32 %v631_v4, %v982_v0  ;;  %v293_v18 = vmul.f32 %v632_v6, %v982_v0  ;;  %v639_v19 = vunpack.c.l.bf16 %v758_v9  ;;  %v703_v20 = vunpack.c.l.bf16 %v773_v10  ;;  %v774_v21 = vld [vmem:[%s977_s8 + $0x18] sm:$0xff]   ;;  %v775_v47 = vld [vmem:[%s977_s8 + $0x20] sm:$0xff]   ;;  %v776_v57 = vld [vmem:[%s977_s8 + $0x28] sm:$0xff]  }
  0x1c   : > { %v294_v22 = vmul.f32 %v635_v12, %v982_v0  ;;  %v295_v23 = vmul.f32 %v636_v14, %v982_v0  ;;  %v640_v24 = vunpack.c.h.bf16 %v758_v9  ;;  %v704_v25 = vunpack.c.h.bf16 %v773_v10  ;;  %v762_v62 = vld [vmem:[%s972_s5 + $0x30] sm:$0xff]   ;;  %v763_v14 = vld [vmem:[%s972_s5 + $0x38] sm:$0xff]  }
  0x1d   : > { %v331_v26 = vadd.f32 %v994_v11, %v292_v17  ;;  %v332_v27 = vadd.f32 %v994_v11, %v293_v18  ;;  %v296_v28 = vmul.f32 %v639_v19, %v982_v0  ;;  %v643_v29 = vunpack.c.l.bf16 %v759_v16  ;;  %v777_v4 = vld [vmem:[%s977_s8 + $0x30] sm:$0xff]  }
  0x1e   : > { %v333_v30 = vadd.f32 %v994_v11, %v294_v22  ;;  %v334_v31 = vadd.f32 %v994_v11, %v295_v23  ;;  %v297_v32 = vmul.f32 %v640_v24, %v982_v0  ;;  %v707_v33 = vunpack.c.l.bf16 %v774_v21  ;;  %v778_v23 = vld [vmem:[%s977_s8 + $0x38] sm:$0xff]  }
  0x1f   : > { %v427_v34 = vadd.f32 %v695_v5, %v331_v26  ;;  %v428_v35 = vadd.f32 %v696_v7, %v332_v27  ;;  %v335_v36 = vadd.f32 %v994_v11, %v296_v28  ;;  %v298_v37 = vmul.f32 %v643_v29, %v982_v0 }
  0x20   : > { %v429_v38 = vadd.f32 %v699_v13, %v333_v30  ;;  %v430_v39 = vadd.f32 %v700_v15, %v334_v31  ;;  %v336_v40 = vadd.f32 %v994_v11, %v297_v32  ;;  %v644_v41 = vunpack.c.h.bf16 %v759_v16  ;;  %v764_v32 = vld [vmem:[%s972_s5 + $0x40] sm:$0xff]  }
  0x21   : > { %v459_v43 = vmax.f32 %v427_v34, 0.0  ;;  %v460_v44 = vmax.f32 %v428_v35, 0.0  ;;  %v431_v45 = vadd.f32 %v703_v20, %v335_v36  ;;  %v337_v46 = vadd.f32 %v994_v11, %v298_v37  ;;  %v779_v37 = vld [vmem:[%s977_s8 + $0x40] sm:$0xff]  }
  0x22   : > { %v461_v48 = vmax.f32 %v429_v38, 0.0  ;;  %v462_v49 = vmax.f32 %v430_v39, 0.0  ;;  %v432_v50 = vadd.f32 %v704_v25, %v336_v40  ;;  %v299_v51 = vmul.f32 %v644_v41, %v982_v0 }
  0x23   : > { %492 = vst.msk [vmem:[%s1018_s20] sm:$0xff] %vm491_vm0, %v459_v43  ;;  %493 = vst.msk [vmem:[%s1018_s20 + $0x8] sm:$0xff] %vm491_vm0, %v460_v44  ;;  %v463_v53 = vmax.f32 %v431_v45, 0.0  ;;  %v433_v54 = vadd.f32 %v707_v33, %v337_v46  ;;  %v708_v55 = vunpack.c.h.bf16 %v774_v21  ;;  %v647_v56 = vunpack.c.l.bf16 %v760_v42  ;;  %v765_v46 = vld [vmem:[%s972_s5 + $0x48] sm:$0xff]  }
  0x24   : > { %494 = vst.msk [vmem:[%s1018_s20 + $0x10] sm:$0xff] %vm491_vm0, %v461_v48  ;;  %495 = vst.msk [vmem:[%s1018_s20 + $0x18] sm:$0xff] %vm491_vm0, %v462_v49  ;;  %v464_v58 = vmax.f32 %v432_v50, 0.0  ;;  %v338_v59 = vadd.f32 %v994_v11, %v299_v51  ;;  %v711_v60 = vunpack.c.l.bf16 %v775_v47  ;;  %v648_v61 = vunpack.c.h.bf16 %v760_v42 }
  0x25   : > { %496 = vst.msk [vmem:[%s1018_s20 + $0x20] sm:$0xff] %vm491_vm0, %v463_v53  ;;  %v465_v63 = vmax.f32 %v433_v54, 0.0  ;;  %v300_v1 = vmul.f32 %v647_v56, %v982_v0  ;;  %v712_v2 = vunpack.c.h.bf16 %v775_v47  ;;  %v651_v3 = vunpack.c.l.bf16 %v761_v52  ;;  %v780_v47 = vld [vmem:[%s977_s8 + $0x48] sm:$0xff]   ;;  %v766_v56 = vld [vmem:[%s972_s5 + $0x50] sm:$0xff]  }
  0x26   : > { %497 = vst.msk [vmem:[%s1018_s20 + $0x28] sm:$0xff] %vm491_vm0, %v464_v58  ;;  %v434_v5 = vadd.f32 %v708_v55, %v338_v59  ;;  %v301_v6 = vmul.f32 %v648_v61, %v982_v0  ;;  %v715_v7 = vunpack.c.l.bf16 %v776_v57  ;;  %v652_v8 = vunpack.c.h.bf16 %v761_v52  ;;  %v781_v61 = vld [vmem:[%s977_s8 + $0x50] sm:$0xff]  }
  0x27   : > { %498 = vst.msk [vmem:[%s1018_s20 + $0x30] sm:$0xff] %vm491_vm0, %v465_v63  ;;  %v339_v9 = vadd.f32 %v994_v11, %v300_v1  ;;  %v302_v10 = vmul.f32 %v651_v3, %v982_v0  ;;  %v716_v12 = vunpack.c.h.bf16 %v776_v57  ;;  %v655_v13 = vunpack.c.l.bf16 %v762_v62 }
  0x28   : > { %v466_v15 = vmax.f32 %v434_v5, 0.0  ;;  %v340_v16 = vadd.f32 %v994_v11, %v301_v6  ;;  %v303_v17 = vmul.f32 %v652_v8, %v982_v0  ;;  %v719_v18 = vunpack.c.l.bf16 %v777_v4 }
  0x29   : > { %v435_v19 = vadd.f32 %v711_v60, %v339_v9  ;;  %v341_v20 = vadd.f32 %v994_v11, %v302_v10  ;;  %v304_v21 = vmul.f32 %v655_v13, %v982_v0  ;;  %v656_v22 = vunpack.c.h.bf16 %v762_v62 }
  0x2a   : > { %499 = vst.msk [vmem:[%s1018_s20 + $0x38] sm:$0xff] %vm491_vm0, %v466_v15  ;;  %v436_v24 = vadd.f32 %v712_v2, %v340_v16  ;;  %v342_v25 = vadd.f32 %v994_v11, %v303_v17  ;;  %v720_v26 = vunpack.c.h.bf16 %v777_v4  ;;  %v659_v27 = vunpack.c.l.bf16 %v763_v14  ;;  %v782_v17 = vld [vmem:[%s977_s8 + $0x58] sm:$0xff]  }
  0x2b   : > { %v467_v28 = vmax.f32 %v435_v19, 0.0  ;;  %v437_v29 = vadd.f32 %v715_v7, %v341_v20  ;;  %v343_v30 = vadd.f32 %v994_v11, %v304_v21  ;;  %v305_v31 = vmul.f32 %v656_v22, %v982_v0 }
  0x2c   : > { %v468_v33 = vmax.f32 %v436_v24, 0.0  ;;  %v438_v34 = vadd.f32 %v716_v12, %v342_v25  ;;  %v306_v35 = vmul.f32 %v659_v27, %v982_v0  ;;  %v723_v36 = vunpack.c.l.bf16 %v778_v23  ;;  %v767_v12 = vld [vmem:[%s972_s5 + $0x58] sm:$0xff]  }
  0x2d   : > { %500 = vst.msk [vmem:[%s1018_s20 + $0x40] sm:$0xff] %vm491_vm0, %v467_v28  ;;  %v469_v38 = vmax.f32 %v437_v29, 0.0  ;;  %v439_v39 = vadd.f32 %v719_v18, %v343_v30  ;;  %v344_v40 = vadd.f32 %v994_v11, %v305_v31  ;;  %v660_v41 = vunpack.c.h.bf16 %v763_v14  ;;  %v783_v31 = vld [vmem:[%s977_s8 + $0x60] sm:$0xff]  }
  0x2e   : > { %501 = vst.msk [vmem:[%s1018_s20 + $0x48] sm:$0xff] %vm491_vm0, %v468_v33  ;;  %v470_v42 = vmax.f32 %v438_v34, 0.0  ;;  %v345_v43 = vadd.f32 %v994_v11, %v306_v35  ;;  %v724_v44 = vunpack.c.h.bf16 %v778_v23  ;;  %v663_v45 = vunpack.c.l.bf16 %v764_v32 }
  0x2f   : > { %502 = vst.msk [vmem:[%s1018_s20 + $0x50] sm:$0xff] %vm491_vm0, %v469_v38  ;;  %v471_v48 = vmax.f32 %v439_v39, 0.0  ;;  %v440_v49 = vadd.f32 %v720_v26, %v344_v40  ;;  %v307_v50 = vmul.f32 %v660_v41, %v982_v0  ;;  %v727_v51 = vunpack.c.l.bf16 %v779_v37  ;;  %v768_v26 = vld [vmem:[%s972_s5 + $0x60] sm:$0xff]   ;;  %v769_v40 = vld [vmem:[%s972_s5 + $0x68] sm:$0xff]  }
  0x30   : > { %503 = vst.msk [vmem:[%s1018_s20 + $0x58] sm:$0xff] %vm491_vm0, %v470_v42  ;;  %v441_v52 = vadd.f32 %v723_v36, %v345_v43  ;;  %v308_v53 = vmul.f32 %v663_v45, %v982_v0  ;;  %v664_v54 = vunpack.c.h.bf16 %v764_v32  ;;  %v728_v55 = vunpack.c.h.bf16 %v779_v37  ;;  %v784_v41 = vld [vmem:[%s977_s8 + $0x68] sm:$0xff]  }
  0x31   : > { %504 = vst.msk [vmem:[%s1018_s20 + $0x60] sm:$0xff] %vm491_vm0, %v471_v48  ;;  %v472_v57 = vmax.f32 %v440_v49, 0.0  ;;  %v346_v58 = vadd.f32 %v994_v11, %v307_v50  ;;  %v667_v59 = vunpack.c.l.bf16 %v765_v46  ;;  %v731_v60 = vunpack.c.l.bf16 %v780_v47  ;;  %v770_v50 = vld [vmem:[%s972_s5 + $0x70] sm:$0xff]  }
  0x32   : > { %v473_v62 = vmax.f32 %v441_v52, 0.0  ;;  %v347_v63 = vadd.f32 %v994_v11, %v308_v53  ;;  %v309_v1 = vmul.f32 %v664_v54, %v982_v0  ;;  %v668_v2 = vunpack.c.h.bf16 %v765_v46 }
  0x33   : > { %505 = vst.msk [vmem:[%s1018_s20 + $0x68] sm:$0xff] %vm491_vm0, %v472_v57  ;;  %v442_v3 = vadd.f32 %v724_v44, %v346_v58  ;;  %v310_v4 = vmul.f32 %v667_v59, %v982_v0  ;;  %v732_v5 = vunpack.c.h.bf16 %v780_v47  ;;  %v671_v6 = vunpack.c.l.bf16 %v766_v56  ;;  %v785_v59 = vld [vmem:[%s977_s8 + $0x70] sm:$0xff]  }
  0x34   : > { %506 = vst.msk [vmem:[%s1018_s20 + $0x70] sm:$0xff] %vm491_vm0, %v473_v62  ;;  %v443_v7 = vadd.f32 %v727_v51, %v347_v63  ;;  %v348_v8 = vadd.f32 %v994_v11, %v309_v1  ;;  %v311_v9 = vmul.f32 %v668_v2, %v982_v0  ;;  %v735_v10 = vunpack.c.l.bf16 %v781_v61 }
  0x35   : > { %v474_v13 = vmax.f32 %v442_v3, 0.0  ;;  %v349_v14 = vadd.f32 %v994_v11, %v310_v4  ;;  %v312_v15 = vmul.f32 %v671_v6, %v982_v0  ;;  %v672_v16 = vunpack.c.h.bf16 %v766_v56 }
  0x36   : > { %v475_v18 = vmax.f32 %v443_v7, 0.0  ;;  %v444_v19 = vadd.f32 %v728_v55, %v348_v8  ;;  %v350_v20 = vadd.f32 %v994_v11, %v311_v9  ;;  %v736_v21 = vunpack.c.h.bf16 %v781_v61 }
  0x37   : > { %507 = vst.msk [vmem:[%s1018_s20 + $0x78] sm:$0xff] %vm491_vm0, %v474_v13  ;;  %v445_v22 = vadd.f32 %v731_v60, %v349_v14  ;;  %v351_v23 = vadd.f32 %v994_v11, %v312_v15  ;;  %v313_v24 = vmul.f32 %v672_v16, %v982_v0  ;;  %v675_v25 = vunpack.c.l.bf16 %v767_v12 }
  0x38   : > { %508 = vst.msk [vmem:[%s1018_s20 + $0x80] sm:$0xff] %vm491_vm0, %v475_v18  ;;  %v476_v27 = vmax.f32 %v444_v19, 0.0  ;;  %v446_v28 = vadd.f32 %v732_v5, %v350_v20  ;;  %v739_v29 = vunpack.c.l.bf16 %v782_v17  ;;  %v676_v30 = vunpack.c.h.bf16 %v767_v12  ;;  %v771_v5 = vld [vmem:[%s972_s5 + $0x78] sm:$0xff]   ;;  %s892_s5 = smov [#allocation2]  }
  0x39   : > { %v477_v32 = vmax.f32 %v445_v22, 0.0  ;;  %v447_v33 = vadd.f32 %v735_v10, %v351_v23  ;;  %v352_v34 = vadd.f32 %v994_v11, %v313_v24  ;;  %v314_v35 = vmul.f32 %v675_v25, %v982_v0  ;;  %v786_v10 = vld [vmem:[%s977_s8 + $0x78] sm:$0xff]   ;;  %s832_s6 = sshll.u32 %s892_s5, 4  ;;  %s833_s6 = int_to_ptr.vmem [resolvable:$false] %s832_s6 }
  0x3a   : > { %509 = vst.msk [vmem:[%s1018_s20 + $0x88] sm:$0xff] %vm491_vm0, %v476_v27  ;;  %v478_v36 = vmax.f32 %v446_v28, 0.0  ;;  %v315_v37 = vmul.f32 %v676_v30, %v982_v0  ;;  %v740_v38 = vunpack.c.h.bf16 %v782_v17  ;;  %v679_v39 = vunpack.c.l.bf16 %v768_v26  ;;  %s834_s7 = scalar_lea.vmem %s833_s6, 8192  ;;  %p835_p0 = scmp.lt.s32.totalorder %s1157_s23, %s833_s6 }
  0x3b   : > { %510 = vst.msk [vmem:[%s1018_s20 + $0x90] sm:$0xff] %vm491_vm0, %v477_v32  ;;  %v479_v42 = vmax.f32 %v447_v33, 0.0  ;;  %v448_v43 = vadd.f32 %v736_v21, %v352_v34  ;;  %v353_v44 = vadd.f32 %v994_v11, %v314_v35  ;;  %v743_v45 = vunpack.c.l.bf16 %v783_v31  ;;  %p836_p1 = scmp.lt.s32.totalorder %s834_s7, %s828_s30 }
  0x3c   : > { %511 = vst.msk [vmem:[%s1018_s20 + $0x98] sm:$0xff] %vm491_vm0, %v478_v36  ;;  %v354_v46 = vadd.f32 %v994_v11, %v315_v37  ;;  %v316_v47 = vmul.f32 %v679_v39, %v982_v0  ;;  %v680_v48 = vunpack.c.h.bf16 %v768_v26  ;;  %v744_v49 = vunpack.c.h.bf16 %v783_v31 }
  0x3d   : > { %512 = vst.msk [vmem:[%s1018_s20 + $0xa0] sm:$0xff] %vm491_vm0, %v479_v42  ;;  %v480_v51 = vmax.f32 %v448_v43, 0.0  ;;  %v449_v52 = vadd.f32 %v739_v29, %v353_v44  ;;  %v683_v53 = vunpack.c.l.bf16 %v769_v40  ;;  %v747_v54 = vunpack.c.l.bf16 %v784_v41  ;;  %p837_p2 = por %p836_p1, %p835_p0 }
  0x3e   : > { %v450_v55 = vadd.f32 %v740_v38, %v354_v46  ;;  %v355_v56 = vadd.f32 %v994_v11, %v316_v47  ;;  %v317_v57 = vmul.f32 %v680_v48, %v982_v0  ;;  %v684_v58 = vunpack.c.h.bf16 %v769_v40 }
  0x3f   : > { %513 = vst.msk [vmem:[%s1018_s20 + $0xa8] sm:$0xff] %vm491_vm0, %v480_v51  ;;  %v481_v60 = vmax.f32 %v449_v52, 0.0  ;;  %v318_v61 = vmul.f32 %v683_v53, %v982_v0  ;;  %v748_v62 = vunpack.c.h.bf16 %v784_v41  ;;  %v687_v63 = vunpack.c.l.bf16 %v770_v50  ;;  %p838_p3 = pnand %p837_p2, %p831_p13 }
  0x40   : > { %v482_v1 = vmax.f32 %v450_v55, 0.0  ;;  %v451_v2 = vadd.f32 %v743_v45, %v355_v56  ;;  %v356_v3 = vadd.f32 %v994_v11, %v317_v57  ;;  %v319_v4 = vmul.f32 %v684_v58, %v982_v0 }
  0x41   : > { %514 = vst.msk [vmem:[%s1018_s20 + $0xb0] sm:$0xff] %vm491_vm0, %v481_v60  ;;  %v357_v6 = vadd.f32 %v994_v11, %v318_v61  ;;  %v320_v7 = vmul.f32 %v687_v63, %v982_v0  ;;  %v751_v8 = vunpack.c.l.bf16 %v785_v59  ;;  %v688_v9 = vunpack.c.h.bf16 %v770_v50 }
  0x42   : > { %515 = vst.msk [vmem:[%s1018_s20 + $0xb8] sm:$0xff] %vm491_vm0, %v482_v1  ;;  %v483_v12 = vmax.f32 %v451_v2, 0.0  ;;  %v452_v13 = vadd.f32 %v744_v49, %v356_v3  ;;  %v358_v14 = vadd.f32 %v994_v11, %v319_v4  ;;  %v752_v15 = vunpack.c.h.bf16 %v785_v59 }
  0x43   : > { %v453_v16 = vadd.f32 %v747_v54, %v357_v6  ;;  %v359_v17 = vadd.f32 %v994_v11, %v320_v7  ;;  %v321_v18 = vmul.f32 %v688_v9, %v982_v0  ;;  %v691_v19 = vunpack.c.l.bf16 %v771_v5 }
  0x44   : > { %516 = vst.msk [vmem:[%s1018_s20 + $0xc0] sm:$0xff] %vm491_vm0, %v483_v12  ;;  %v484_v20 = vmax.f32 %v452_v13, 0.0  ;;  %v454_v21 = vadd.f32 %v748_v62, %v358_v14  ;;  %v755_v22 = vunpack.c.l.bf16 %v786_v10  ;;  %v692_v23 = vunpack.c.h.bf16 %v771_v5 }
  0x45   : > { %v485_v24 = vmax.f32 %v453_v16, 0.0  ;;  %v455_v25 = vadd.f32 %v751_v8, %v359_v17  ;;  %v360_v26 = vadd.f32 %v994_v11, %v321_v18  ;;  %v322_v27 = vmul.f32 %v691_v19, %v982_v0 }
  0x46   : > { %517 = vst.msk [vmem:[%s1018_s20 + $0xc8] sm:$0xff] %vm491_vm0, %v484_v20  ;;  %v486_v28 = vmax.f32 %v454_v21, 0.0  ;;  %v323_v29 = vmul.f32 %v692_v23, %v982_v0  ;;  %v756_v30 = vunpack.c.h.bf16 %v786_v10 }
  0x47   : > { %518 = vst.msk [vmem:[%s1018_s20 + $0xd0] sm:$0xff] %vm491_vm0, %v485_v24  ;;  %v487_v31 = vmax.f32 %v455_v25, 0.0  ;;  %v456_v32 = vadd.f32 %v752_v15, %v360_v26  ;;  %v361_v33 = vadd.f32 %v994_v11, %v322_v27 }
  0x48   : > { %519 = vst.msk [vmem:[%s1018_s20 + $0xd8] sm:$0xff] %vm491_vm0, %v486_v28  ;;  %v362_v34 = vadd.f32 %v994_v11, %v323_v29 }
  0x49   : > { %520 = vst.msk [vmem:[%s1018_s20 + $0xe0] sm:$0xff] %vm491_vm0, %v487_v31  ;;  %v488_v0 = vmax.f32 %v456_v32, 0.0  ;;  %v457_v35 = vadd.f32 %v755_v22, %v361_v33 }
  0x4a   : > { %v458_v36 = vadd.f32 %v756_v30, %v362_v34 }
  0x4b   : > { %521 = vst.msk [vmem:[%s1018_s20 + $0xe8] sm:$0xff] %vm491_vm0, %v488_v0  ;;  %v489_v37 = vmax.f32 %v457_v35, 0.0 }
  0x4c   : > { %v490_v11 = vmax.f32 %v458_v36, 0.0 }
  0x4d   : > { %522 = vst.msk [vmem:[%s1018_s20 + $0xf0] sm:$0xff] %vm491_vm0, %v489_v37 }
  0x4e   : > { %523 = vst.msk [vmem:[%s1018_s20 + $0xf8] sm:$0xff] %vm491_vm0, %v490_v11 }
  0x4f   : > { %841 = shalt.err (!%p838_p3)
}
  0x50   : > { %s842_s8 = scalar_lea.hbm %s1155_s29, 4096  ;;  %s846_s11 = scalar_lea.hbm %s1210_s4, 8192 }
  0x51   : > { %p843_p4 = scmp.ne.s32.totalorder %s1155_s29, %s842_s8  ;;  %p847_p9 = scmp.lt.u32.totalorder %s1155_s29, %s1210_s4 }
  0x52   : > { %p848_p10 = scmp.lt.u32.totalorder %s846_s11, %s842_s8  ;;  %p850_p12 = scmp.lt.u32.totalorder %s842_s8, %s1155_s29 }
  0x53   : > { %p844_p7 = pnand %p843_p4, %p958_p5 }
  0x54   : > { %p849_p11 = por %p848_p10, %p847_p9 }
  0x55   : > { %p845_p8 = pneg %p844_p7 }
  0x56   : > { %p851_p13 = por %p850_p12, %p849_p11 }
  0x58   : > { %p852_p0 = pnand %p851_p13, %p845_p8 }
  0x5a   : > { %855 = shalt.err (!%p852_p0)
}
  0x5b   : > { %s893_s14 = smov 128   ;;  %s894_s20 = smov 8  }
  0x5c   : > { %787 = dma.vmem_to_hbm [thread:$0]  (%p958_p5), %s1157_s23, 4096, %s1155_s29, %s1165_s19, %s893_s14, %s893_s14, %s894_s20  }
  0x5d PF: > { %p793_p1 = scmp.ge.s32.totalorder %s890_s18, 2  ;;  %s553_s22 = sand.u32 1, %s878_s15  }
  0x5e   : > { %s554_s27 = scalar_lea.sflag [#allocation3], %s553_s22 }
  0x5f   : > { %p790_p2 = pnand %p793_p1, %p962_p6 }
  0x61   : > { %873 = dma.done.wait (!%p790_p2), %s554_s27, 4096  }
  0x62   : > { %875 = vsyncadd (!%p790_p2), %s554_s27, 4294963200  ;;  %p14_p3 = scmp.ge.s32.totalorder %s945_s21, 4   ;;  %s1213_s15 = smov %s882_s16 }
  0x63   : > { %s1214_s16 = smov %s886_s17  ;;  %s1215_s17 = smov %s956_s24 }
  0x64   : > { %s1216_s18 = smov %s945_s21  ;;  %16 = sbr.rel (!%p14_p3) target bundleno = 3 (0x3), region = 74 }
  0x6b   :  { %559 = vsyncpa [#allocation3], 1 }
  0x6c   :  { %561 = vsyncpa [#allocation3 + $0x1], 1 }

// kernel: bottleneck_forward.4
= control target key start
LH: loop header
LB: loop body
LE: loop exit
PB: predicated region body
PF: predicated region fallthrough
CT: control target
= control target key end

     0   :  { %s1231_s12 = smov 0   ;;  %s1507_s0 = inlined_call_operand.vmem [shape: bf16[512,64], index: 0, kind: input, shape index: {}]   ;;  %s1508_s1 = inlined_call_operand.vmem [shape: bf16[64,16], index: 1, kind: input, shape index: {}]   ;;  %s1509_s2 = inlined_call_operand.vmem [shape: bf16[512,16], index: 2, kind: output, shape index: {0}]   ;;  %s1510_s3 = inlined_call_operand.vmem [shape: f32[2,2,16], index: 3, kind: output, shape index: {1}]  }
   0x1 LB: > { %s1237_s13 = sadd.s32 4294967295, %s1209_s12   ;;  %p999_p0 = scmp.ge.s32.totalorder %s1209_s12, 1  ;;  %s1209_s12 = sphi %s1231_s12, %s14_s12  }
   0x2   : > { %p141_p1 = scmp.lt.s32.totalorder %s1209_s12, 3 }
   0x4   : > { %p142_p2 = pnand %p999_p0, %p141_p1 }
   0x5   : > { %v1183_v0 = vld [vmem:[%s1508_s1] sm:$0xff] (!%p142_p2)   ;;  %s1000_s16 = sshll.u32 (!%p142_p2), %s1237_s13, 5  ;;  %v1184_v1 = vld [vmem:[%s1508_s1 + $0x8] sm:$0xff] (!%p142_p2)   ;;  %v1185_v2 = vld [vmem:[%s1508_s1 + $0x10] sm:$0xff] (!%p142_p2)   ;;  %vm330_vm0 = vcmask (!%p142_p2), 523264   ;;  %vm668_vm1 = vcmask (!%p142_p2), 125952  }
   0x6   : > { %145 = sbr.rel (%p142_p2) target bundleno = 322 (0x142), region = 28  ;;  %p170_p3 = scmp.lt.s32.totalorder (!%p142_p2), %s1000_s16, 63  ;;  %1127 = vmatprep.subr.bf16.mxu0 (!%p142_p2), %v1183_v0  ;;  %1167 = vmatprep.subr.bf16.mxu1 (!%p142_p2), %v1183_v0  ;;  %v1186_v4 = vld [vmem:[%s1508_s1 + $0x18] sm:$0xff] (!%p142_p2)   ;;  %vm733_vm2 = vcmask (!%p142_p2), 130048   ;;  %vm904_vm3 = vcmask (!%p142_p2), 1040384   ;;  %vm906_vm4 = vcmask (!%p142_p2), 123904  }
   0x7   : > { %1128 = vmatpush3.bf16.msra.mxu0 (!%p142_p2), %v1183_v0  ;;  %1171 = vmatpush3.bf16.msra.mxu1 (!%p142_p2), %v1183_v0  ;;  %p181_p4 = scmp.lt.s32.totalorder (!%p142_p2), %s1237_s13, 1 }
   0x8   : > { %1129 = vmatprep.subr.bf16.mxu0 (!%p142_p2), %v1184_v1  ;;  %1168 = vmatprep.subr.bf16.mxu1 (!%p142_p2), %v1184_v1 }
   0xb   : > { %1130 = vmatpush3.bf16.msra.mxu0 (!%p142_p2), %v1184_v1  ;;  %1172 = vmatpush3.bf16.msra.mxu1 (!%p142_p2), %v1184_v1 }
   0xc   : > { %1131 = vmatprep.subr.bf16.mxu0 (!%p142_p2), %v1185_v2  ;;  %1169 = vmatprep.subr.bf16.mxu1 (!%p142_p2), %v1185_v2 }
   0xd   : > { %s1512_s16 = smov (!%p170_p3, %s1000_s16), 63  ;;  %s1514_s13 = smov (!%p181_p4, %s1237_s13), 1 }
   0xe   : > { %s1001_s21 = sshll.u32 %s1512_s16, 2  ;;  %s1004_s30 = sshll.u32 %s1514_s13, 1 }
   0xf   : > { %s1259_s24 = scalar_lea.vmem %s1507_s0, %s1001_s21  ;;  %1132 = vmatpush3.bf16.msra.mxu0 %v1185_v2  ;;  %1173 = vmatpush3.bf16.msra.mxu1 %v1185_v2  ;;  %s1301_s29 = scalar_lea.vmem %s1509_s2, %s1001_s21 }
  0x10   : > { %v1187_v3 = vld [vmem:[%s1259_s24] sm:$0xff]   ;;  %1133 = vmatprep.subr.bf16.mxu0 %v1186_v4  ;;  %1170 = vmatprep.subr.bf16.mxu1 %v1186_v4  ;;  %v1188_v5 = vld [vmem:[%s1259_s24 + $0x8] sm:$0xff]   ;;  %v1189_v6 = vld [vmem:[%s1259_s24 + $0x10] sm:$0xff]   ;;  %s184_s6 = scalar_lea.vmem %s1510_s3, %s1004_s30 }
  0x11   : > { %1135 = vmatprep.mubr.msk.bf16.mxu0 %vm330_vm0, %v1187_v3  ;;  %v1195_v7 = vld [vmem:[%s1259_s24 + $0x40] sm:$0xff]   ;;  %v1196_v8 = vld [vmem:[%s1259_s24 + $0x48] sm:$0xff]   ;;  %v1197_v9 = vld [vmem:[%s1259_s24 + $0x50] sm:$0xff]  }
  0x12   : > { %1151 = vmatprep.mubr.msk.bf16.mxu1 %vm330_vm0, %v1195_v7  ;;  %v1190_v10 = vld [vmem:[%s1259_s24 + $0x18] sm:$0xff]   ;;  %v1191_v12 = vld [vmem:[%s1259_s24 + $0x20] sm:$0xff]   ;;  %v1192_v14 = vld [vmem:[%s1259_s24 + $0x28] sm:$0xff]  }
  0x13   : > { %1134 = vmatpush3.bf16.msra.mxu0 %v1186_v4  ;;  %1174 = vmatpush3.bf16.msra.mxu1 %v1186_v4  ;;  %v1198_v11 = vld [vmem:[%s1259_s24 + $0x58] sm:$0xff]   ;;  %v1199_v13 = vld [vmem:[%s1259_s24 + $0x60] sm:$0xff]   ;;  %v1200_v15 = vld [vmem:[%s1259_s24 + $0x68] sm:$0xff]  }
  0x14   : > { %v1193_v16 = vld [vmem:[%s1259_s24 + $0x30] sm:$0xff]   ;;  %v1194_v18 = vld [vmem:[%s1259_s24 + $0x38] sm:$0xff]  }
  0x15   : > { %v1201_v17 = vld [vmem:[%s1259_s24 + $0x70] sm:$0xff]   ;;  %v1202_v19 = vld [vmem:[%s1259_s24 + $0x78] sm:$0xff]  }
  0x16   : > { %1136 = vmatmul.mubr.msk.bf16.vlgmr.msra.gmra.mrb[0].mxu0 %vm330_vm0, %v1188_v5  ;;  %1152 = vmatmul.mubr.msk.bf16.vlgmr.msra.gmra.mrb[0].mxu1 %vm330_vm0, %v1196_v8 }
  0x17   : > { %1139 = vmatprep.mubr.msk.bf16.mxu0 %vm330_vm0, %v1189_v6  ;;  %1155 = vmatprep.mubr.msk.bf16.mxu1 %vm330_vm0, %v1197_v9 }
  0x1e   : > { %1140 = vmatmul.mubr.msk.bf16.gmra.mrb[4].mxu0 %vm330_vm0, %v1190_v10  ;;  %1156 = vmatmul.mubr.msk.bf16.gmra.mrb[4].mxu1 %vm330_vm0, %v1198_v11 }
  0x1f   : > { %1143 = vmatprep.mubr.msk.bf16.mxu0 %vm330_vm0, %v1191_v12  ;;  %1159 = vmatprep.mubr.msk.bf16.mxu1 %vm330_vm0, %v1199_v13 }
  0x26   : > { %1144 = vmatmul.mubr.msk.bf16.gmra.mrb[8].mxu0 %vm330_vm0, %v1192_v14  ;;  %1160 = vmatmul.mubr.msk.bf16.gmra.mrb[8].mxu1 %vm330_vm0, %v1200_v15 }
  0x27   : > { %1147 = vmatprep.mubr.msk.bf16.mxu0 %vm330_vm0, %v1193_v16  ;;  %1163 = vmatprep.mubr.msk.bf16.mxu1 %vm330_vm0, %v1201_v17 }
  0x2e   : > { %1148 = vmatmul.mubr.msk.bf16.gmra.mrb[12].mxu0 %vm330_vm0, %v1194_v18  ;;  %1164 = vmatmul.mubr.msk.bf16.gmra.mrb[12].mxu1 %vm330_vm0, %v1202_v19 }
  0xe9   : > { %v1137_v20 = vpop.f32.mrb[0].mxu0  ;;  %v1153_v21 = vpop.f32.mrb[0].mxu1 }
  0xea   : > { %v1077_v22 = vpack.c.bf16 %v1137_v20, %v1137_v20  ;;  %v413_v23 = vpop.f32.mrb[1].mxu0  ;;  %v1093_v24 = vpack.c.bf16 %v1153_v21, %v1153_v21  ;;  %v477_v25 = vpop.f32.mrb[1].mxu1 }
  0xeb   : > { %v1075_v26 = vpack.c.bf16 %v413_v23, %v413_v23  ;;  %v1138_v27 = vpop.f32.mrb[2].mxu0  ;;  %v1091_v28 = vpack.c.bf16 %v477_v25, %v477_v25  ;;  %v1154_v29 = vpop.f32.mrb[2].mxu1 }
  0xec   : > { %671 = vst.msk [vmem:[%s1301_s29 + $0x8] sm:$0xf] %vm668_vm1, %v1077_v22  ;;  %v541_v30 = vpack.c.bf16 %v1138_v27, %v1137_v20  ;;  %v1078_v31 = vpack.c.bf16 %v1138_v27, %v1138_v27  ;;  %v416_v32 = vpop.f32.mrb[3].mxu0  ;;  %687 = vst.msk [vmem:[%s1301_s29 + $0x48] sm:$0xf] %vm668_vm1, %v1093_v24  ;;  %v1307_v33 = vpack.c.bf16 %v1154_v29, %v1153_v21  ;;  %v480_v35 = vpop.f32.mrb[3].mxu1 }
  0xed   : > { %v1094_v34 = vpack.c.bf16 %v1154_v29, %v1154_v29  ;;  %669 = vst.msk [vmem:[%s1301_s29] sm:$0xf] %vm668_vm1, %v1075_v26  ;;  %v540_v36 = vpack.c.bf16 %v416_v32, %v413_v23  ;;  %v1076_v37 = vpack.c.bf16 %v416_v32, %v416_v32  ;;  %685 = vst.msk [vmem:[%s1301_s29 + $0x40] sm:$0xf] %vm668_vm1, %v1091_v28 }
  0xee   : > { %v1313_v38 = vpack.c.bf16 %v480_v35, %v477_v25  ;;  %v1092_v39 = vpack.c.bf16 %v480_v35, %v480_v35  ;;  %672 = vst.msk [vmem:[%s1301_s29 + $0xc] sm:$0xf] %vm668_vm1, %v1078_v31  ;;  %v703_v40 = vunpack.c.l.bf16 %v541_v30  ;;  %v704_v41 = vunpack.c.h.bf16 %v541_v30 }
  0xef   : > { %688 = vst.msk [vmem:[%s1301_s29 + $0x4c] sm:$0xf] %vm668_vm1, %v1094_v34  ;;  %670 = vst.msk [vmem:[%s1301_s29 + $0x4] sm:$0xf] %vm668_vm1, %v1076_v37  ;;  %v701_v42 = vunpack.c.l.bf16 %v540_v36  ;;  %v702_v43 = vunpack.c.h.bf16 %v540_v36 }
  0xf0   : > { %686 = vst.msk [vmem:[%s1301_s29 + $0x44] sm:$0xf] %vm668_vm1, %v1092_v39  ;;  %v805_v44 = vmul.f32 %v703_v40, %v703_v40  ;;  %v737_v51 = vsel %vm733_vm2, %v703_v40, 0.0  ;;  %v806_v56 = vmul.f32 %v704_v41, %v704_v41  ;;  %v739_v4 = vsel %vm733_vm2, %v704_v41, 0.0 }
  0xf1   : > { %v734_v45 = vsel %vm733_vm2, %v701_v42, 0.0  ;;  %v735_v46 = vsel %vm733_vm2, %v702_v43, 0.0  ;;  %v803_v47 = vmul.f32 %v701_v42, %v701_v42  ;;  %v804_v48 = vmul.f32 %v702_v43, %v702_v43  ;;  %v1141_v49 = vpop.f32.mrb[4].mxu0  ;;  %v1325_v50 = vpop.f32.mrb[4].mxu1 }
  0xf2   : > { %v736_v52 = vadd.f32 %v735_v46, %v734_v45  ;;  %v1081_v53 = vpack.c.bf16 %v1141_v49, %v1141_v49  ;;  %v429_v54 = vpop.f32.mrb[5].mxu0  ;;  %v1328_v55 = vpop.f32.mrb[5].mxu1  ;;  %v838_v5 = vsel %vm733_vm2, %v805_v44, 0.0  ;;  %v840_v13 = vsel %vm733_vm2, %v806_v56, 0.0 }
  0xf3   : > { %v835_v57 = vsel %vm733_vm2, %v803_v47, 0.0  ;;  %v836_v58 = vsel %vm733_vm2, %v804_v48, 0.0  ;;  %v1079_v59 = vpack.c.bf16 %v429_v54, %v429_v54  ;;  %v1142_v60 = vpop.f32.mrb[6].mxu0  ;;  %v1332_v61 = vpop.f32.mrb[6].mxu1 }
  0xf4   : > { %v738_v62 = vadd.f32 %v737_v51, %v736_v52  ;;  %v837_v63 = vadd.f32 %v836_v58, %v835_v57  ;;  %675 = vst.msk [vmem:[%s1301_s29 + $0x18] sm:$0xf] %vm668_vm1, %v1081_v53  ;;  %v543_v0 = vpack.c.bf16 %v1142_v60, %v1141_v49  ;;  %v1082_v1 = vpack.c.bf16 %v1142_v60, %v1142_v60  ;;  %v432_v2 = vpop.f32.mrb[7].mxu0  ;;  %v1336_v3 = vpop.f32.mrb[7].mxu1 }
  0xf5   : > { %673 = vst.msk [vmem:[%s1301_s29 + $0x10] sm:$0xf] %vm668_vm1, %v1079_v59  ;;  %v542_v6 = vpack.c.bf16 %v432_v2, %v429_v54  ;;  %v1080_v7 = vpack.c.bf16 %v432_v2, %v432_v2 }
  0xf6   : > { %v839_v8 = vadd.f32 %v838_v5, %v837_v63  ;;  %676 = vst.msk [vmem:[%s1301_s29 + $0x1c] sm:$0xf] %vm668_vm1, %v1082_v1  ;;  %v707_v9 = vunpack.c.l.bf16 %v543_v0  ;;  %v740_v10 = vadd.f32 %v739_v4, %v738_v62  ;;  %v708_v14 = vunpack.c.h.bf16 %v543_v0 }
  0xf7   : > { %674 = vst.msk [vmem:[%s1301_s29 + $0x14] sm:$0xf] %vm668_vm1, %v1080_v7  ;;  %v705_v11 = vunpack.c.l.bf16 %v542_v6  ;;  %v706_v12 = vunpack.c.h.bf16 %v542_v6 }
  0xf8   : > { %v745_v20 = vsel %vm733_vm2, %v707_v9, 0.0  ;;  %v809_v21 = vmul.f32 %v707_v9, %v707_v9  ;;  %v841_v23 = vadd.f32 %v840_v13, %v839_v8  ;;  %v810_v40 = vmul.f32 %v708_v14, %v708_v14 }
  0xf9   : > { %v741_v15 = vsel %vm733_vm2, %v705_v11, 0.0  ;;  %v807_v16 = vmul.f32 %v705_v11, %v705_v11  ;;  %v808_v17 = vmul.f32 %v706_v12, %v706_v12  ;;  %v1145_v18 = vpop.f32.mrb[8].mxu0  ;;  %v1348_v19 = vpop.f32.mrb[8].mxu1  ;;  %v743_v26 = vsel %vm733_vm2, %v706_v12, 0.0 }
  0xfa   : > { %v742_v22 = vadd.f32 %v741_v15, %v740_v10  ;;  %v445_v24 = vpop.f32.mrb[9].mxu0  ;;  %v1351_v25 = vpop.f32.mrb[9].mxu1  ;;  %v1085_v28 = vpack.c.bf16 %v1145_v18, %v1145_v18  ;;  %v846_v47 = vsel %vm733_vm2, %v809_v21, 0.0  ;;  %v747_v52 = vsel %vm733_vm2, %v708_v14, 0.0 }
  0xfb   : > { %v842_v27 = vsel %vm733_vm2, %v807_v16, 0.0  ;;  %v1083_v29 = vpack.c.bf16 %v445_v24, %v445_v24  ;;  %v1146_v30 = vpop.f32.mrb[10].mxu0  ;;  %v1355_v31 = vpop.f32.mrb[10].mxu1  ;;  %v844_v41 = vsel %vm733_vm2, %v808_v17, 0.0  ;;  %v848_v54 = vsel %vm733_vm2, %v810_v40, 0.0 }
  0xfc   : > { %v744_v32 = vadd.f32 %v743_v26, %v742_v22  ;;  %v843_v34 = vadd.f32 %v842_v27, %v841_v23  ;;  %v545_v35 = vpack.c.bf16 %v1146_v30, %v1145_v18  ;;  %v1086_v36 = vpack.c.bf16 %v1146_v30, %v1146_v30  ;;  %v448_v37 = vpop.f32.mrb[11].mxu0  ;;  %v1357_v39 = vpop.f32.mrb[11].mxu1  ;;  %679 = vst.msk [vmem:[%s1301_s29 + $0x28] sm:$0xf] %vm668_vm1, %v1085_v28 }
  0xfd   : > { %677 = vst.msk [vmem:[%s1301_s29 + $0x20] sm:$0xf] %vm668_vm1, %v1083_v29  ;;  %v544_v42 = vpack.c.bf16 %v448_v37, %v445_v24  ;;  %v1084_v43 = vpack.c.bf16 %v448_v37, %v448_v37  ;;  %v719_v24 = vunpack.c.l.bf16 %v1307_v33 }
  0xfe   : > { %v746_v44 = vadd.f32 %v745_v20, %v744_v32  ;;  %v845_v45 = vadd.f32 %v844_v41, %v843_v34  ;;  %680 = vst.msk [vmem:[%s1301_s29 + $0x2c] sm:$0xf] %vm668_vm1, %v1086_v36  ;;  %v711_v46 = vunpack.c.l.bf16 %v545_v35  ;;  %v712_v48 = vunpack.c.h.bf16 %v545_v35 }
  0xff   : > { %678 = vst.msk [vmem:[%s1301_s29 + $0x24] sm:$0xf] %vm668_vm1, %v1084_v43  ;;  %v709_v49 = vunpack.c.l.bf16 %v544_v42  ;;  %v710_v51 = vunpack.c.h.bf16 %v544_v42  ;;  %v717_v34 = vunpack.c.l.bf16 %v1313_v38  ;;  %v718_v35 = vunpack.c.h.bf16 %v1313_v38 }
 0x100   : > { %v847_v53 = vadd.f32 %v846_v47, %v845_v45  ;;  %v748_v56 = vadd.f32 %v747_v52, %v746_v44  ;;  %v813_v60 = vmul.f32 %v711_v46, %v711_v46  ;;  %v814_v4 = vmul.f32 %v712_v48, %v712_v48 }
 0x101   : > { %v749_v57 = vsel %vm733_vm2, %v709_v49, 0.0  ;;  %v1149_v58 = vpop.f32.mrb[12].mxu0  ;;  %v1372_v59 = vpop.f32.mrb[12].mxu1  ;;  %v811_v62 = vmul.f32 %v709_v49, %v709_v49  ;;  %v812_v63 = vmul.f32 %v710_v51, %v710_v51  ;;  %v751_v10 = vsel %vm733_vm2, %v710_v51, 0.0 }
 0x102   : > { %v849_v0 = vadd.f32 %v848_v54, %v847_v53  ;;  %v461_v1 = vpop.f32.mrb[13].mxu0  ;;  %v1374_v2 = vpop.f32.mrb[13].mxu1  ;;  %v750_v5 = vadd.f32 %v749_v57, %v748_v56  ;;  %v1089_v6 = vpack.c.bf16 %v1149_v58, %v1149_v58  ;;  %v753_v21 = vsel %vm733_vm2, %v711_v46, 0.0 }
 0x103   : > { %v1087_v7 = vpack.c.bf16 %v461_v1, %v461_v1  ;;  %v1150_v8 = vpop.f32.mrb[14].mxu0  ;;  %v1376_v9 = vpop.f32.mrb[14].mxu1  ;;  %v850_v11 = vsel %vm733_vm2, %v811_v62, 0.0  ;;  %v852_v22 = vsel %vm733_vm2, %v812_v63, 0.0  ;;  %v755_v30 = vsel %vm733_vm2, %v712_v48, 0.0 }
 0x104   : > { %v547_v12 = vpack.c.bf16 %v1150_v8, %v1149_v58  ;;  %v1090_v13 = vpack.c.bf16 %v1150_v8, %v1150_v8  ;;  %v464_v14 = vpop.f32.mrb[15].mxu0  ;;  %v1380_v15 = vpop.f32.mrb[15].mxu1  ;;  %v752_v16 = vadd.f32 %v751_v10, %v750_v5  ;;  %v851_v17 = vadd.f32 %v850_v11, %v849_v0  ;;  %683 = vst.msk [vmem:[%s1301_s29 + $0x38] sm:$0xf] %vm668_vm1, %v1089_v6 }
 0x105   : > { %681 = vst.msk [vmem:[%s1301_s29 + $0x30] sm:$0xf] %vm668_vm1, %v1087_v7  ;;  %v546_v18 = vpack.c.bf16 %v464_v14, %v461_v1  ;;  %v1088_v20 = vpack.c.bf16 %v464_v14, %v464_v14  ;;  %v854_v32 = vsel %vm733_vm2, %v813_v60, 0.0  ;;  %v856_v36 = vsel %vm733_vm2, %v814_v4, 0.0 }
 0x106   : > { %684 = vst.msk [vmem:[%s1301_s29 + $0x3c] sm:$0xf] %vm668_vm1, %v1090_v13  ;;  %v715_v23 = vunpack.c.l.bf16 %v547_v12  ;;  %v754_v26 = vadd.f32 %v753_v21, %v752_v16  ;;  %v853_v27 = vadd.f32 %v852_v22, %v851_v17  ;;  %v716_v42 = vunpack.c.h.bf16 %v547_v12 }
 0x107   : > { %682 = vst.msk [vmem:[%s1301_s29 + $0x34] sm:$0xf] %vm668_vm1, %v1088_v20  ;;  %v713_v28 = vunpack.c.l.bf16 %v546_v18  ;;  %v714_v29 = vunpack.c.h.bf16 %v546_v18  ;;  %v1097_v49 = vpack.c.bf16 %v1325_v50, %v1325_v50  ;;  %v1095_v52 = vpack.c.bf16 %v1328_v55, %v1328_v55 }
 0x108   : > { %v855_v37 = vadd.f32 %v854_v32, %v853_v27  ;;  %v756_v40 = vadd.f32 %v755_v30, %v754_v26  ;;  %v761_v43 = vsel %vm733_vm2, %v715_v23, 0.0  ;;  %v817_v46 = vmul.f32 %v715_v23, %v715_v23 }
 0x109   : > { %v757_v41 = vsel %vm733_vm2, %v713_v28, 0.0  ;;  %v815_v44 = vmul.f32 %v713_v28, %v713_v28  ;;  %v816_v45 = vmul.f32 %v714_v29, %v714_v29  ;;  %v759_v38 = vsel %vm733_vm2, %v714_v29, 0.0  ;;  %691 = vst.msk [vmem:[%s1301_s29 + $0x58] sm:$0xf] %vm668_vm1, %v1097_v49  ;;  %689 = vst.msk [vmem:[%s1301_s29 + $0x50] sm:$0xf] %vm668_vm1, %v1095_v52 }
 0x10a   : > { %v758_v47 = vadd.f32 %v757_v41, %v756_v40  ;;  %v857_v48 = vadd.f32 %v856_v36, %v855_v37  ;;  %v551_v53 = vpack.c.bf16 %v1332_v61, %v1325_v50  ;;  %v1098_v57 = vpack.c.bf16 %v1332_v61, %v1332_v61 }
 0x10b   : > { %v858_v51 = vsel %vm733_vm2, %v815_v44, 0.0  ;;  %v550_v58 = vpack.c.bf16 %v1336_v3, %v1328_v55  ;;  %v818_v60 = vmul.f32 %v716_v42, %v716_v42  ;;  %v860_v62 = vsel %vm733_vm2, %v816_v45, 0.0 }
 0x10c   : > { %v760_v54 = vadd.f32 %v759_v38, %v758_v47  ;;  %v859_v56 = vadd.f32 %v858_v51, %v857_v48  ;;  %v1096_v50 = vpack.c.bf16 %v1336_v3, %v1336_v3  ;;  %v1101_v63 = vpack.c.bf16 %v1348_v19, %v1348_v19  ;;  %692 = vst.msk [vmem:[%s1301_s29 + $0x5c] sm:$0xf] %vm668_vm1, %v1098_v57 }
 0x10d   : > { %v763_v61 = vsel %vm733_vm2, %v716_v42, 0.0  ;;  %v862_v4 = vsel %vm733_vm2, %v817_v46, 0.0  ;;  %v819_v55 = vmul.f32 %v717_v34, %v717_v34  ;;  %v720_v6 = vunpack.c.h.bf16 %v1307_v33 }
 0x10e   : > { %v762_v0 = vadd.f32 %v761_v43, %v760_v54  ;;  %v861_v1 = vadd.f32 %v860_v62, %v859_v56  ;;  %690 = vst.msk [vmem:[%s1301_s29 + $0x54] sm:$0xf] %vm668_vm1, %v1096_v50  ;;  %695 = vst.msk [vmem:[%s1301_s29 + $0x68] sm:$0xf] %vm668_vm1, %v1101_v63  ;;  %v821_v3 = vmul.f32 %v719_v24, %v719_v24  ;;  %v864_v8 = vsel %vm733_vm2, %v818_v60, 0.0 }
 0x10f   : > { %v765_v10 = vsel %vm733_vm2, %v717_v34, 0.0  ;;  %v767_v11 = vsel %vm733_vm2, %v718_v35, 0.0  ;;  %v820_v12 = vmul.f32 %v718_v35, %v718_v35  ;;  %v1099_v16 = vpack.c.bf16 %v1351_v25, %v1351_v25 }
 0x110   : > { %v863_v5 = vadd.f32 %v862_v4, %v861_v1  ;;  %v764_v7 = vadd.f32 %v763_v61, %v762_v0  ;;  %v553_v17 = vpack.c.bf16 %v1355_v31, %v1348_v19  ;;  %v866_v33 = vsel %vm733_vm2, %v819_v55, 0.0 }
 0x111   : > { %v721_v18 = vunpack.c.l.bf16 %v550_v58  ;;  %v1102_v20 = vpack.c.bf16 %v1355_v31, %v1355_v31  ;;  %v552_v21 = vpack.c.bf16 %v1357_v39, %v1351_v25  ;;  %v769_v22 = vsel %vm733_vm2, %v719_v24, 0.0  ;;  %693 = vst.msk [vmem:[%s1301_s29 + $0x60] sm:$0xf] %vm668_vm1, %v1099_v16 }
 0x112   : > { %v766_v13 = vadd.f32 %v765_v10, %v764_v7  ;;  %v865_v14 = vadd.f32 %v864_v8, %v863_v5  ;;  %v822_v23 = vmul.f32 %v720_v6, %v720_v6  ;;  %v868_v19 = vsel %vm733_vm2, %v820_v12, 0.0 }
 0x113   : > { %v722_v28 = vunpack.c.h.bf16 %v550_v58  ;;  %696 = vst.msk [vmem:[%s1301_s29 + $0x6c] sm:$0xf] %vm668_vm1, %v1102_v20  ;;  %v1100_v31 = vpack.c.bf16 %v1357_v39, %v1357_v39  ;;  %v1105_v25 = vpack.c.bf16 %v1372_v59, %v1372_v59  ;;  %v723_v30 = vunpack.c.l.bf16 %v551_v53 }
 0x114   : > { %v768_v26 = vadd.f32 %v767_v11, %v766_v13  ;;  %v867_v27 = vadd.f32 %v866_v33, %v865_v14  ;;  %v771_v32 = vsel %vm733_vm2, %v720_v6, 0.0  ;;  %v870_v34 = vsel %vm733_vm2, %v821_v3, 0.0 }
 0x115   : > { %v823_v35 = vmul.f32 %v721_v18, %v721_v18  ;;  %694 = vst.msk [vmem:[%s1301_s29 + $0x64] sm:$0xf] %vm668_vm1, %v1100_v31  ;;  %699 = vst.msk [vmem:[%s1301_s29 + $0x78] sm:$0xf] %vm668_vm1, %v1105_v25  ;;  %v872_v36 = vsel %vm733_vm2, %v822_v23, 0.0  ;;  %v724_v39 = vunpack.c.h.bf16 %v551_v53  ;;  %v773_v41 = vsel %vm733_vm2, %v721_v18, 0.0 }
 0x116   : > { %v770_v29 = vadd.f32 %v769_v22, %v768_v26  ;;  %v869_v24 = vadd.f32 %v868_v19, %v867_v27  ;;  %v824_v42 = vmul.f32 %v722_v28, %v722_v28  ;;  %v1103_v43 = vpack.c.bf16 %v1374_v2, %v1374_v2 }
 0x117   : > { %v555_v44 = vpack.c.bf16 %v1376_v9, %v1372_v59  ;;  %v825_v45 = vmul.f32 %v723_v30, %v723_v30  ;;  %v775_v47 = vsel %vm733_vm2, %v722_v28, 0.0  ;;  %v874_v49 = vsel %vm733_vm2, %v823_v35, 0.0 }
 0x118   : > { %v871_v37 = vadd.f32 %v870_v34, %v869_v24  ;;  %v772_v40 = vadd.f32 %v771_v32, %v770_v29  ;;  %v725_v38 = vunpack.c.l.bf16 %v552_v21  ;;  %697 = vst.msk [vmem:[%s1301_s29 + $0x70] sm:$0xf] %vm668_vm1, %v1103_v43  ;;  %v1106_v51 = vpack.c.bf16 %v1376_v9, %v1376_v9 }
 0x119   : > { %v554_v52 = vpack.c.bf16 %v1380_v15, %v1374_v2  ;;  %v1104_v54 = vpack.c.bf16 %v1380_v15, %v1380_v15  ;;  %v777_v56 = vsel %vm733_vm2, %v723_v30, 0.0  ;;  %v826_v57 = vmul.f32 %v724_v39, %v724_v39 }
 0x11a   : > { %v774_v46 = vadd.f32 %v773_v41, %v772_v40  ;;  %v873_v48 = vadd.f32 %v872_v36, %v871_v37  ;;  %v876_v58 = vsel %vm733_vm2, %v824_v42, 0.0  ;;  %v726_v60 = vunpack.c.h.bf16 %v552_v21  ;;  %700 = vst.msk [vmem:[%s1301_s29 + $0x7c] sm:$0xf] %vm668_vm1, %v1106_v51 }
 0x11b   : > { %698 = vst.msk [vmem:[%s1301_s29 + $0x74] sm:$0xf] %vm668_vm1, %v1104_v54  ;;  %v779_v9 = vsel %vm733_vm2, %v724_v39, 0.0  ;;  %v878_v2 = vsel %vm733_vm2, %v825_v45, 0.0  ;;  %v727_v63 = vunpack.c.l.bf16 %v553_v17  ;;  %v827_v0 = vmul.f32 %v725_v38, %v725_v38 }
 0x11c   : > { %v776_v53 = vadd.f32 %v775_v47, %v774_v46  ;;  %v875_v59 = vadd.f32 %v874_v49, %v873_v48  ;;  %v880_v61 = vsel %vm733_vm2, %v826_v57, 0.0  ;;  %v728_v4 = vunpack.c.h.bf16 %v553_v17 }
 0x11d   : > { %v781_v55 = vsel %vm733_vm2, %v725_v38, 0.0  ;;  %v828_v5 = vmul.f32 %v726_v60, %v726_v60  ;;  %v829_v7 = vmul.f32 %v727_v63, %v727_v63  ;;  %v783_v8 = vsel %vm733_vm2, %v726_v60, 0.0 }
 0x11e   : > { %v778_v62 = vadd.f32 %v777_v56, %v776_v53  ;;  %v877_v50 = vadd.f32 %v876_v58, %v875_v59  ;;  %v882_v10 = vsel %vm733_vm2, %v827_v0, 0.0  ;;  %v729_v11 = vunpack.c.l.bf16 %v554_v52 }
 0x11f   : > { %v785_v14 = vsel %vm733_vm2, %v727_v63, 0.0  ;;  %v830_v16 = vmul.f32 %v728_v4, %v728_v4  ;;  %v884_v33 = vsel %vm733_vm2, %v828_v5, 0.0  ;;  %v730_v18 = vunpack.c.h.bf16 %v554_v52 }
 0x120   : > { %v879_v1 = vadd.f32 %v878_v2, %v877_v50  ;;  %v780_v15 = vadd.f32 %v779_v9, %v778_v62  ;;  %v787_v21 = vsel %vm733_vm2, %v728_v4, 0.0  ;;  %v886_v22 = vsel %vm733_vm2, %v829_v7, 0.0 }
 0x121   : > { %v731_v23 = vunpack.c.l.bf16 %v555_v44  ;;  %v831_v26 = vmul.f32 %v729_v11, %v729_v11  ;;  %v888_v28 = vsel %vm733_vm2, %v830_v16, 0.0  ;;  %v732_v31 = vunpack.c.h.bf16 %v555_v44 }
 0x122   : > { %v782_v6 = vadd.f32 %v781_v55, %v780_v15  ;;  %v881_v3 = vadd.f32 %v880_v61, %v879_v1  ;;  %v789_v25 = vsel %vm733_vm2, %v729_v11, 0.0  ;;  %v832_v29 = vmul.f32 %v730_v18, %v730_v18 }
 0x123   : > { %v833_v32 = vmul.f32 %v731_v23, %v731_v23  ;;  %v791_v34 = vsel %vm733_vm2, %v730_v18, 0.0  ;;  %v890_v35 = vsel %vm733_vm2, %v831_v26, 0.0  ;;  %v793_v39 = vsel %vm733_vm2, %v731_v23, 0.0 }
 0x124   : > { %v784_v12 = vadd.f32 %v783_v8, %v782_v6  ;;  %v883_v13 = vadd.f32 %v882_v10, %v881_v3  ;;  %v834_v40 = vmul.f32 %v732_v31, %v732_v31  ;;  %v892_v41 = vsel %vm733_vm2, %v832_v29, 0.0 }
 0x125   : > { %v795_v44 = vsel %vm733_vm2, %v732_v31, 0.0  ;;  %v894_v45 = vsel %vm733_vm2, %v833_v32, 0.0 }
 0x126   : > { %v786_v17 = vadd.f32 %v785_v14, %v784_v12  ;;  %v885_v20 = vadd.f32 %v884_v33, %v883_v13  ;;  %v896_v48 = vsel %vm733_vm2, %v834_v40, 0.0 }
 0x128   : > { %v887_v27 = vadd.f32 %v886_v22, %v885_v20  ;;  %v788_v19 = vadd.f32 %v787_v21, %v786_v17 }
 0x12a   : > { %v790_v24 = vadd.f32 %v789_v25, %v788_v19  ;;  %v889_v30 = vadd.f32 %v888_v28, %v887_v27 }
 0x12c   : > { %v792_v36 = vadd.f32 %v791_v34, %v790_v24  ;;  %v891_v37 = vadd.f32 %v890_v35, %v889_v30 }
 0x12e   : > { %v794_v42 = vadd.f32 %v793_v39, %v792_v36  ;;  %v893_v43 = vadd.f32 %v892_v41, %v891_v37 }
 0x130   : > { %v796_v46 = vadd.f32 %v795_v44, %v794_v42  ;;  %v895_v47 = vadd.f32 %v894_v45, %v893_v43 }
 0x132   : > { %v797_v49 = vrot.slane %v796_v46, 4  ;;  %v897_v38 = vadd.f32 %v896_v48, %v895_v47 }
 0x134   : > { %v798_v51 = vadd.f32 %v797_v49, %v796_v46  ;;  %v898_v52 = vrot.slane %v897_v38, 4 }
 0x136   : > { %v799_v53 = vrot.slane %v798_v51, 2  ;;  %v899_v59 = vadd.f32 %v898_v52, %v897_v38 }
 0x138   : > { %v800_v54 = vadd.f32 %v799_v53, %v798_v51  ;;  %v900_v56 = vrot.slane %v899_v59, 2 }
 0x13a   : > { %v801_v57 = vrot.slane %v800_v54, 1  ;;  %v901_v58 = vadd.f32 %v900_v56, %v899_v59 }
 0x13c   : > { %v902_v60 = vrot.slane %v901_v58, 1  ;;  %v802_v62 = vadd.f32 %v801_v57, %v800_v54 }
 0x13e   : > { %v903_v50 = vadd.f32 %v902_v60, %v901_v58 }
 0x140   : > { %v905_v9 = vsel %vm904_vm3, %v802_v62, %v903_v50 }
 0x141   : > { %907 = vst.msk [vmem:[%s184_s6] sm:$0x3] %vm906_vm4, %v905_v9 }
 0x142 PF: > { %s14_s12 = sadd.s32 1, %s1209_s12  }
 0x143   : > { %p11_p5 = scmp.ge.s32.totalorder %s14_s12, 4  }
 0x145   :  { %13 = sbr.rel (!%p11_p5) target bundleno = 1 (0x1), region = 70 }

// kernel: bottleneck_forward.6
= control target key start
LH: loop header
LB: loop body
LE: loop exit
PB: predicated region body
PF: predicated region fallthrough
CT: control target
= control target key end

     0   :  { %s1377_s18 = smov 0   ;;  %s1713_s0 = inlined_call_operand.vmem [shape: bf16[512,16], index: 0, kind: input, shape index: {}]   ;;  %s1714_s1 = inlined_call_operand.vmem [shape: f32[1,16], index: 1, kind: input, shape index: {}]   ;;  %s1715_s2 = inlined_call_operand.vmem [shape: f32[1,16], index: 2, kind: input, shape index: {}]   ;;  %s1716_s3 = inlined_call_operand.vmem [shape: bf16[16,64], index: 3, kind: input, shape index: {}]   ;;  %s1717_s4 = inlined_call_operand.vmem [shape: bf16[512,64], index: 4, kind: output, shape index: {0}]   ;;  %s1718_s5 = inlined_call_operand.vmem [shape: f32[2,2,64], index: 5, kind: output, shape index: {1}]  }
   0x1 LB: > { %s1383_s19 = sadd.s32 4294967295, %s1345_s18   ;;  %p1107_p0 = scmp.ge.s32.totalorder %s1345_s18, 1  ;;  %s1345_s18 = sphi %s1377_s18, %s16_s18  }
   0x2   : > { %p191_p1 = scmp.lt.s32.totalorder %s1345_s18, 3 }
   0x4   : > { %p192_p2 = pnand %p1107_p0, %p191_p1 }
   0x5   : > { %v1338_v0 = vld [vmem:[%s1716_s3] sm:$0xff] (!%p192_p2)   ;;  %s1108_s22 = sshll.u32 (!%p192_p2), %s1383_s19, 5  ;;  %vm438_vm0 = vcmask (!%p192_p2), 130048   ;;  %vm776_vm1 = vcmask (!%p192_p2), 519168   ;;  %vm841_vm2 = vcmask (!%p192_p2), 523264   ;;  %p235_p4 = scmp.lt.s32.totalorder (!%p192_p2), %s1383_s19, 1 }
   0x6   : > { %195 = sbr.rel (%p192_p2) target bundleno = 328 (0x148), region = 36  ;;  %p224_p3 = scmp.lt.s32.totalorder (!%p192_p2), %s1108_s22, 63  ;;  %1294 = vmatprep.subr.bf16.mxu0 (!%p192_p2), %v1338_v0  ;;  %1328 = vmatprep.subr.bf16.mxu1 (!%p192_p2), %v1338_v0  ;;  %v1404_v1 = vld [vmem:[%s1714_s1] ss:$0 sm:$0xff] (!%p192_p2)  ;;  %vm1012_vm3 = vcmask (!%p192_p2), 1040384   ;;  %vm1014_vm4 = vcmask (!%p192_p2), 517120  }
   0x7   : > { %1295 = vmatpush3.bf16.msra.mxu0 (!%p192_p2), %v1338_v0  ;;  %1329 = vmatpush3.bf16.msra.mxu1 (!%p192_p2), %v1338_v0  ;;  %v1413_v10 = vld [vmem:[%s1715_s2] ss:$0 sm:$0xff] (!%p192_p2) }
   0xd   : > { %s1720_s22 = smov (!%p224_p3, %s1108_s22), 63  ;;  %s1722_s19 = smov (!%p235_p4, %s1383_s19), 1 }
   0xe   : > { %s1109_s23 = sshll.u32 %s1720_s22, 2  ;;  %s1112_s9 = sshll.u32 %s1722_s19, 1 }
   0xf   : > { %s1399_s26 = scalar_lea.vmem %s1713_s0, %s1109_s23  ;;  %s1520_s8 = scalar_lea.vmem %s1717_s4, %s1109_s23 }
  0x10   : > { %v1199_v2 = vld [vmem:[%s1399_s26] sm:$0xff]   ;;  %v1262_v3 = vld [vmem:[%s1399_s26 + $0x8] sm:$0xff]   ;;  %v1263_v4 = vld [vmem:[%s1399_s26 + $0x10] sm:$0xff]   ;;  %s238_s12 = scalar_lea.vmem %s1718_s5, %s1112_s9 }
  0x11   : > { %v1200_v5 = vunpack.c.l.bf16 %v1199_v2  ;;  %v1201_v6 = vunpack.c.h.bf16 %v1199_v2  ;;  %v1204_v7 = vunpack.c.l.bf16 %v1262_v3  ;;  %v1205_v8 = vunpack.c.h.bf16 %v1262_v3  ;;  %v1264_v9 = vld [vmem:[%s1399_s26 + $0x18] sm:$0xff]   ;;  %v1265_v31 = vld [vmem:[%s1399_s26 + $0x20] sm:$0xff]   ;;  %v1266_v36 = vld [vmem:[%s1399_s26 + $0x28] sm:$0xff]  }
  0x12   : > { %v1208_v11 = vunpack.c.l.bf16 %v1263_v4  ;;  %v1209_v12 = vunpack.c.h.bf16 %v1263_v4  ;;  %v1212_v13 = vunpack.c.l.bf16 %v1264_v9  ;;  %v1213_v14 = vunpack.c.h.bf16 %v1264_v9  ;;  %v1267_v41 = vld [vmem:[%s1399_s26 + $0x30] sm:$0xff]   ;;  %v1268_v46 = vld [vmem:[%s1399_s26 + $0x38] sm:$0xff]   ;;  %v1269_v4 = vld [vmem:[%s1399_s26 + $0x40] sm:$0xff]  }
  0x13   : > { %v311_v15 = vmul.f32 %v1200_v5, %v1404_v1  ;;  %v312_v16 = vmul.f32 %v1201_v6, %v1404_v1  ;;  %v313_v17 = vmul.f32 %v1204_v7, %v1404_v1  ;;  %v314_v18 = vmul.f32 %v1205_v8, %v1404_v1 }
  0x14   : > { %v315_v19 = vmul.f32 %v1208_v11, %v1404_v1  ;;  %v316_v20 = vmul.f32 %v1209_v12, %v1404_v1  ;;  %v317_v21 = vmul.f32 %v1212_v13, %v1404_v1  ;;  %v318_v22 = vmul.f32 %v1213_v14, %v1404_v1  ;;  %v1270_v14 = vld [vmem:[%s1399_s26 + $0x48] sm:$0xff]  }
  0x15   : > { %v350_v23 = vadd.f32 %v1413_v10, %v311_v15  ;;  %v351_v24 = vadd.f32 %v1413_v10, %v312_v16  ;;  %v352_v25 = vadd.f32 %v1413_v10, %v313_v17  ;;  %v353_v26 = vadd.f32 %v1413_v10, %v314_v18 }
  0x16   : > { %v354_v27 = vadd.f32 %v1413_v10, %v315_v19  ;;  %v355_v28 = vadd.f32 %v1413_v10, %v316_v20  ;;  %v356_v29 = vadd.f32 %v1413_v10, %v317_v21  ;;  %v357_v30 = vadd.f32 %v1413_v10, %v318_v22  ;;  %v1271_v19 = vld [vmem:[%s1399_s26 + $0x50] sm:$0xff]  }
  0x17   : > { %v382_v32 = vmax.f32 %v350_v23, 0.0  ;;  %v383_v33 = vmax.f32 %v351_v24, 0.0  ;;  %v384_v34 = vmax.f32 %v352_v25, 0.0  ;;  %v385_v35 = vmax.f32 %v353_v26, 0.0  ;;  %v1272_v23 = vld [vmem:[%s1399_s26 + $0x58] sm:$0xff]  }
  0x18   : > { %v386_v37 = vmax.f32 %v354_v27, 0.0  ;;  %v387_v38 = vmax.f32 %v355_v28, 0.0  ;;  %v388_v39 = vmax.f32 %v356_v29, 0.0  ;;  %v389_v40 = vmax.f32 %v357_v30, 0.0 }
  0x19   : > { %v414_v42 = vpack.c.bf16 %v383_v33, %v382_v32  ;;  %v415_v43 = vpack.c.bf16 %v385_v35, %v384_v34  ;;  %v1216_v44 = vunpack.c.l.bf16 %v1265_v31  ;;  %v1217_v45 = vunpack.c.h.bf16 %v1265_v31 }
  0x1a   : > { %v416_v47 = vpack.c.bf16 %v387_v38, %v386_v37  ;;  %v417_v48 = vpack.c.bf16 %v389_v40, %v388_v39  ;;  %v1220_v49 = vunpack.c.l.bf16 %v1266_v36  ;;  %v1221_v50 = vunpack.c.h.bf16 %v1266_v36  ;;  %v1273_v40 = vld [vmem:[%s1399_s26 + $0x60] sm:$0xff]  }
  0x1b   : > { %1296 = vmatprep.mubr.msk.bf16.mxu0 %vm438_vm0, %v414_v42  ;;  %v319_v51 = vmul.f32 %v1216_v44, %v1404_v1  ;;  %v320_v52 = vmul.f32 %v1217_v45, %v1404_v1  ;;  %v1224_v53 = vunpack.c.l.bf16 %v1267_v41  ;;  %v1225_v54 = vunpack.c.h.bf16 %v1267_v41 }
  0x1c   : > { %1297 = vmatmul.mubr.msk.bf16.vlgmr.msra.gmra.mrb[0].mxu0 %vm438_vm0, %v415_v43  ;;  %v321_v55 = vmul.f32 %v1220_v49, %v1404_v1  ;;  %v322_v56 = vmul.f32 %v1221_v50, %v1404_v1  ;;  %v1228_v57 = vunpack.c.l.bf16 %v1268_v46  ;;  %v1229_v58 = vunpack.c.h.bf16 %v1268_v46 }
  0x1d   : > { %1300 = vmatprep.mubr.msk.bf16.mxu0 %vm438_vm0, %v416_v47  ;;  %v358_v59 = vadd.f32 %v1413_v10, %v319_v51  ;;  %v359_v60 = vadd.f32 %v1413_v10, %v320_v52  ;;  %v323_v61 = vmul.f32 %v1224_v53, %v1404_v1  ;;  %v324_v62 = vmul.f32 %v1225_v54, %v1404_v1  ;;  %v1274_v53 = vld [vmem:[%s1399_s26 + $0x68] sm:$0xff]  }
  0x1e   : > { %v360_v63 = vadd.f32 %v1413_v10, %v321_v55  ;;  %v361_v0 = vadd.f32 %v1413_v10, %v322_v56  ;;  %v325_v2 = vmul.f32 %v1228_v57, %v1404_v1  ;;  %v326_v3 = vmul.f32 %v1229_v58, %v1404_v1  ;;  %v1275_v58 = vld [vmem:[%s1399_s26 + $0x70] sm:$0xff]  }
  0x1f   : > { %v390_v5 = vmax.f32 %v358_v59, 0.0  ;;  %v391_v6 = vmax.f32 %v359_v60, 0.0  ;;  %v362_v7 = vadd.f32 %v1413_v10, %v323_v61  ;;  %v363_v8 = vadd.f32 %v1413_v10, %v324_v62 }
  0x20   : > { %v392_v9 = vmax.f32 %v360_v63, 0.0  ;;  %v393_v11 = vmax.f32 %v361_v0, 0.0  ;;  %v1454_v12 = vadd.f32 %v1413_v10, %v325_v2  ;;  %v1457_v13 = vadd.f32 %v1413_v10, %v326_v3 }
  0x21   : > { %v418_v15 = vpack.c.bf16 %v391_v6, %v390_v5  ;;  %v394_v16 = vmax.f32 %v362_v7, 0.0  ;;  %v395_v17 = vmax.f32 %v363_v8, 0.0  ;;  %v1232_v18 = vunpack.c.l.bf16 %v1269_v4  ;;  %v1276_v8 = vld [vmem:[%s1399_s26 + $0x78] sm:$0xff]  }
  0x22   : > { %v419_v20 = vpack.c.bf16 %v393_v11, %v392_v9  ;;  %v396_v21 = vmax.f32 %v1454_v12, 0.0  ;;  %v1233_v22 = vunpack.c.h.bf16 %v1269_v4  ;;  %v397_v24 = vmax.f32 %v1457_v13, 0.0 }
  0x23   : > { %v327_v25 = vmul.f32 %v1232_v18, %v1404_v1  ;;  %v1236_v26 = vunpack.c.l.bf16 %v1270_v14  ;;  %v1237_v27 = vunpack.c.h.bf16 %v1270_v14  ;;  %v420_v28 = vpack.c.bf16 %v395_v17, %v394_v16 }
  0x24   : > { %1301 = vmatmul.mubr.msk.bf16.gmra.mrb[4].mxu0 %vm438_vm0, %v417_v48  ;;  %v328_v29 = vmul.f32 %v1233_v22, %v1404_v1  ;;  %v1240_v30 = vunpack.c.l.bf16 %v1271_v19  ;;  %v1241_v31 = vunpack.c.h.bf16 %v1271_v19  ;;  %v1244_v35 = vunpack.c.l.bf16 %v1272_v23 }
  0x25   : > { %1304 = vmatprep.mubr.msk.bf16.mxu0 %vm438_vm0, %v418_v15  ;;  %v366_v32 = vadd.f32 %v1413_v10, %v327_v25  ;;  %v329_v33 = vmul.f32 %v1236_v26, %v1404_v1  ;;  %v330_v34 = vmul.f32 %v1237_v27, %v1404_v1  ;;  %v1245_v39 = vunpack.c.h.bf16 %v1272_v23 }
  0x26   : > { %v367_v36 = vadd.f32 %v1413_v10, %v328_v29  ;;  %v331_v37 = vmul.f32 %v1240_v30, %v1404_v1  ;;  %v332_v38 = vmul.f32 %v1241_v31, %v1404_v1  ;;  %v333_v44 = vmul.f32 %v1244_v35, %v1404_v1 }
  0x27   : > { %v398_v41 = vmax.f32 %v366_v32, 0.0  ;;  %v368_v42 = vadd.f32 %v1413_v10, %v329_v33  ;;  %v369_v43 = vadd.f32 %v1413_v10, %v330_v34  ;;  %v334_v48 = vmul.f32 %v1245_v39, %v1404_v1 }
  0x28   : > { %v399_v45 = vmax.f32 %v367_v36, 0.0  ;;  %v370_v46 = vadd.f32 %v1413_v10, %v331_v37  ;;  %v371_v47 = vadd.f32 %v1413_v10, %v332_v38  ;;  %v372_v51 = vadd.f32 %v1413_v10, %v333_v44 }
  0x29   : > { %v400_v49 = vmax.f32 %v368_v42, 0.0  ;;  %v401_v50 = vmax.f32 %v369_v43, 0.0  ;;  %v1248_v52 = vunpack.c.l.bf16 %v1273_v40  ;;  %v373_v57 = vadd.f32 %v1413_v10, %v334_v48 }
  0x2a   : > { %v422_v54 = vpack.c.bf16 %v399_v45, %v398_v41  ;;  %v402_v55 = vmax.f32 %v370_v46, 0.0  ;;  %v403_v56 = vmax.f32 %v371_v47, 0.0  ;;  %v404_v60 = vmax.f32 %v372_v51, 0.0 }
  0x2b   : > { %v423_v59 = vpack.c.bf16 %v401_v50, %v400_v49  ;;  %v1249_v61 = vunpack.c.h.bf16 %v1273_v40  ;;  %v335_v62 = vmul.f32 %v1248_v52, %v1404_v1  ;;  %v405_v0 = vmax.f32 %v373_v57, 0.0 }
  0x2c   : > { %1305 = vmatmul.mubr.msk.bf16.gmra.mrb[8].mxu0 %vm438_vm0, %v419_v20  ;;  %1312 = vmatprep.mubr.msk.bf16.mxu1 %vm438_vm0, %v422_v54  ;;  %v424_v63 = vpack.c.bf16 %v403_v56, %v402_v55  ;;  %v1252_v2 = vunpack.c.l.bf16 %v1274_v53  ;;  %v1253_v3 = vunpack.c.h.bf16 %v1274_v53  ;;  %v1256_v6 = vunpack.c.l.bf16 %v1275_v58 }
  0x2d   : > { %1308 = vmatprep.mubr.msk.bf16.mxu0 %vm438_vm0, %v420_v28  ;;  %1313 = vmatmul.mubr.msk.bf16.vlgmr.msra.gmra.mrb[0].mxu1 %vm438_vm0, %v423_v59  ;;  %v336_v4 = vmul.f32 %v1249_v61, %v1404_v1  ;;  %v374_v5 = vadd.f32 %v1413_v10, %v335_v62  ;;  %v1257_v7 = vunpack.c.h.bf16 %v1275_v58  ;;  %v421_v17 = vpack.c.bf16 %v397_v24, %v396_v21 }
  0x2e   : > { %1316 = vmatprep.mubr.msk.bf16.mxu1 %vm438_vm0, %v424_v63  ;;  %v337_v9 = vmul.f32 %v1252_v2, %v1404_v1  ;;  %v338_v11 = vmul.f32 %v1253_v3, %v1404_v1  ;;  %v339_v15 = vmul.f32 %v1256_v6, %v1404_v1  ;;  %v425_v18 = vpack.c.bf16 %v405_v0, %v404_v60 }
  0x2f   : > { %v375_v13 = vadd.f32 %v1413_v10, %v336_v4  ;;  %v406_v14 = vmax.f32 %v374_v5, 0.0  ;;  %v340_v16 = vmul.f32 %v1257_v7, %v1404_v1  ;;  %v1260_v19 = vunpack.c.l.bf16 %v1276_v8 }
  0x30   : > { %v376_v22 = vadd.f32 %v1413_v10, %v337_v9  ;;  %v377_v23 = vadd.f32 %v1413_v10, %v338_v11  ;;  %v1261_v25 = vunpack.c.h.bf16 %v1276_v8  ;;  %v378_v26 = vadd.f32 %v1413_v10, %v339_v15 }
  0x31   : > { %v407_v20 = vmax.f32 %v375_v13, 0.0  ;;  %v379_v27 = vadd.f32 %v1413_v10, %v340_v16  ;;  %v341_v21 = vmul.f32 %v1260_v19, %v1404_v1 }
  0x32   : > { %v408_v29 = vmax.f32 %v376_v22, 0.0  ;;  %v409_v12 = vmax.f32 %v377_v23, 0.0  ;;  %v342_v24 = vmul.f32 %v1261_v25, %v1404_v1  ;;  %v410_v30 = vmax.f32 %v378_v26, 0.0 }
  0x33   : > { %v426_v28 = vpack.c.bf16 %v407_v20, %v406_v14  ;;  %v411_v31 = vmax.f32 %v379_v27, 0.0  ;;  %v380_v33 = vadd.f32 %v1413_v10, %v341_v21 }
  0x34   : > { %1309 = vmatmul.mubr.msk.bf16.gmra.mrb[12].mxu0 %vm438_vm0, %v421_v17  ;;  %v427_v32 = vpack.c.bf16 %v409_v12, %v408_v29  ;;  %v381_v34 = vadd.f32 %v1413_v10, %v342_v24 }
  0x35   : > { %1317 = vmatmul.mubr.msk.bf16.gmra.mrb[4].mxu1 %vm438_vm0, %v425_v18  ;;  %v428_v35 = vpack.c.bf16 %v411_v31, %v410_v30  ;;  %v412_v36 = vmax.f32 %v380_v33, 0.0 }
  0x36   : > { %1320 = vmatprep.mubr.msk.bf16.mxu1 %vm438_vm0, %v426_v28  ;;  %v413_v37 = vmax.f32 %v381_v34, 0.0 }
  0x38   : > { %v429_v38 = vpack.c.bf16 %v413_v37, %v412_v36 }
  0x3d   : > { %1321 = vmatmul.mubr.msk.bf16.gmra.mrb[8].mxu1 %vm438_vm0, %v427_v32 }
  0x3e   : > { %1324 = vmatprep.mubr.msk.bf16.mxu1 %vm438_vm0, %v428_v35 }
  0x45   : > { %1325 = vmatmul.mubr.msk.bf16.gmra.mrb[12].mxu1 %vm438_vm0, %v429_v38 }
  0xef   : > { %v1298_v1 = vpop.f32.mrb[0].mxu0 }
  0xf0   : > { %v1168_v10 = vpack.c.bf16 %v1298_v1, %v1298_v1  ;;  %v521_v39 = vpop.f32.mrb[1].mxu0 }
  0xf1   : > { %v1166_v40 = vpack.c.bf16 %v521_v39, %v521_v39  ;;  %v1299_v41 = vpop.f32.mrb[2].mxu0 }
  0xf2   : > { %779 = vst.msk [vmem:[%s1520_s8 + $0x8] sm:$0xf] %vm776_vm1, %v1168_v10  ;;  %v649_v42 = vpack.c.bf16 %v1299_v41, %v1298_v1  ;;  %v1169_v43 = vpack.c.bf16 %v1299_v41, %v1299_v41  ;;  %v524_v44 = vpop.f32.mrb[3].mxu0 }
  0xf3   : > { %777 = vst.msk [vmem:[%s1520_s8] sm:$0xf] %vm776_vm1, %v1166_v40  ;;  %v648_v45 = vpack.c.bf16 %v524_v44, %v521_v39  ;;  %v1167_v46 = vpack.c.bf16 %v524_v44, %v524_v44 }
  0xf4   : > { %780 = vst.msk [vmem:[%s1520_s8 + $0xc] sm:$0xf] %vm776_vm1, %v1169_v43  ;;  %v811_v47 = vunpack.c.l.bf16 %v649_v42  ;;  %v812_v48 = vunpack.c.h.bf16 %v649_v42 }
  0xf5   : > { %778 = vst.msk [vmem:[%s1520_s8 + $0x4] sm:$0xf] %vm776_vm1, %v1167_v46  ;;  %v809_v49 = vunpack.c.l.bf16 %v648_v45  ;;  %v810_v50 = vunpack.c.h.bf16 %v648_v45 }
  0xf6   : > { %v913_v51 = vmul.f32 %v811_v47, %v811_v47  ;;  %v845_v57 = vsel %vm841_vm2, %v811_v47, 0.0  ;;  %v914_v61 = vmul.f32 %v812_v48, %v812_v48  ;;  %v847_v8 = vsel %vm841_vm2, %v812_v48, 0.0 }
  0xf7   : > { %v842_v52 = vsel %vm841_vm2, %v809_v49, 0.0  ;;  %v843_v53 = vsel %vm841_vm2, %v810_v50, 0.0  ;;  %v911_v54 = vmul.f32 %v809_v49, %v809_v49  ;;  %v912_v55 = vmul.f32 %v810_v50, %v810_v50  ;;  %v1302_v56 = vpop.f32.mrb[4].mxu0 }
  0xf8   : > { %v844_v58 = vadd.f32 %v843_v53, %v842_v52  ;;  %v1172_v59 = vpack.c.bf16 %v1302_v56, %v1302_v56  ;;  %v537_v60 = vpop.f32.mrb[5].mxu0  ;;  %v946_v9 = vsel %vm841_vm2, %v913_v51, 0.0  ;;  %v948_v20 = vsel %vm841_vm2, %v914_v61, 0.0 }
  0xf9   : > { %v943_v62 = vsel %vm841_vm2, %v911_v54, 0.0  ;;  %v944_v63 = vsel %vm841_vm2, %v912_v55, 0.0  ;;  %v1170_v0 = vpack.c.bf16 %v537_v60, %v537_v60  ;;  %v1303_v2 = vpop.f32.mrb[6].mxu0 }
  0xfa   : > { %v846_v3 = vadd.f32 %v845_v57, %v844_v58  ;;  %v945_v4 = vadd.f32 %v944_v63, %v943_v62  ;;  %783 = vst.msk [vmem:[%s1520_s8 + $0x18] sm:$0xf] %vm776_vm1, %v1172_v59  ;;  %v651_v5 = vpack.c.bf16 %v1303_v2, %v1302_v56  ;;  %v1173_v6 = vpack.c.bf16 %v1303_v2, %v1303_v2  ;;  %v540_v7 = vpop.f32.mrb[7].mxu0 }
  0xfb   : > { %781 = vst.msk [vmem:[%s1520_s8 + $0x10] sm:$0xf] %vm776_vm1, %v1170_v0  ;;  %v650_v11 = vpack.c.bf16 %v540_v7, %v537_v60  ;;  %v1171_v13 = vpack.c.bf16 %v540_v7, %v540_v7 }
  0xfc   : > { %v947_v14 = vadd.f32 %v946_v9, %v945_v4  ;;  %784 = vst.msk [vmem:[%s1520_s8 + $0x1c] sm:$0xf] %vm776_vm1, %v1173_v6  ;;  %v815_v15 = vunpack.c.l.bf16 %v651_v5  ;;  %v816_v16 = vunpack.c.h.bf16 %v651_v5  ;;  %v848_v17 = vadd.f32 %v847_v8, %v846_v3 }
  0xfd   : > { %782 = vst.msk [vmem:[%s1520_s8 + $0x14] sm:$0xf] %vm776_vm1, %v1171_v13  ;;  %v813_v18 = vunpack.c.l.bf16 %v650_v11  ;;  %v814_v19 = vunpack.c.h.bf16 %v650_v11 }
  0xfe   : > { %v853_v22 = vsel %vm841_vm2, %v815_v15, 0.0  ;;  %v917_v23 = vmul.f32 %v815_v15, %v815_v15  ;;  %v918_v25 = vmul.f32 %v816_v16, %v816_v16  ;;  %v949_v30 = vadd.f32 %v948_v20, %v947_v14 }
  0xff   : > { %v849_v26 = vsel %vm841_vm2, %v813_v18, 0.0  ;;  %v915_v27 = vmul.f32 %v813_v18, %v813_v18  ;;  %v916_v28 = vmul.f32 %v814_v19, %v814_v19  ;;  %v1306_v29 = vpop.f32.mrb[8].mxu0  ;;  %v851_v24 = vsel %vm841_vm2, %v814_v19, 0.0 }
 0x100   : > { %v954_v12 = vsel %vm841_vm2, %v917_v23, 0.0  ;;  %v850_v21 = vadd.f32 %v849_v26, %v848_v17  ;;  %v553_v31 = vpop.f32.mrb[9].mxu0  ;;  %v1314_v32 = vpop.f32.mrb[0].mxu1  ;;  %v1176_v35 = vpack.c.bf16 %v1306_v29, %v1306_v29  ;;  %v855_v56 = vsel %vm841_vm2, %v816_v16, 0.0 }
 0x101   : > { %v950_v33 = vsel %vm841_vm2, %v915_v27, 0.0  ;;  %v952_v34 = vsel %vm841_vm2, %v916_v28, 0.0  ;;  %v1174_v36 = vpack.c.bf16 %v553_v31, %v553_v31  ;;  %v1307_v37 = vpop.f32.mrb[10].mxu0  ;;  %v1552_v38 = vpop.f32.mrb[1].mxu1  ;;  %v1184_v45 = vpack.c.bf16 %v1314_v32, %v1314_v32 }
 0x102   : > { %v852_v1 = vadd.f32 %v851_v24, %v850_v21  ;;  %v951_v10 = vadd.f32 %v950_v33, %v949_v30  ;;  %v653_v39 = vpack.c.bf16 %v1307_v37, %v1306_v29  ;;  %v1177_v40 = vpack.c.bf16 %v1307_v37, %v1307_v37  ;;  %v556_v41 = vpop.f32.mrb[11].mxu0  ;;  %v1315_v42 = vpop.f32.mrb[2].mxu1  ;;  %787 = vst.msk [vmem:[%s1520_s8 + $0x28] sm:$0xf] %vm776_vm1, %v1176_v35 }
 0x103   : > { %785 = vst.msk [vmem:[%s1520_s8 + $0x20] sm:$0xf] %vm776_vm1, %v1174_v36  ;;  %v652_v43 = vpack.c.bf16 %v556_v41, %v553_v31  ;;  %v1175_v44 = vpack.c.bf16 %v556_v41, %v556_v41  ;;  %v1182_v46 = vpack.c.bf16 %v1552_v38, %v1552_v38  ;;  %v1560_v47 = vpop.f32.mrb[3].mxu1  ;;  %795 = vst.msk [vmem:[%s1520_s8 + $0x48] sm:$0xf] %vm776_vm1, %v1184_v45  ;;  %v956_v58 = vsel %vm841_vm2, %v918_v25, 0.0 }
 0x104   : > { %v854_v48 = vadd.f32 %v853_v22, %v852_v1  ;;  %v953_v49 = vadd.f32 %v952_v34, %v951_v10  ;;  %788 = vst.msk [vmem:[%s1520_s8 + $0x2c] sm:$0xf] %vm776_vm1, %v1177_v40  ;;  %v819_v50 = vunpack.c.l.bf16 %v653_v39  ;;  %v820_v51 = vunpack.c.h.bf16 %v653_v39 }
 0x105   : > { %786 = vst.msk [vmem:[%s1520_s8 + $0x24] sm:$0xf] %vm776_vm1, %v1175_v44  ;;  %v817_v52 = vunpack.c.l.bf16 %v652_v43  ;;  %v818_v53 = vunpack.c.h.bf16 %v652_v43  ;;  %793 = vst.msk [vmem:[%s1520_s8 + $0x40] sm:$0xf] %vm776_vm1, %v1182_v46  ;;  %v657_v54 = vpack.c.bf16 %v1315_v42, %v1314_v32  ;;  %v1185_v55 = vpack.c.bf16 %v1315_v42, %v1315_v42 }
 0x106   : > { %v955_v57 = vadd.f32 %v954_v12, %v953_v49  ;;  %v856_v59 = vadd.f32 %v855_v56, %v854_v48  ;;  %v921_v62 = vmul.f32 %v819_v50, %v819_v50  ;;  %v922_v5 = vmul.f32 %v820_v51, %v820_v51 }
 0x107   : > { %v857_v60 = vsel %vm841_vm2, %v817_v52, 0.0  ;;  %v1310_v61 = vpop.f32.mrb[12].mxu0  ;;  %796 = vst.msk [vmem:[%s1520_s8 + $0x4c] sm:$0xf] %vm776_vm1, %v1185_v55  ;;  %v919_v63 = vmul.f32 %v817_v52, %v817_v52  ;;  %v920_v0 = vmul.f32 %v818_v53, %v818_v53  ;;  %v859_v13 = vsel %vm841_vm2, %v818_v53, 0.0 }
 0x108   : > { %v957_v2 = vadd.f32 %v956_v58, %v955_v57  ;;  %v569_v3 = vpop.f32.mrb[13].mxu0  ;;  %v1575_v4 = vpop.f32.mrb[4].mxu1  ;;  %v858_v6 = vadd.f32 %v857_v60, %v856_v59  ;;  %v1180_v7 = vpack.c.bf16 %v1310_v61, %v1310_v61  ;;  %v861_v26 = vsel %vm841_vm2, %v819_v50, 0.0 }
 0x109   : > { %v1178_v8 = vpack.c.bf16 %v569_v3, %v569_v3  ;;  %v1311_v9 = vpop.f32.mrb[14].mxu0  ;;  %v1577_v11 = vpop.f32.mrb[5].mxu1  ;;  %v958_v14 = vsel %vm841_vm2, %v919_v63, 0.0  ;;  %v960_v27 = vsel %vm841_vm2, %v920_v0, 0.0  ;;  %v863_v30 = vsel %vm841_vm2, %v820_v51, 0.0 }
 0x10a   : > { %v655_v15 = vpack.c.bf16 %v1311_v9, %v1310_v61  ;;  %v1181_v16 = vpack.c.bf16 %v1311_v9, %v1311_v9  ;;  %v572_v17 = vpop.f32.mrb[15].mxu0  ;;  %v1581_v18 = vpop.f32.mrb[6].mxu1  ;;  %v860_v19 = vadd.f32 %v859_v13, %v858_v6  ;;  %v959_v20 = vadd.f32 %v958_v14, %v957_v2  ;;  %791 = vst.msk [vmem:[%s1520_s8 + $0x38] sm:$0xf] %vm776_vm1, %v1180_v7 }
 0x10b   : > { %789 = vst.msk [vmem:[%s1520_s8 + $0x30] sm:$0xf] %vm776_vm1, %v1178_v8  ;;  %v654_v22 = vpack.c.bf16 %v572_v17, %v569_v3  ;;  %v1179_v23 = vpack.c.bf16 %v572_v17, %v572_v17  ;;  %v604_v25 = vpop.f32.mrb[7].mxu1  ;;  %v962_v31 = vsel %vm841_vm2, %v921_v62, 0.0  ;;  %v964_v33 = vsel %vm841_vm2, %v922_v5, 0.0 }
 0x10c   : > { %792 = vst.msk [vmem:[%s1520_s8 + $0x3c] sm:$0xf] %vm776_vm1, %v1181_v16  ;;  %v823_v28 = vunpack.c.l.bf16 %v655_v15  ;;  %v862_v29 = vadd.f32 %v861_v26, %v860_v19  ;;  %v961_v12 = vadd.f32 %v960_v27, %v959_v20  ;;  %v824_v32 = vunpack.c.h.bf16 %v655_v15 }
 0x10d   : > { %790 = vst.msk [vmem:[%s1520_s8 + $0x34] sm:$0xf] %vm776_vm1, %v1179_v23  ;;  %v821_v21 = vunpack.c.l.bf16 %v654_v22  ;;  %v822_v24 = vunpack.c.h.bf16 %v654_v22  ;;  %v827_v39 = vunpack.c.l.bf16 %v657_v54  ;;  %v828_v44 = vunpack.c.h.bf16 %v657_v54 }
 0x10e   : > { %v963_v34 = vadd.f32 %v962_v31, %v961_v12  ;;  %v864_v35 = vadd.f32 %v863_v30, %v862_v29  ;;  %v925_v37 = vmul.f32 %v823_v28, %v823_v28  ;;  %v869_v41 = vsel %vm841_vm2, %v823_v28, 0.0 }
 0x10f   : > { %v865_v36 = vsel %vm841_vm2, %v821_v21, 0.0  ;;  %v923_v1 = vmul.f32 %v821_v21, %v821_v21  ;;  %v924_v10 = vmul.f32 %v822_v24, %v822_v24  ;;  %v871_v46 = vsel %vm841_vm2, %v824_v32, 0.0 }
 0x110   : > { %v1597_v40 = vpop.f32.mrb[8].mxu1  ;;  %v866_v42 = vadd.f32 %v865_v36, %v864_v35  ;;  %v965_v43 = vadd.f32 %v964_v33, %v963_v34  ;;  %v926_v48 = vmul.f32 %v824_v32, %v824_v32  ;;  %v867_v49 = vsel %vm841_vm2, %v822_v24, 0.0 }
 0x111   : > { %v1600_v45 = vpop.f32.mrb[9].mxu1  ;;  %v966_v50 = vsel %vm841_vm2, %v923_v1, 0.0  ;;  %v656_v55 = vpack.c.bf16 %v1560_v47, %v1552_v38  ;;  %v1183_v54 = vpack.c.bf16 %v1560_v47, %v1560_v47  ;;  %v970_v57 = vsel %vm841_vm2, %v925_v37, 0.0 }
 0x112   : > { %v1605_v51 = vpop.f32.mrb[10].mxu1  ;;  %v868_v52 = vadd.f32 %v867_v49, %v866_v42  ;;  %v967_v53 = vadd.f32 %v966_v50, %v965_v43  ;;  %v968_v58 = vsel %vm841_vm2, %v924_v10, 0.0  ;;  %v1188_v59 = vpack.c.bf16 %v1575_v4, %v1575_v4 }
 0x113   : > { %v1611_v56 = vpop.f32.mrb[11].mxu1  ;;  %v1186_v60 = vpack.c.bf16 %v1577_v11, %v1577_v11  ;;  %794 = vst.msk [vmem:[%s1520_s8 + $0x44] sm:$0xf] %vm776_vm1, %v1183_v54  ;;  %v825_v38 = vunpack.c.l.bf16 %v656_v55  ;;  %v826_v63 = vunpack.c.h.bf16 %v656_v55  ;;  %v659_v47 = vpack.c.bf16 %v1581_v18, %v1575_v4 }
 0x114   : > { %v870_v61 = vadd.f32 %v869_v41, %v868_v52  ;;  %v969_v62 = vadd.f32 %v968_v58, %v967_v53  ;;  %799 = vst.msk [vmem:[%s1520_s8 + $0x58] sm:$0xf] %vm776_vm1, %v1188_v59  ;;  %v1189_v0 = vpack.c.bf16 %v1581_v18, %v1581_v18  ;;  %v658_v2 = vpack.c.bf16 %v604_v25, %v1577_v11 }
 0x115   : > { %797 = vst.msk [vmem:[%s1520_s8 + $0x50] sm:$0xf] %vm776_vm1, %v1186_v60  ;;  %v1187_v3 = vpack.c.bf16 %v604_v25, %v604_v25  ;;  %v972_v5 = vsel %vm841_vm2, %v926_v48, 0.0  ;;  %v929_v7 = vmul.f32 %v827_v39, %v827_v39  ;;  %v930_v9 = vmul.f32 %v828_v44, %v828_v44 }
 0x116   : > { %v971_v6 = vadd.f32 %v970_v57, %v969_v62  ;;  %v872_v8 = vadd.f32 %v871_v46, %v870_v61  ;;  %v873_v13 = vsel %vm841_vm2, %v825_v38, 0.0  ;;  %v927_v14 = vmul.f32 %v825_v38, %v825_v38  ;;  %800 = vst.msk [vmem:[%s1520_s8 + $0x5c] sm:$0xf] %vm776_vm1, %v1189_v0 }
 0x117   : > { %v928_v15 = vmul.f32 %v826_v63, %v826_v63  ;;  %798 = vst.msk [vmem:[%s1520_s8 + $0x54] sm:$0xf] %vm776_vm1, %v1187_v3  ;;  %v829_v18 = vunpack.c.l.bf16 %v658_v2  ;;  %v875_v19 = vsel %vm841_vm2, %v826_v63, 0.0  ;;  %v830_v22 = vunpack.c.h.bf16 %v658_v2 }
 0x118   : > { %v1326_v4 = vpop.f32.mrb[12].mxu1  ;;  %v874_v16 = vadd.f32 %v873_v13, %v872_v8  ;;  %v973_v17 = vadd.f32 %v972_v5, %v971_v6  ;;  %v974_v20 = vsel %vm841_vm2, %v927_v14, 0.0  ;;  %v877_v25 = vsel %vm841_vm2, %v827_v39, 0.0 }
 0x119   : > { %v1636_v11 = vpop.f32.mrb[13].mxu1  ;;  %v879_v26 = vsel %vm841_vm2, %v828_v44, 0.0  ;;  %v978_v12 = vsel %vm841_vm2, %v929_v7, 0.0  ;;  %v980_v21 = vsel %vm841_vm2, %v930_v9, 0.0  ;;  %v976_v24 = vsel %vm841_vm2, %v928_v15, 0.0 }
 0x11a   : > { %v1327_v23 = vpop.f32.mrb[14].mxu1  ;;  %v876_v27 = vadd.f32 %v875_v19, %v874_v16  ;;  %v975_v28 = vadd.f32 %v974_v20, %v973_v17  ;;  %v831_v30 = vunpack.c.l.bf16 %v659_v47  ;;  %v832_v33 = vunpack.c.h.bf16 %v659_v47 }
 0x11b   : > { %v1642_v29 = vpop.f32.mrb[15].mxu1  ;;  %v881_v34 = vsel %vm841_vm2, %v829_v18, 0.0  ;;  %v931_v35 = vmul.f32 %v829_v18, %v829_v18  ;;  %v932_v36 = vmul.f32 %v830_v22, %v830_v22  ;;  %v1192_v37 = vpack.c.bf16 %v1597_v40, %v1597_v40 }
 0x11c   : > { %v878_v31 = vadd.f32 %v877_v25, %v876_v27  ;;  %v977_v32 = vadd.f32 %v976_v24, %v975_v28  ;;  %v1190_v1 = vpack.c.bf16 %v1600_v45, %v1600_v45  ;;  %v661_v41 = vpack.c.bf16 %v1605_v51, %v1597_v40 }
 0x11d   : > { %v1193_v42 = vpack.c.bf16 %v1605_v51, %v1605_v51  ;;  %803 = vst.msk [vmem:[%s1520_s8 + $0x68] sm:$0xf] %vm776_vm1, %v1192_v37  ;;  %v660_v43 = vpack.c.bf16 %v1611_v56, %v1600_v45  ;;  %v1191_v44 = vpack.c.bf16 %v1611_v56, %v1611_v56  ;;  %v1196_v46 = vpack.c.bf16 %v1326_v4, %v1326_v4 }
 0x11e   : > { %v979_v10 = vadd.f32 %v978_v12, %v977_v32  ;;  %v880_v39 = vadd.f32 %v879_v26, %v878_v31  ;;  %801 = vst.msk [vmem:[%s1520_s8 + $0x60] sm:$0xf] %vm776_vm1, %v1190_v1  ;;  %v1194_v48 = vpack.c.bf16 %v1636_v11, %v1636_v11  ;;  %v933_v40 = vmul.f32 %v831_v30, %v831_v30 }
 0x11f   : > { %v883_v50 = vsel %vm841_vm2, %v830_v22, 0.0  ;;  %804 = vst.msk [vmem:[%s1520_s8 + $0x6c] sm:$0xf] %vm776_vm1, %v1193_v42  ;;  %v982_v52 = vsel %vm841_vm2, %v931_v35, 0.0  ;;  %802 = vst.msk [vmem:[%s1520_s8 + $0x64] sm:$0xf] %vm776_vm1, %v1191_v44  ;;  %v833_v45 = vunpack.c.l.bf16 %v660_v43  ;;  %v663_v53 = vpack.c.bf16 %v1327_v23, %v1326_v4 }
 0x120   : > { %v882_v49 = vadd.f32 %v881_v34, %v880_v39  ;;  %v981_v51 = vadd.f32 %v980_v21, %v979_v10  ;;  %807 = vst.msk [vmem:[%s1520_s8 + $0x78] sm:$0xf] %vm776_vm1, %v1196_v46  ;;  %805 = vst.msk [vmem:[%s1520_s8 + $0x70] sm:$0xf] %vm776_vm1, %v1194_v48  ;;  %v1197_v55 = vpack.c.bf16 %v1327_v23, %v1327_v23  ;;  %v885_v57 = vsel %vm841_vm2, %v831_v30, 0.0 }
 0x121   : > { %v934_v58 = vmul.f32 %v832_v33, %v832_v33  ;;  %v984_v59 = vsel %vm841_vm2, %v932_v36, 0.0  ;;  %v834_v60 = vunpack.c.h.bf16 %v660_v43  ;;  %v887_v38 = vsel %vm841_vm2, %v832_v33, 0.0 }
 0x122   : > { %v884_v54 = vadd.f32 %v883_v50, %v882_v49  ;;  %v983_v56 = vadd.f32 %v982_v52, %v981_v51  ;;  %808 = vst.msk [vmem:[%s1520_s8 + $0x7c] sm:$0xf] %vm776_vm1, %v1197_v55  ;;  %v986_v63 = vsel %vm841_vm2, %v933_v40, 0.0  ;;  %v835_v47 = vunpack.c.l.bf16 %v661_v41 }
 0x123   : > { %v935_v0 = vmul.f32 %v833_v45, %v833_v45  ;;  %v988_v5 = vsel %vm841_vm2, %v934_v58, 0.0  ;;  %v836_v6 = vunpack.c.h.bf16 %v661_v41  ;;  %v889_v7 = vsel %vm841_vm2, %v833_v45, 0.0 }
 0x124   : > { %v886_v61 = vadd.f32 %v885_v57, %v884_v54  ;;  %v985_v62 = vadd.f32 %v984_v59, %v983_v56  ;;  %v936_v8 = vmul.f32 %v834_v60, %v834_v60  ;;  %v662_v14 = vpack.c.bf16 %v1642_v29, %v1636_v11 }
 0x125   : > { %v1195_v15 = vpack.c.bf16 %v1642_v29, %v1642_v29  ;;  %v937_v4 = vmul.f32 %v835_v47, %v835_v47  ;;  %v891_v16 = vsel %vm841_vm2, %v834_v60, 0.0  ;;  %v990_v17 = vsel %vm841_vm2, %v935_v0, 0.0 }
 0x126   : > { %v987_v2 = vadd.f32 %v986_v63, %v985_v62  ;;  %v888_v3 = vadd.f32 %v887_v38, %v886_v61  ;;  %v837_v20 = vunpack.c.l.bf16 %v662_v14  ;;  %v893_v22 = vsel %vm841_vm2, %v835_v47, 0.0 }
 0x127   : > { %806 = vst.msk [vmem:[%s1520_s8 + $0x74] sm:$0xf] %vm776_vm1, %v1195_v15  ;;  %v938_v23 = vmul.f32 %v836_v6, %v836_v6  ;;  %v992_v25 = vsel %vm841_vm2, %v936_v8, 0.0  ;;  %v838_v26 = vunpack.c.h.bf16 %v662_v14  ;;  %v895_v28 = vsel %vm841_vm2, %v836_v6, 0.0 }
 0x128   : > { %v890_v9 = vadd.f32 %v889_v7, %v888_v3  ;;  %v989_v13 = vadd.f32 %v988_v5, %v987_v2  ;;  %v994_v29 = vsel %vm841_vm2, %v937_v4, 0.0  ;;  %v839_v12 = vunpack.c.l.bf16 %v663_v53 }
 0x129   : > { %v939_v21 = vmul.f32 %v837_v20, %v837_v20  ;;  %v996_v31 = vsel %vm841_vm2, %v938_v23, 0.0  ;;  %v840_v32 = vunpack.c.h.bf16 %v663_v53  ;;  %v897_v33 = vsel %vm841_vm2, %v837_v20, 0.0 }
 0x12a   : > { %v892_v18 = vadd.f32 %v891_v16, %v890_v9  ;;  %v991_v19 = vadd.f32 %v990_v17, %v989_v13  ;;  %v940_v34 = vmul.f32 %v838_v26, %v838_v26  ;;  %v941_v37 = vmul.f32 %v839_v12, %v839_v12 }
 0x12b   : > { %v899_v1 = vsel %vm841_vm2, %v838_v26, 0.0  ;;  %v998_v10 = vsel %vm841_vm2, %v939_v21, 0.0  ;;  %v901_v42 = vsel %vm841_vm2, %v839_v12, 0.0  ;;  %v942_v43 = vmul.f32 %v840_v32, %v840_v32 }
 0x12c   : > { %v894_v11 = vadd.f32 %v893_v22, %v892_v18  ;;  %v993_v27 = vadd.f32 %v992_v25, %v991_v19  ;;  %v1000_v44 = vsel %vm841_vm2, %v940_v34, 0.0  ;;  %v903_v40 = vsel %vm841_vm2, %v840_v32, 0.0 }
 0x12d   : > { %v1002_v49 = vsel %vm841_vm2, %v941_v37, 0.0  ;;  %v1004_v52 = vsel %vm841_vm2, %v942_v43, 0.0 }
 0x12e   : > { %v995_v24 = vadd.f32 %v994_v29, %v993_v27  ;;  %v896_v30 = vadd.f32 %v895_v28, %v894_v11 }
 0x130   : > { %v898_v35 = vadd.f32 %v897_v33, %v896_v30  ;;  %v997_v36 = vadd.f32 %v996_v31, %v995_v24 }
 0x132   : > { %v900_v39 = vadd.f32 %v899_v1, %v898_v35  ;;  %v999_v41 = vadd.f32 %v998_v10, %v997_v36 }
 0x134   : > { %v902_v46 = vadd.f32 %v901_v42, %v900_v39  ;;  %v1001_v48 = vadd.f32 %v1000_v44, %v999_v41 }
 0x136   : > { %v904_v50 = vadd.f32 %v903_v40, %v902_v46  ;;  %v1003_v51 = vadd.f32 %v1002_v49, %v1001_v48 }
 0x138   : > { %v905_v45 = vrot.slane %v904_v50, 4  ;;  %v1005_v53 = vadd.f32 %v1004_v52, %v1003_v51 }
 0x13a   : > { %v906_v55 = vadd.f32 %v905_v45, %v904_v50  ;;  %v1006_v54 = vrot.slane %v1005_v53, 4 }
 0x13c   : > { %v907_v56 = vrot.slane %v906_v55, 2  ;;  %v1007_v57 = vadd.f32 %v1006_v54, %v1005_v53 }
 0x13e   : > { %v908_v58 = vadd.f32 %v907_v56, %v906_v55  ;;  %v1008_v59 = vrot.slane %v1007_v57, 2 }
 0x140   : > { %v909_v60 = vrot.slane %v908_v58, 1  ;;  %v1009_v61 = vadd.f32 %v1008_v59, %v1007_v57 }
 0x142   : > { %v1010_v62 = vrot.slane %v1009_v61, 1  ;;  %v910_v38 = vadd.f32 %v909_v60, %v908_v58 }
 0x144   : > { %v1011_v63 = vadd.f32 %v1010_v62, %v1009_v61 }
 0x146   : > { %v1013_v47 = vsel %vm1012_vm3, %v910_v38, %v1011_v63 }
 0x147   : > { %1015 = vst.msk [vmem:[%s238_s12] sm:$0x3] %vm1014_vm4, %v1013_v47 }
 0x148 PF: > { %s16_s18 = sadd.s32 1, %s1345_s18  }
 0x149   : > { %p13_p5 = scmp.ge.s32.totalorder %s16_s18, 4  }
 0x14b   :  { %15 = sbr.rel (!%p13_p5) target bundleno = 1 (0x1), region = 78 }

// kernel: bottleneck_forward.5
= control target key start
LH: loop header
LB: loop body
LE: loop exit
PB: predicated region body
PF: predicated region fallthrough
CT: control target
= control target key end

     0   :  { %s3147_s21 = smov 0   ;;  %s3149_s22 = smov 0   ;;  %s3952_s0 = inlined_call_operand.vmem [shape: bf16[32,16,16], index: 0, kind: input, shape index: {}, may-alias: {0,1}]   ;;  %s3953_s1 = inlined_call_operand.vmem [shape: bf16[32,16,16], index: 1, kind: input, shape index: {}, may-alias: {0,1}]   ;;  %s3954_s2 = inlined_call_operand.vmem [shape: f32[1,16], index: 2, kind: input, shape index: {}]   ;;  %s3955_s3 = inlined_call_operand.vmem [shape: f32[1,16], index: 3, kind: input, shape index: {}]   ;;  %s3956_s4 = inlined_call_operand.vmem [shape: bf16[3,48,16], index: 4, kind: input, shape index: {}]   ;;  %s3957_s5 = inlined_call_operand.vmem [shape: bf16[512,16], index: 5, kind: output, shape index: {0}]   ;;  %s3958_s6 = inlined_call_operand.vmem [shape: f32[4,2,16], index: 6, kind: output, shape index: {1}]  }
   0x1   :  { %s3151_s23 = smov 0   ;;  %s3153_s24 = smov 0  }
   0x2   :  { %s3155_s25 = smov 0  }
   0x3 LB: > { %s26_s26 = sadd.s32 1, %s3100_s23  ;;  %s29_s27 = sadd.s32 1, %s3104_s24  ;;  %s3108_s25 = sphi %s3155_s25, %s17_s25   ;;  %s3104_s24 = sphi %s3153_s24, %s3974_s24   ;;  %s3100_s23 = sphi %s3151_s23, %s3973_s23   ;;  %s3096_s22 = sphi %s3149_s22, %s3972_s22   ;;  %s3092_s21 = sphi %s3147_s21, %s3971_s21  }
   0x4   : > { %p27_p0 = scmp.ge.s32.totalorder %s26_s26, 2  ;;  %p2631_p1 = scmp.ge.s32.totalorder %s3108_s25, 1 }
   0x5   : > { %p221_p2 = scmp.lt.s32.totalorder %s3108_s25, 5 }
   0x6   : > { %s3976_s26 = smov (%p27_p0, %s26_s26), 0  ;;  %s3978_s27 = smov (!%p27_p0, %s29_s27), %s3104_s24 }
   0x7   : > { %p222_p3 = pnand %p2631_p1, %p221_p2  ;;  %p31_p4 = scmp.ge.s32.totalorder %s3978_s27, 2 }
   0x8   : > { %s2632_s28 = sshll.u32 (!%p222_p3), %s3096_s22, 1  ;;  %s2641_s29 = sshll.u32 (!%p222_p3), %s3096_s22, 4 }
   0x9   : > { %s3980_s27 = smov (%p31_p4, %s3978_s27), 0  ;;  %225 = sbr.rel (%p222_p3) target bundleno = 577 (0x241), region = 36 }
   0xa   : > { %3959 = sst [smem:[#allocation10_spill]] %s3980_s27  ;;  %s261_s30 = sadd.s32 (!%p222_p3), %s3092_s21, %s2632_s28 }
   0xb   : > { %s2642_s7 = sshll.u32 (!%p222_p3), %s3092_s21, 3  ;;  %s2633_s8 = sshll.u32 (!%p222_p3), %s261_s30, 3 }
   0xc   : > { %s2637_s9 = sshll.u32 (!%p222_p3), %s261_s30, 4  ;;  %p263_p5 = scmp.lt.s32.totalorder (!%p222_p3), %s2633_s8, 31 }
   0xd   : > { %p274_p6 = scmp.lt.s32.totalorder (!%p222_p3), %s2637_s9, 63  ;;  %p283_p7 = scmp.lt.s32.totalorder (!%p222_p3), %s261_s30, 3 }
   0xe   : > { %s292_s10 = sadd.s32 (!%p222_p3), %s2642_s7, %s2641_s29  ;;  %s297_s27 = sadd.s32 (!%p222_p3), 15, %s2641_s29 }
   0xf   : > { %s2643_s12 = sadd.s32 (!%p222_p3), 4294967295, %s292_s10  ;;  %s296_s22 = sadd.s32 (!%p222_p3), 8, %s292_s10 }
  0x10   : > { %s3982_s8 = smov (!%p263_p5, %s2633_s8), 31  ;;  %s3984_s9 = smov (!%p274_p6, %s2637_s9), 63 }
  0x11   : > { %s2783_s11 = sshll.u32 %s3982_s8, 3  ;;  %s2638_s16 = sshll.u32 %s3984_s9, 2 }
  0x12   : > { %s3184_s15 = scalar_lea.vmem %s3952_s0, %s2783_s11  ;;  %s3189_s19 = scalar_lea.vmem %s3957_s5, %s2638_s16 }
  0x13   : > { %p294_p8 = scmp.gt.s32.totalorder %s2643_s12, %s2641_s29  ;;  %s3986_s30 = smov (!%p283_p7, %s261_s30), 3 }
  0x14   : > { %s2640_s20 = sshll.u32 %s3986_s30, 1  ;;  %p298_p9 = scmp.lt.s32.totalorder %s296_s22, %s297_s27 }
  0x15   : > { %s3988_s12 = smov (!%p294_p8, %s2643_s12), %s2641_s29  ;;  %s3194_s8 = scalar_lea.vmem %s3958_s6, %s2640_s20 }
  0x16   : > { %s2784_s11 = sshll.u32 %s3988_s12, 3  ;;  %s3990_s22 = smov (!%p298_p9, %s296_s22), %s297_s27 }
  0x17   : > { %s302_s14 = scalar_lea.vmem %s3953_s1, %s2784_s11 }
  0x18   : > { %v3199_v0 = vld [vmem:[%s302_s14] sm:$0xff] }
  0x19   : > { %344 = vsyncadd [#allocation5], 128  ;;  %s2785_s16 = sshll.u32 %s3990_s22, 3  ;;  %vm394_vm0 = vcmask 122880   ;;  %vm395_vm1 = vsmask.f32 256 }
  0x1a   : > { %s347_s10 = scalar_lea.vmem %s3953_s1, %s2785_s16  ;;  %v400_v2 = vld [vmem:[#allocation2 + $0xc] sm:$0x1]  ;;  %vm3208_vm2 = vmand %vm394_vm0, %vm395_vm1  ;;  %v403_v4 = vld [vmem:[#allocation2 + $0x18] sm:$0x1]  ;;  %vm427_vm3 = vsmask.f32 7938 }
  0x1b   : > { %v3204_v1 = vld [vmem:[%s347_s10] sm:$0xff]  ;;  %v401_v6 = vsel %vm3208_vm2, 0, %v400_v2  ;;  %v404_v7 = vsel %vm3208_vm2, 0, %v403_v4  ;;  %v409_v9 = vld [vmem:[#allocation2 + $0x30] sm:$0x1]  ;;  %vm3222_vm4 = vmand %vm394_vm0, %vm427_vm3 }
  0x1c   : > { %v406_v5 = vld [vmem:[#allocation2 + $0x24] sm:$0x1]  ;;  %402 = vst [vmem:[#allocation2 + $0xc] sm:$0x1] %v401_v6  ;;  %405 = vst [vmem:[#allocation2 + $0x18] sm:$0x1] %v404_v7 }
  0x1d   : > { %v407_v8 = vsel %vm3208_vm2, 0, %v406_v5  ;;  %v410_v10 = vsel %vm3208_vm2, 0, %v409_v9  ;;  %v412_v11 = vld [vmem:[#allocation2 + $0x3c] sm:$0x1]  ;;  %v415_v12 = vld [vmem:[#allocation2 + $0x48] sm:$0x1] }
  0x1e   : > { %408 = vst [vmem:[#allocation2 + $0x24] sm:$0x1] %v407_v8  ;;  %v2823_v14 = vld [vmem:[%s3184_s15] sm:$0xff]   ;;  %411 = vst [vmem:[#allocation2 + $0x30] sm:$0x1] %v410_v10  ;;  %v413_v15 = vsel %vm3208_vm2, 0, %v412_v11 }
  0x1f   : > { %v416_v16 = vsel %vm3208_vm2, 0, %v415_v12  ;;  %v418_v17 = vld [vmem:[#allocation2 + $0x54] sm:$0x1]  ;;  %v421_v18 = vld [vmem:[#allocation2 + $0x60] sm:$0x1]  ;;  %v2824_v35 = vunpack.c.l.bf16 %v2823_v14  ;;  %v2825_v36 = vunpack.c.h.bf16 %v2823_v14 }
  0x20   : > { %414 = vst [vmem:[#allocation2 + $0x3c] sm:$0x1] %v413_v15  ;;  %417 = vst [vmem:[#allocation2 + $0x48] sm:$0x1] %v416_v16  ;;  %v419_v19 = vsel %vm3208_vm2, 0, %v418_v17  ;;  %v422_v20 = vsel %vm3208_vm2, 0, %v421_v18 }
  0x21   : > { %v432_v21 = vld [vmem:[#allocation2 + $0x14] sm:$0x1]  ;;  %v435_v22 = vld [vmem:[#allocation2 + $0x20] sm:$0x1]  ;;  %420 = vst [vmem:[#allocation2 + $0x54] sm:$0x1] %v419_v19 }
  0x22   : > { %423 = vst [vmem:[#allocation2 + $0x60] sm:$0x1] %v422_v20  ;;  %v433_v23 = vsel %vm3222_vm4, 0, %v432_v21  ;;  %v436_v24 = vsel %vm3222_vm4, 0, %v435_v22  ;;  %v438_v25 = vld [vmem:[#allocation2 + $0x2c] sm:$0x1] }
  0x23   : > { %v441_v26 = vld [vmem:[#allocation2 + $0x38] sm:$0x1]  ;;  %434 = vst [vmem:[#allocation2 + $0x14] sm:$0x1] %v433_v23  ;;  %437 = vst [vmem:[#allocation2 + $0x20] sm:$0x1] %v436_v24 }
  0x24   : > { %v439_v27 = vsel %vm3222_vm4, 0, %v438_v25  ;;  %v442_v28 = vsel %vm3222_vm4, 0, %v441_v26  ;;  %v444_v29 = vld [vmem:[#allocation2 + $0x44] sm:$0x1]  ;;  %v447_v30 = vld [vmem:[#allocation2 + $0x50] sm:$0x1] }
  0x25   : > { %440 = vst [vmem:[#allocation2 + $0x2c] sm:$0x1] %v439_v27  ;;  %443 = vst [vmem:[#allocation2 + $0x38] sm:$0x1] %v442_v28  ;;  %v445_v31 = vsel %vm3222_vm4, 0, %v444_v29  ;;  %v448_v32 = vsel %vm3222_vm4, 0, %v447_v30 }
  0x26   : > { %v450_v33 = vld [vmem:[#allocation2 + $0x5c] sm:$0x1]  ;;  %v453_v34 = vld [vmem:[#allocation2 + $0x68] sm:$0x1]  ;;  %446 = vst [vmem:[#allocation2 + $0x44] sm:$0x1] %v445_v31 }
  0x27   : > { %449 = vst [vmem:[#allocation2 + $0x50] sm:$0x1] %v448_v32  ;;  %v451_v37 = vsel %vm3222_vm4, 0, %v450_v33  ;;  %v454_v38 = vsel %vm3222_vm4, 0, %v453_v34 }
  0x28   : > { %391 = vsyncadd [#allocation5 + $0x1], 128  ;;  %v397_v39 = vld [vmem:[#allocation2] sm:$0x1]  ;;  %452 = vst [vmem:[#allocation2 + $0x5c] sm:$0x1] %v451_v37 }
  0x29   : > { %455 = vst [vmem:[#allocation2 + $0x68] sm:$0x1] %v454_v38  ;;  %v398_v40 = vsel %vm3208_vm2, 0, %v397_v39  ;;  %v424_v41 = vld [vmem:[#allocation2 + $0x6c] sm:$0x1]  ;;  %v2855_v54 = vld [vmem:[%s3184_s15 + $0x10] sm:$0xff]  }
  0x2a   : > { %v429_v42 = vld [vmem:[#allocation2 + $0x8] sm:$0x1]  ;;  %399 = vst [vmem:[#allocation2] sm:$0x1] %v398_v40  ;;  %v425_v44 = vsel %vm3208_vm2, 0, %v424_v41  ;;  %v2832_v57 = vunpack.c.l.bf16 %v2855_v54  ;;  %vm762_vm5 = vcmask 125952   ;;  %v2833_v60 = vunpack.c.h.bf16 %v2855_v54 }
  0x2b   : > { %v2854_v43 = vld [vmem:[%s3184_s15 + $0x8] sm:$0xff]   ;;  %v430_v45 = vsel %vm3222_vm4, 0, %v429_v42  ;;  %v456_v46 = vld [vmem:[#allocation2 + $0x74] sm:$0x1]  ;;  %v3261_v47 = vld [vmem:[%s3954_s2] ss:$0 sm:$0xff] }
  0x2c   : > { %v2828_v48 = vunpack.c.l.bf16 %v2854_v43  ;;  %v2829_v49 = vunpack.c.h.bf16 %v2854_v43  ;;  %426 = vst [vmem:[#allocation2 + $0x6c] sm:$0x1] %v425_v44  ;;  %431 = vst [vmem:[#allocation2 + $0x8] sm:$0x1] %v430_v45  ;;  %v457_v50 = vsel %vm3222_vm4, 0, %v456_v46  ;;  %v497_v52 = vmul.f32 %v2824_v35, %v3261_v47  ;;  %v2856_v2 = vld [vmem:[%s3184_s15 + $0x18] sm:$0xff]  }
  0x2d   : > { %v3268_v51 = vld [vmem:[%s3955_s3] ss:$0 sm:$0xff]  ;;  %v498_v53 = vmul.f32 %v2825_v36, %v3261_v47  ;;  %458 = vst [vmem:[#allocation2 + $0x74] sm:$0x1] %v457_v50  ;;  %vm599_vm6 = vsmask.f32 4368  ;;  %v501_v63 = vmul.f32 %v2832_v57, %v3261_v47  ;;  %v502_v6 = vmul.f32 %v2833_v60, %v3261_v47  ;;  %vm3288_vm7 = vmand %vm762_vm5, %vm427_vm3 }
  0x2e   : > { %v499_v55 = vmul.f32 %v2828_v48, %v3261_v47  ;;  %v500_v56 = vmul.f32 %v2829_v49, %v3261_v47  ;;  %v519_v58 = vadd.f32 %v3268_v51, %v497_v52  ;;  %v2836_v7 = vunpack.c.l.bf16 %v2856_v2  ;;  %v764_v33 = vld [vmem:[#allocation2 + $0xc] sm:$0xf]  ;;  %vm3294_vm8 = vmor %vm395_vm1, %vm599_vm6  ;;  %v769_v35 = vld [vmem:[#allocation2 + $0x14] sm:$0x1] }
  0x2f   : > { %v520_v59 = vadd.f32 %v3268_v51, %v498_v53  ;;  %v523_v10 = vadd.f32 %v3268_v51, %v501_v63  ;;  %v2837_v11 = vunpack.c.h.bf16 %v2856_v2  ;;  %v524_v14 = vadd.f32 %v3268_v51, %v502_v6  ;;  %v772_v44 = vld [vmem:[#allocation2 + $0x18] sm:$0xf]  ;;  %v776_v45 = vld [vmem:[#allocation2 + $0x20] sm:$0x1]  ;;  %v2858_v57 = vld [vmem:[%s3184_s15 + $0x28] sm:$0xff]  }
  0x30   : > { %v521_v61 = vadd.f32 %v3268_v51, %v499_v55  ;;  %v522_v62 = vadd.f32 %v3268_v51, %v500_v56  ;;  %v535_v4 = vmax.f32 %v519_v58, 0.0  ;;  %v503_v15 = vmul.f32 %v2836_v7, %v3261_v47  ;;  %v2857_v56 = vld [vmem:[%s3184_s15 + $0x20] sm:$0xff]  }
  0x31   : > { %v536_v5 = vmax.f32 %v520_v59, 0.0  ;;  %v539_v18 = vmax.f32 %v523_v10, 0.0  ;;  %v504_v19 = vmul.f32 %v2837_v11, %v3261_v47  ;;  %v540_v32 = vmax.f32 %v524_v14, 0.0 }
  0x32   : > { %v537_v8 = vmax.f32 %v521_v61, 0.0  ;;  %v538_v9 = vmax.f32 %v522_v62, 0.0  ;;  %v2786_v12 = vpack.c.bf16 %v535_v4, %v535_v4  ;;  %v525_v38 = vadd.f32 %v3268_v51, %v503_v15 }
  0x33   : > { %v2787_v13 = vpack.c.bf16 %v536_v5, %v536_v5  ;;  %v2790_v31 = vpack.c.bf16 %v539_v18, %v539_v18  ;;  %v526_v39 = vadd.f32 %v3268_v51, %v504_v19  ;;  %v2791_v63 = vpack.c.bf16 %v540_v32, %v540_v32  ;;  %v779_v5 = vld [vmem:[#allocation2 + $0x24] sm:$0xf] }
  0x34   : > { %v2788_v16 = vpack.c.bf16 %v537_v8, %v537_v8  ;;  %v2789_v17 = vpack.c.bf16 %v538_v9, %v538_v9  ;;  %v602_v20 = vshrl.u32 %v2786_v12, 16  ;;  %v605_v21 = vshll.u32 %v2786_v12, 16 }
  0x35   : > { %v610_v22 = vshrl.u32 %v2787_v13, 16  ;;  %v613_v23 = vshll.u32 %v2787_v13, 16  ;;  %v636_v55 = vshrl.u32 %v2790_v31, 16  ;;  %v639_v61 = vshll.u32 %v2790_v31, 16 }
  0x36   : > { %v619_v24 = vshrl.u32 %v2788_v16, 16  ;;  %v622_v25 = vshll.u32 %v2788_v16, 16  ;;  %v627_v26 = vshrl.u32 %v2789_v17, 16  ;;  %v630_v27 = vshll.u32 %v2789_v17, 16 }
  0x37   : > { %v604_v28 = vrot.slane %v602_v20, 7  ;;  %v612_v30 = vrot.slane %v610_v22, 7  ;;  %v638_v62 = vrot.slane %v636_v55, 7  ;;  %v541_v2 = vmax.f32 %v525_v38, 0.0  ;;  %v783_v22 = vld [vmem:[#allocation2 + $0x2c] sm:$0x1] }
  0x38   : > { %v621_v36 = vrot.slane %v619_v24, 7  ;;  %v629_v37 = vrot.slane %v627_v26, 7  ;;  %v542_v4 = vmax.f32 %v526_v39, 0.0  ;;  %v2840_v6 = vunpack.c.l.bf16 %v2857_v56 }
  0x39   : > { %v607_v40 = vor.u32 %v605_v21, %v604_v28  ;;  %v608_v41 = vrot.slane %v604_v28, 4  ;;  %v615_v42 = vor.u32 %v613_v23, %v612_v30  ;;  %v617_v43 = vrot.slane %v612_v30, 4 }
  0x3a   : > { %v624_v46 = vor.u32 %v622_v25, %v621_v36  ;;  %v625_v48 = vrot.slane %v621_v36, 4  ;;  %v632_v49 = vor.u32 %v630_v27, %v629_v37  ;;  %v634_v50 = vrot.slane %v629_v37, 4 }
  0x3b   : > { %v765_v52 = vsel %vm3288_vm7, %v607_v40, %v764_v33  ;;  %v616_v53 = vsel %vm3294_vm8, %v608_v41, %v615_v42  ;;  %v770_v54 = vsel %vm3208_vm2, %v617_v43, %v769_v35  ;;  %v2841_v7 = vunpack.c.h.bf16 %v2857_v56  ;;  %v786_v33 = vld [vmem:[#allocation2 + $0x30] sm:$0xf]  ;;  %v790_v40 = vld [vmem:[#allocation2 + $0x38] sm:$0x1] }
  0x3c   : > { %766 = vst [vmem:[#allocation2 + $0xc] sm:$0xf] %v765_v52  ;;  %768 = vst.msk [vmem:[#allocation2 + $0x10] sm:$0xf] %vm762_vm5, %v616_v53  ;;  %v773_v58 = vsel %vm3288_vm7, %v624_v46, %v772_v44  ;;  %v633_v59 = vsel %vm3294_vm8, %v625_v48, %v632_v49  ;;  %v777_v60 = vsel %vm3208_vm2, %v634_v50, %v776_v45  ;;  %v2844_v8 = vunpack.c.l.bf16 %v2858_v57  ;;  %v2859_v43 = vld [vmem:[%s3184_s15 + $0x30] sm:$0xff]  }
  0x3d   : > { %771 = vst [vmem:[#allocation2 + $0x14] sm:$0x1] %v770_v54  ;;  %774 = vst [vmem:[#allocation2 + $0x18] sm:$0xf] %v773_v58  ;;  %v2845_v9 = vunpack.c.h.bf16 %v2858_v57  ;;  %v641_v10 = vor.u32 %v639_v61, %v638_v62  ;;  %v642_v11 = vrot.slane %v638_v62, 4  ;;  %v644_v12 = vshrl.u32 %v2791_v63, 16 }
  0x3e   : > { %775 = vst.msk [vmem:[#allocation2 + $0x1c] sm:$0xf] %vm762_vm5, %v633_v59  ;;  %778 = vst [vmem:[#allocation2 + $0x20] sm:$0x1] %v777_v60  ;;  %v647_v13 = vshll.u32 %v2791_v63, 16  ;;  %v2792_v14 = vpack.c.bf16 %v541_v2, %v541_v2  ;;  %v2793_v15 = vpack.c.bf16 %v542_v4, %v542_v4  ;;  %v505_v16 = vmul.f32 %v2840_v6, %v3261_v47  ;;  %v2860_v58 = vld [vmem:[%s3184_s15 + $0x38] sm:$0xff]  }
  0x3f   : > { %v506_v17 = vmul.f32 %v2841_v7, %v3261_v47  ;;  %v780_v18 = vsel %vm3288_vm7, %v641_v10, %v779_v5  ;;  %v646_v19 = vrot.slane %v644_v12, 7  ;;  %v507_v20 = vmul.f32 %v2844_v8, %v3261_v47  ;;  %v793_v7 = vld [vmem:[#allocation2 + $0x3c] sm:$0xf] }
  0x40   : > { %v508_v21 = vmul.f32 %v2845_v9, %v3261_v47  ;;  %781 = vst [vmem:[#allocation2 + $0x24] sm:$0xf] %v780_v18  ;;  %v653_v23 = vshrl.u32 %v2792_v14, 16  ;;  %v656_v24 = vshll.u32 %v2792_v14, 16  ;;  %v661_v25 = vshrl.u32 %v2793_v15, 16 }
  0x41   : > { %v664_v26 = vshll.u32 %v2793_v15, 16  ;;  %v649_v27 = vor.u32 %v647_v13, %v646_v19  ;;  %v651_v28 = vrot.slane %v646_v19, 4  ;;  %v527_v30 = vadd.f32 %v3268_v51, %v505_v16 }
  0x42   : > { %v528_v31 = vadd.f32 %v3268_v51, %v506_v17  ;;  %v655_v32 = vrot.slane %v653_v23, 7  ;;  %v663_v35 = vrot.slane %v661_v25, 7  ;;  %v529_v36 = vadd.f32 %v3268_v51, %v507_v20 }
  0x43   : > { %v530_v37 = vadd.f32 %v3268_v51, %v508_v21  ;;  %v650_v38 = vsel %vm3294_vm8, %v642_v11, %v649_v27  ;;  %v784_v39 = vsel %vm3208_vm2, %v651_v28, %v783_v22  ;;  %v543_v41 = vmax.f32 %v527_v30, 0.0  ;;  %v797_v11 = vld [vmem:[#allocation2 + $0x44] sm:$0x1]  ;;  %v800_v27 = vld [vmem:[#allocation2 + $0x48] sm:$0xf] }
  0x44   : > { %v544_v42 = vmax.f32 %v528_v31, 0.0  ;;  %782 = vst.msk [vmem:[#allocation2 + $0x28] sm:$0xf] %vm762_vm5, %v650_v38  ;;  %785 = vst [vmem:[#allocation2 + $0x2c] sm:$0x1] %v784_v39  ;;  %v658_v44 = vor.u32 %v656_v24, %v655_v32  ;;  %v659_v45 = vrot.slane %v655_v32, 4  ;;  %v666_v46 = vor.u32 %v664_v26, %v663_v35 }
  0x45   : > { %v668_v48 = vrot.slane %v663_v35, 4  ;;  %v2794_v49 = vpack.c.bf16 %v543_v41, %v543_v41  ;;  %v545_v52 = vmax.f32 %v529_v36, 0.0  ;;  %v546_v53 = vmax.f32 %v530_v37, 0.0  ;;  %v804_v28 = vld [vmem:[#allocation2 + $0x50] sm:$0x1] }
  0x46   : > { %v2795_v50 = vpack.c.bf16 %v544_v42, %v544_v42  ;;  %v787_v54 = vsel %vm3288_vm7, %v658_v44, %v786_v33  ;;  %v667_v55 = vsel %vm3294_vm8, %v659_v45, %v666_v46  ;;  %v2848_v57 = vunpack.c.l.bf16 %v2859_v43 }
  0x47   : > { %v791_v56 = vsel %vm3208_vm2, %v668_v48, %v790_v40  ;;  %788 = vst [vmem:[#allocation2 + $0x30] sm:$0xf] %v787_v54  ;;  %789 = vst.msk [vmem:[#allocation2 + $0x34] sm:$0xf] %vm762_vm5, %v667_v55  ;;  %v670_v59 = vshrl.u32 %v2794_v49, 16  ;;  %v673_v60 = vshll.u32 %v2794_v49, 16  ;;  %v2796_v63 = vpack.c.bf16 %v545_v52, %v545_v52 }
  0x48   : > { %792 = vst [vmem:[#allocation2 + $0x38] sm:$0x1] %v791_v56  ;;  %v678_v61 = vshrl.u32 %v2795_v50, 16  ;;  %v681_v62 = vshll.u32 %v2795_v50, 16  ;;  %v2797_v2 = vpack.c.bf16 %v546_v53, %v546_v53  ;;  %v509_v4 = vmul.f32 %v2848_v57, %v3261_v47 }
  0x49   : > { %v2849_v5 = vunpack.c.h.bf16 %v2859_v43  ;;  %v672_v6 = vrot.slane %v670_v59, 7  ;;  %v2852_v9 = vunpack.c.l.bf16 %v2860_v58  ;;  %v2853_v10 = vunpack.c.h.bf16 %v2860_v58  ;;  %v807_v58 = vld [vmem:[#allocation2 + $0x54] sm:$0xf] }
  0x4a   : > { %v680_v8 = vrot.slane %v678_v61, 7  ;;  %v687_v12 = vshrl.u32 %v2796_v63, 16  ;;  %v690_v13 = vshll.u32 %v2796_v63, 16  ;;  %v695_v14 = vshrl.u32 %v2797_v2, 16 }
  0x4b   : > { %v698_v15 = vshll.u32 %v2797_v2, 16  ;;  %v675_v16 = vor.u32 %v673_v60, %v672_v6  ;;  %v676_v17 = vrot.slane %v672_v6, 4  ;;  %v531_v22 = vadd.f32 %v3268_v51, %v509_v4  ;;  %v811_v4 = vld [vmem:[#allocation2 + $0x5c] sm:$0x1] }
  0x4c   : > { %v683_v18 = vor.u32 %v681_v62, %v680_v8  ;;  %v685_v19 = vrot.slane %v680_v8, 4  ;;  %v689_v20 = vrot.slane %v687_v12, 7  ;;  %v697_v21 = vrot.slane %v695_v14, 7 }
  0x4d   : > { %v510_v23 = vmul.f32 %v2849_v5, %v3261_v47  ;;  %v794_v24 = vsel %vm3288_vm7, %v675_v16, %v793_v7  ;;  %v511_v30 = vmul.f32 %v2852_v9, %v3261_v47  ;;  %v547_v36 = vmax.f32 %v531_v22, 0.0  ;;  %v814_v5 = vld [vmem:[#allocation2 + $0x60] sm:$0xf] }
  0x4e   : > { %v684_v25 = vsel %vm3294_vm8, %v676_v17, %v683_v18  ;;  %v798_v26 = vsel %vm3208_vm2, %v685_v19, %v797_v11  ;;  %795 = vst [vmem:[#allocation2 + $0x3c] sm:$0xf] %v794_v24  ;;  %v692_v31 = vor.u32 %v690_v13, %v689_v20  ;;  %v693_v32 = vrot.slane %v689_v20, 4  ;;  %v818_v17 = vld [vmem:[#allocation2 + $0x68] sm:$0x1] }
  0x4f   : > { %796 = vst.msk [vmem:[#allocation2 + $0x40] sm:$0xf] %vm762_vm5, %v684_v25  ;;  %799 = vst [vmem:[#allocation2 + $0x44] sm:$0x1] %v798_v26  ;;  %v700_v33 = vor.u32 %v698_v15, %v697_v21  ;;  %v702_v35 = vrot.slane %v697_v21, 4  ;;  %v532_v37 = vadd.f32 %v3268_v51, %v510_v23  ;;  %v533_v38 = vadd.f32 %v3268_v51, %v511_v30 }
  0x50   : > { %v512_v39 = vmul.f32 %v2853_v10, %v3261_v47  ;;  %v801_v40 = vsel %vm3288_vm7, %v692_v31, %v800_v27  ;;  %v2798_v43 = vpack.c.bf16 %v547_v36, %v547_v36 }
  0x51   : > { %v701_v41 = vsel %vm3294_vm8, %v693_v32, %v700_v33  ;;  %v805_v42 = vsel %vm3208_vm2, %v702_v35, %v804_v28  ;;  %802 = vst [vmem:[#allocation2 + $0x48] sm:$0xf] %v801_v40  ;;  %v548_v44 = vmax.f32 %v532_v37, 0.0  ;;  %v549_v45 = vmax.f32 %v533_v38, 0.0 }
  0x52   : > { %803 = vst.msk [vmem:[#allocation2 + $0x4c] sm:$0xf] %vm762_vm5, %v701_v41  ;;  %806 = vst [vmem:[#allocation2 + $0x50] sm:$0x1] %v805_v42  ;;  %v534_v46 = vadd.f32 %v3268_v51, %v512_v39  ;;  %v704_v48 = vshrl.u32 %v2798_v43, 16  ;;  %v707_v49 = vshll.u32 %v2798_v43, 16 }
  0x53   : > { %v2799_v50 = vpack.c.bf16 %v548_v44, %v548_v44  ;;  %v2800_v52 = vpack.c.bf16 %v549_v45, %v549_v45 }
  0x54   : > { %v550_v53 = vmax.f32 %v534_v46, 0.0  ;;  %v706_v54 = vrot.slane %v704_v48, 7 }
  0x55   : > { %v712_v55 = vshrl.u32 %v2799_v50, 16  ;;  %v715_v56 = vshll.u32 %v2799_v50, 16  ;;  %v721_v57 = vshrl.u32 %v2800_v52, 16  ;;  %v724_v59 = vshll.u32 %v2800_v52, 16 }
  0x56   : > { %v2801_v60 = vpack.c.bf16 %v550_v53, %v550_v53  ;;  %v709_v61 = vor.u32 %v707_v49, %v706_v54  ;;  %v710_v62 = vrot.slane %v706_v54, 4 }
  0x57   : > { %v714_v63 = vrot.slane %v712_v55, 7  ;;  %v723_v2 = vrot.slane %v721_v57, 7 }
  0x58   : > { %v729_v6 = vshrl.u32 %v2801_v60, 16  ;;  %v732_v7 = vshll.u32 %v2801_v60, 16  ;;  %v808_v8 = vsel %vm3288_vm7, %v709_v61, %v807_v58 }
  0x59   : > { %v717_v9 = vor.u32 %v715_v56, %v714_v63  ;;  %v719_v10 = vrot.slane %v714_v63, 4  ;;  %v726_v11 = vor.u32 %v724_v59, %v723_v2  ;;  %809 = vst [vmem:[#allocation2 + $0x54] sm:$0xf] %v808_v8  ;;  %v727_v12 = vrot.slane %v723_v2, 4 }
  0x5a   : > { %v731_v13 = vrot.slane %v729_v6, 7 }
  0x5b   : > { %v718_v14 = vsel %vm3294_vm8, %v710_v62, %v717_v9  ;;  %v812_v15 = vsel %vm3208_vm2, %v719_v10, %v811_v4  ;;  %v815_v16 = vsel %vm3288_vm7, %v726_v11, %v814_v5 }
  0x5c   : > { %810 = vst.msk [vmem:[#allocation2 + $0x58] sm:$0xf] %vm762_vm5, %v718_v14  ;;  %813 = vst [vmem:[#allocation2 + $0x5c] sm:$0x1] %v812_v15  ;;  %v734_v18 = vor.u32 %v732_v7, %v731_v13  ;;  %v736_v19 = vrot.slane %v731_v13, 4 }
  0x5d   : > { %816 = vst [vmem:[#allocation2 + $0x60] sm:$0xf] %v815_v16 }
  0x5e   : > { %v735_v20 = vsel %vm3294_vm8, %v727_v12, %v734_v18  ;;  %v819_v21 = vsel %vm3208_vm2, %v736_v19, %v818_v17 }
  0x5f   : > { %817 = vst.msk [vmem:[#allocation2 + $0x64] sm:$0xf] %vm762_vm5, %v735_v20  ;;  %820 = vst [vmem:[#allocation2 + $0x68] sm:$0x1] %v819_v21 }
  0x60   : > { %3086 = dma.done.wait [#allocation5], 128 }
  0x61   : > { %3087 = vsyncadd [#allocation5], 4294967168 }
  0x62   : > { %3088 = dma.done.wait [#allocation5 + $0x1], 128 }
  0x63   : > { %3089 = vsyncadd [#allocation5 + $0x1], 4294967168  ;;  %v829_v22 = vunpack.c.l.bf16 %v3199_v0  ;;  %v830_v23 = vunpack.c.h.bf16 %v3199_v0  ;;  %p845_p10 = scmp.gt.s32.totalorder %s3092_s21, 0  ;;  %vm1125_vm9 = vcmask 1046528   ;;  %v3390_v0 = vld [vmem:[#allocation2 + $0x30] sm:$0xff]   ;;  %v3397_v40 = vld [vmem:[#allocation2 + $0x3c] sm:$0xff]  }
  0x64   : > { %v3009_v33 = vld [vmem:[#allocation2 + $0x38] ss:$0 sps:$4 sm:$0x11]   ;;  %vm1012_vm11 = vsmask.f32 7424  ;;  %v3010_v35 = vld [vmem:[#allocation2 + $0xc] sm:$0xff]  }
  0x65   : > { %v833_v24 = vmul.f32 %v3261_v47, %v829_v22  ;;  %v834_v25 = vmul.f32 %v3261_v47, %v830_v23  ;;  %s846_s15 = scalar_select %p845_p10, 1, 0  ;;  %v1138_v37 = vrot.slane %v3390_v0, 1  ;;  %v1139_v38 = vrot.slane %v3009_v33, 1  ;;  %v3404_v50 = vld [vmem:[#allocation2 + $0x48] sm:$0xff]   ;;  %v3415_v6 = vld [vmem:[#allocation2 + $0x54] sm:$0xff]  }
  0x66   : > { %v3011_v39 = vld [vmem:[#allocation2 + $0x14] ss:$0 sps:$4 sm:$0x11]   ;;  %v1129_v41 = vrot.slane %v3010_v35, 1  ;;  %v1062_v42 = vshrl.u32 %v3390_v0, 16  ;;  %s3110_s20 = smov 32  }
  0x67   : > { %v837_v26 = vadd.f32 %v3268_v51, %v833_v24  ;;  %v3383_v27 = vadd.f32 %v3268_v51, %v834_v25  ;;  %v847_v28 = vstv %s846_s15  ;;  %v1140_v43 = vsel %vm1125_vm9, %v1138_v37, %v1139_v38  ;;  %v3013_v45 = vld [vmem:[#allocation2 + $0x44] ss:$0 sps:$4 sm:$0x11]   ;;  %v3015_v57 = vld [vmem:[#allocation2 + $0x50] ss:$0 sps:$4 sm:$0x11]  }
  0x68   : > { %vm3386_vm10 = vcmp.eq.s32.totalorder %v847_v28, 1  ;;  %v1130_v44 = vrot.slane %v3011_v39, 1  ;;  %1158 = vrot.lane.b32.xlu1 %v1140_v43, %s3110_s20  ;;  %v1141_v46 = vrot.slane %v3397_v40, 1  ;;  %v1064_v48 = vshll.u32 %v3390_v0, 16  ;;  %v3419_v16 = vld [vmem:[#allocation2 + $0x18] sm:$0xff]   ;;  %s3111_s22 = smov 16  }
  0x69   : > { %v841_v30 = vmax.f32 %v837_v26, 0.0  ;;  %v842_v31 = vmax.f32 %v3383_v27, 0.0  ;;  %v1069_v49 = vshll.u32 %v3009_v33, 16  ;;  %v1142_v53 = vrot.slane %v3013_v45, 1  ;;  %v3429_v33 = vld [vmem:[#allocation2 + $0x24] sm:$0xff]   ;;  %v3436_v43 = vld [vmem:[#allocation2 + $0xc] sm:$0xff]  }
  0x6a   : > { %v1131_v52 = vsel %vm1125_vm9, %v1129_v41, %v1130_v44  ;;  %v1074_v54 = vshrl.u32 %v3397_v40, 16  ;;  %v1066_v55 = vrot.slane %v1064_v48, 1  ;;  %v1144_v58 = vrot.slane %v3404_v50, 1  ;;  %v3017_v15 = vld [vmem:[#allocation2 + $0x5c] ss:$0 sps:$4 sm:$0x11]  }
  0x6b   : > { %v3394_v36 = vsel %vm3386_vm10, %v841_v30, 0.0  ;;  %1152 = vrot.lane.b32.xlu0 %v1131_v52, %s3110_s20  ;;  %v1071_v56 = vrot.slane %v1069_v49, 1  ;;  %v1143_v59 = vsel %vm1125_vm9, %v1141_v46, %v1142_v53  ;;  %v1076_v60 = vshll.u32 %v3397_v40, 16  ;;  %v3426_v28 = vld [vmem:[#allocation2 + $0x20] ss:$0 sps:$4 sm:$0x11]  }
  0x6c   : > { %v1081_v61 = vshll.u32 %v3013_v45, 16  ;;  %v1086_v62 = vshrl.u32 %v3404_v50, 16  ;;  %1160 = vrot.lane.b32.xlu1 %v1143_v59, %s3110_s20  ;;  %v1067_v63 = vor.u32 %v1066_v55, %v1062_v42  ;;  %v1145_v2 = vrot.slane %v3015_v57, 1  ;;  %v3438_v44 = vld [vmem:[#allocation2 + $0x18] sm:$0xff]   ;;  %p851_p11 = scmp.lt.s32.totalorder %s3092_s21, 1 }
  0x6d   : > { %v1088_v4 = vshll.u32 %v3404_v50, 16  ;;  %v1093_v5 = vshll.u32 %v3015_v57, 16  ;;  %v1078_v7 = vrot.slane %v1076_v60, 1  ;;  %v1026_v9 = vshrl.u32 %v3010_v35, 16 }
  0x6e   : > { %v1083_v8 = vrot.slane %v1081_v61, 1  ;;  %v1028_v10 = vshll.u32 %v3010_v35, 16  ;;  %v1072_v11 = vsel %vm1012_vm11, %v1067_v63, %v1071_v56  ;;  %v1146_v12 = vsel %vm1125_vm9, %v1144_v58, %v1145_v2  ;;  %v3442_v49 = vld [vmem:[#allocation2 + $0x2c] ss:$0 sps:$4 sm:$0x11]  }
  0x6f   : > { %v1090_v13 = vrot.slane %v1088_v4, 1  ;;  %v1095_v14 = vrot.slane %v1093_v5, 1  ;;  %1117 = vrot.lane.b32.xlu0 %v1072_v11, %s3111_s22  ;;  %v1079_v17 = vor.u32 %v1078_v7, %v1074_v54  ;;  %v1033_v19 = vshll.u32 %v3011_v39, 16  ;;  %v3023_v61 = vld [vmem:[#allocation2 + $0x14] ss:$0 sps:$4 sm:$0x11]  }
  0x70   : > { %v1030_v18 = vrot.slane %v1028_v10, 1  ;;  %v1098_v20 = vshrl.u32 %v3415_v6, 16  ;;  %1162 = vrot.lane.b32.xlu1 %v1146_v12, %s3110_s20  ;;  %v1100_v22 = vshll.u32 %v3415_v6, 16  ;;  %v1105_v23 = vshll.u32 %v3017_v15, 16  ;;  %s3546_s28 = scalar_select %p851_p11, 1, 0 }
  0x71   : > { %v1091_v21 = vor.u32 %v1090_v13, %v1086_v62  ;;  %v1084_v24 = vsel %vm1012_vm11, %v1079_v17, %v1083_v8  ;;  %v1035_v26 = vrot.slane %v1033_v19, 1  ;;  %v1038_v30 = vshrl.u32 %v3419_v16, 16  ;;  %v3025_v12 = vld [vmem:[#allocation2 + $0x20] ss:$0 sps:$4 sm:$0x11]  }
  0x72   : > { %v1031_v25 = vor.u32 %v1030_v18, %v1026_v9  ;;  %v1102_v37 = vrot.slane %v1100_v22, 1  ;;  %v1107_v38 = vrot.slane %v1105_v23, 1  ;;  %v1040_v39 = vshll.u32 %v3419_v16, 16 }
  0x73   : > { %v1096_v35 = vsel %vm1012_vm11, %v1091_v21, %v1095_v14  ;;  %1119 = vrot.lane.b32.xlu0 %v1084_v24, %s3111_s22  ;;  %v1045_v41 = vshll.u32 %v3426_v28, 16  ;;  %v1147_v42 = vrot.slane %v3415_v6, 1  ;;  %v1148_v53 = vrot.slane %v3017_v15, 1 }
  0x74   : > { %1121 = vrot.lane.b32.xlu1 %v1096_v35, %s3111_s22  ;;  %v1036_v45 = vsel %vm1012_vm11, %v1031_v25, %v1035_v26  ;;  %v1103_v46 = vor.u32 %v1102_v37, %v1098_v20  ;;  %v1042_v48 = vrot.slane %v1040_v39, 1  ;;  %v1050_v54 = vshrl.u32 %v3429_v33, 16  ;;  %v883_v35 = vld [vmem:[#allocation2] sm:$0xf]  ;;  %v887_v37 = vld [vmem:[#allocation2 + $0x8] sm:$0x1] }
  0x75   : > { %v1047_v52 = vrot.slane %v1045_v41, 1  ;;  %v1052_v55 = vshll.u32 %v3429_v33, 16  ;;  %v1057_v58 = vshll.u32 %v3442_v49, 16  ;;  %v1459_v59 = vshrl.u32 %v3436_v43, 16 }
  0x76   : > { %v1108_v56 = vsel %vm1012_vm11, %v1103_v46, %v1107_v38  ;;  %v1043_v57 = vor.u32 %v1042_v48, %v1038_v30  ;;  %v1461_v62 = vshll.u32 %v3436_v43, 16  ;;  %v1471_v63 = vshrl.u32 %v3438_v44, 16 }
  0x77   : > { %1111 = vrot.lane.b32.xlu0 %v1036_v45, %s3111_s22  ;;  %v1054_v60 = vrot.slane %v1052_v55, 1  ;;  %v1059_v4 = vrot.slane %v1057_v58, 1  ;;  %v1473_v5 = vshll.u32 %v3438_v44, 16  ;;  %v2802_v7 = vpack.c.bf16 %v3394_v36, %v3394_v36  ;;  %v3029_v45 = vld [vmem:[#allocation2 + $0x38] ss:$0 sps:$4 sm:$0x11]  }
  0x78   : > { %1123 = vrot.lane.b32.xlu1 %v1108_v56, %s3111_s22  ;;  %v1048_v2 = vsel %vm1012_vm11, %v1043_v57, %v1047_v52  ;;  %v1149_v8 = vsel %vm1125_vm9, %v1147_v42, %v1148_v53  ;;  %v1463_v10 = vrot.slane %v1461_v62, 1  ;;  %v1466_v11 = vshll.u32 %v3023_v61, 16 }
  0x79   : > { %v1055_v9 = vor.u32 %v1054_v60, %v1050_v54  ;;  %v1475_v13 = vrot.slane %v1473_v5, 1  ;;  %v1132_v14 = vrot.slane %v3419_v16, 1  ;;  %v850_v15 = vsel %vm3386_vm10, %v842_v31, 0.0  ;;  %v3468_v31 = vld [vmem:[#allocation2 + $0x30] sm:$0xff]  }
  0x7a   : > { %v1464_v17 = vor.u32 %v1463_v10, %v1459_v59  ;;  %v1468_v18 = vrot.slane %v1466_v11, 1  ;;  %v1133_v36 = vrot.slane %v3426_v28, 1  ;;  %v2803_v19 = vpack.c.bf16 %v850_v15, %v850_v15  ;;  %v3492_v5 = vld [vmem:[#allocation2 + $0x2c] ss:$0 sps:$4 sm:$0x11]  }
  0x7b   : > { %1113 = vrot.lane.b32.xlu0 %v1048_v2, %s3111_s22  ;;  %v1060_v20 = vsel %vm1012_vm11, %v1055_v9, %v1059_v4  ;;  %v1476_v21 = vor.u32 %v1475_v13, %v1471_v63  ;;  %v1478_v22 = vshll.u32 %v3025_v12, 16  ;;  %v864_v23 = vshrl.u32 %v2802_v7, 16  ;;  %v3488_v2 = vld [vmem:[#allocation2 + $0x24] sm:$0xff]   ;;  %v3497_v11 = vld [vmem:[#allocation2 + $0x2c] ss:$0 sps:$4 sm:$0x11]  }
  0x7c   : > { %1164 = vrot.lane.b32.xlu1 %v1149_v8, %s3110_s20  ;;  %v1469_v24 = vsel %vm1012_vm11, %v1464_v17, %v1468_v18  ;;  %v867_v27 = vshll.u32 %v2802_v7, 16  ;;  %v872_v25 = vshrl.u32 %v2803_v19, 16  ;;  %v875_v32 = vshll.u32 %v2803_v19, 16  ;;  %v3490_v4 = vld [vmem:[#allocation2 + $0x24] sm:$0xff]  }
  0x7d   : > { %v1480_v26 = vrot.slane %v1478_v22, 1  ;;  %v866_v30 = vrot.slane %v864_v23, 7  ;;  %v1134_v39 = vsel %vm1125_vm9, %v1132_v14, %v1133_v36  ;;  %v1570_v52 = vrot.slane %v3436_v43, 1 }
  0x7e   : > { %v874_v28 = vrot.slane %v872_v25, 7  ;;  %v1571_v53 = vrot.slane %v3023_v61, 1  ;;  %v1497_v55 = vshll.u32 %v3468_v31, 16  ;;  %v1495_v58 = vshrl.u32 %v3468_v31, 16 }
  0x7f   : > { %1115 = vrot.lane.b32.xlu0 %v1060_v20, %s3111_s22  ;;  %v1481_v38 = vsel %vm1012_vm11, %v1476_v21, %v1480_v26  ;;  %v869_v41 = vor.u32 %v867_v27, %v866_v30  ;;  %v870_v42 = vrot.slane %v866_v30, 4  ;;  %v1502_v60 = vshll.u32 %v3029_v45, 16  ;;  %v3512_v27 = vld [vmem:[#allocation2 + $0x48] sm:$0xff]  }
  0x80   : > { %1554 = vrot.lane.b32.xlu1 %v1469_v24, %s3111_s22  ;;  %v877_v46 = vor.u32 %v875_v32, %v874_v28  ;;  %v879_v48 = vrot.slane %v874_v28, 4  ;;  %v1499_v59 = vrot.slane %v1497_v55, 1  ;;  %v1572_v61 = vsel %vm1125_vm9, %v1570_v52, %v1571_v53  ;;  %v3510_v24 = vld [vmem:[#allocation2 + $0x18] sm:$0xff]   ;;  %v3526_v53 = vld [vmem:[#allocation2 + $0x20] ss:$0 sps:$4 sm:$0x11]  }
  0x81   : > { %v884_v54 = vsel %vm3288_vm7, %v869_v41, %v883_v35  ;;  %v1573_v62 = vrot.slane %v3438_v44, 1  ;;  %v1574_v63 = vrot.slane %v3025_v12, 1  ;;  %v1504_v8 = vrot.slane %v1502_v60, 1 }
  0x82   : > { %v878_v56 = vsel %vm3294_vm8, %v870_v42, %v877_v46  ;;  %885 = vst [vmem:[#allocation2] sm:$0xf] %v884_v54  ;;  %v888_v57 = vsel %vm3208_vm2, %v879_v48, %v887_v37  ;;  %v1500_v7 = vor.u32 %v1499_v59, %v1495_v58  ;;  %v1932_v10 = vshll.u32 %v3488_v2, 16  ;;  %v3521_v42 = vld [vmem:[#allocation2 + $0x50] ss:$0 sps:$4 sm:$0x11]  }
  0x83   : > { %1556 = vrot.lane.b32.xlu0 %v1481_v38, %s3111_s22  ;;  %886 = vst.msk [vmem:[#allocation2 + $0x4] sm:$0xf] %vm762_vm5, %v878_v56  ;;  %889 = vst [vmem:[#allocation2 + $0x8] sm:$0x1] %v888_v57  ;;  %v1575_v9 = vsel %vm1125_vm9, %v1573_v62, %v1574_v63  ;;  %v1485_v13 = vshll.u32 %v3490_v4, 16  ;;  %v1579_v12 = vrot.slane %v3468_v31, 1  ;;  %v831_v63 = vunpack.c.l.bf16 %v3204_v1 }
  0x84   : > { %1154 = vrot.lane.b32.xlu1 %v1134_v39, %s3110_s20  ;;  %v1505_v17 = vsel %vm1012_vm11, %v1500_v7, %v1504_v8  ;;  %v1580_v18 = vrot.slane %v3029_v45, 1  ;;  %v1930_v36 = vshrl.u32 %v3488_v2, 16  ;;  %v1937_v19 = vshll.u32 %v3492_v5, 16  ;;  %v3531_v57 = vld [vmem:[#allocation2 + $0x3c] sm:$0xff]  }
  0x85   : > { %v1934_v23 = vrot.slane %v1932_v10, 1  ;;  %v1135_v30 = vrot.slane %v3429_v33, 1  ;;  %v1136_v35 = vrot.slane %v3442_v49, 1  ;;  %v1483_v28 = vshrl.u32 %v3490_v4, 16  ;;  %v3541_v10 = vld [vmem:[#allocation2 + $0x3c] sm:$0xff]  }
  0x86   : > { %v1490_v39 = vshll.u32 %v3497_v11, 16  ;;  %v1581_v41 = vsel %vm1125_vm9, %v1579_v12, %v1580_v18  ;;  %v1939_v48 = vrot.slane %v1937_v19, 1  ;;  %v1521_v49 = vshll.u32 %v3512_v27, 16 }
  0x87   : > { %v1935_v46 = vor.u32 %v1934_v23, %v1930_v36  ;;  %v1487_v52 = vrot.slane %v1485_v13, 1  ;;  %v1920_v55 = vshll.u32 %v3510_v24, 16  ;;  %v2032_v56 = vrot.slane %v3488_v2, 1  ;;  %v3552_v36 = vld [vmem:[#allocation2 + $0x44] ss:$0 sps:$4 sm:$0x11]  }
  0x88   : > { %1594 = vrot.lane.b32.xlu1 %v1572_v61, %s3110_s20  ;;  %v2033_v58 = vrot.slane %v3492_v5, 1  ;;  %v1526_v59 = vshll.u32 %v3521_v42, 16  ;;  %v1519_v61 = vshrl.u32 %v3512_v27, 16  ;;  %v1523_v62 = vrot.slane %v1521_v49, 1 }
  0x89   : > { %v1940_v60 = vsel %vm1012_vm11, %v1935_v46, %v1939_v48  ;;  %v1137_v7 = vsel %vm1125_vm9, %v1135_v30, %v1136_v35  ;;  %v1488_v8 = vor.u32 %v1487_v52, %v1483_v28  ;;  %v832_v13 = vunpack.c.h.bf16 %v3204_v1 }
  0x8a   : > { %v3500_v14 = vld [vmem:[#allocation2] sm:$0xff]   ;;  %v3027_v15 = vld [vmem:[#allocation2 + $0x8] ss:$0 sps:$4 sm:$0x11]   ;;  %v1576_v5 = vrot.slane %v3490_v4, 1  ;;  %v1918_v12 = vshrl.u32 %v3510_v24, 16  ;;  %v2034_v19 = vsel %vm1125_vm9, %v2032_v56, %v2033_v58  ;;  %v1524_v1 = vor.u32 %v1523_v62, %v1519_v61 }
  0x8b   : > { %v1126_v20 = vrot.slane %v3500_v14, 1  ;;  %v1014_v21 = vshrl.u32 %v3500_v14, 16  ;;  %v1016_v22 = vshll.u32 %v3500_v14, 16  ;;  %v1127_v25 = vrot.slane %v3027_v15, 1 }
  0x8c   : > { %1596 = vrot.lane.b32.xlu1 %v1575_v9, %s3110_s20  ;;  %v1021_v32 = vshll.u32 %v3027_v15, 16  ;;  %v1492_v9 = vrot.slane %v1490_v39, 1  ;;  %v1922_v15 = vrot.slane %v1920_v55, 1  ;;  %v1528_v18 = vrot.slane %v1526_v59, 1 }
  0x8d   : > { %v1018_v26 = vrot.slane %v1016_v22, 1  ;;  %v1128_v37 = vsel %vm1125_vm9, %v1126_v20, %v1127_v25  ;;  %v3556_v20 = vld [vmem:[#allocation2 + $0x44] ss:$0 sps:$4 sm:$0x11]   ;;  %v3559_v22 = vld [vmem:[#allocation2 + $0x30] sm:$0xff]   ;;  %v835_v23 = vmul.f32 %v3261_v47, %v831_v63  ;;  %v836_v30 = vmul.f32 %v3261_v47, %v832_v13  ;;  %v3057_v13 = vld [vmem:[%s3956_s4 + $0x8] sm:$0xff]  }
  0x8e   : > { %v1023_v38 = vrot.slane %v1021_v32, 1  ;;  %1150 = vrot.lane.b32.xlu0 %v1128_v37, %s3110_s20  ;;  %v1493_v25 = vsel %vm1012_vm11, %v1488_v8, %v1492_v9  ;;  %v1577_v32 = vrot.slane %v3497_v11, 1  ;;  %v1923_v35 = vor.u32 %v1922_v15, %v1918_v12  ;;  %v3568_v39 = vld [vmem:[#allocation2 + $0x38] ss:$0 sps:$4 sm:$0x11]  }
  0x8f   : > { %v1019_v45 = vor.u32 %v1018_v26, %v1014_v21  ;;  %v1956_v21 = vshll.u32 %v3531_v57, 16  ;;  %v1509_v26 = vshll.u32 %v3541_v10, 16  ;;  %v2029_v37 = vrot.slane %v3510_v24, 1  ;;  %v3585_v58 = vld [vmem:[#allocation2 + $0x68] ss:$0 sps:$4 sm:$0x11]  }
  0x90   : > { %1560 = vrot.lane.b32.xlu1 %v1505_v17, %s3111_s22  ;;  %v1925_v17 = vshll.u32 %v3526_v53, 16  ;;  %v1514_v11 = vshll.u32 %v3552_v36, 16  ;;  %v1585_v46 = vrot.slane %v3512_v27, 1  ;;  %v1586_v47 = vrot.slane %v3521_v42, 1 }
  0x91   : > { %v1024_v54 = vsel %vm1012_vm11, %v1019_v45, %v1023_v38  ;;  %v2030_v38 = vrot.slane %v3526_v53, 1  ;;  %v1507_v45 = vshrl.u32 %v3541_v10, 16  ;;  %v1529_v48 = vsel %vm1012_vm11, %v1524_v1, %v1528_v18  ;;  %v3605_v1 = vld [vmem:[#allocation2 + $0x54] sm:$0xff]  }
  0x92   : > { %1109 = vrot.lane.b32.xlu0 %v1024_v54, %s3111_s22  ;;  %v1927_v28 = vrot.slane %v1925_v17, 1  ;;  %v1954_v49 = vshrl.u32 %v3531_v57, 16  ;;  %v1958_v52 = vrot.slane %v1956_v21, 1  ;;  %v1961_v53 = vshll.u32 %v3556_v20, 16  ;;  %v3056_v54 = vld [vmem:[%s3956_s4] sm:$0xff]  }
  0x93   : > { %v1578_v55 = vsel %vm1125_vm9, %v1576_v5, %v1577_v32  ;;  %v1511_v56 = vrot.slane %v1509_v26, 1  ;;  %v839_v42 = vadd.f32 %v3268_v51, %v835_v23  ;;  %v1944_v59 = vshll.u32 %v3559_v22, 16  ;;  %2960 = vmatprep.subr.bf16.mxu1 %v3056_v54  ;;  %2894 = vmatprep.subr.bf16.mxu0 %v3056_v54 }
  0x94   : > { %1600 = vrot.lane.b32.xlu1 %v1581_v41, %s3110_s20  ;;  %v3570_v41 = vld [vmem:[#allocation2 + $0x60] sm:$0xff]   ;;  %v840_v61 = vadd.f32 %v3268_v51, %v836_v30  ;;  %v853_v62 = vstv %s3546_s28  ;;  %v1928_v63 = vsel %vm1012_vm11, %v1923_v35, %v1927_v28  ;;  %v1582_v8 = vrot.slane %v3541_v10, 1  ;;  %2963 = vmatpush3.bf16.msra.mxu1 %v3056_v54  ;;  %v3611_v30 = vld [vmem:[#allocation2 + $0x54] sm:$0xff]  }
  0x95   : > { %v1583_v9 = vrot.slane %v3552_v36, 1  ;;  %v1587_v51 = vsel %vm1125_vm9, %v1585_v46, %v1586_v47  ;;  %v1959_v5 = vor.u32 %v1958_v52, %v1954_v49  ;;  %v1963_v12 = vrot.slane %v1961_v53, 1  ;;  %2895 = vmatpush3.bf16.msra.mxu0 %v3056_v54  ;;  %2961 = vmatprep.subr.bf16.mxu1 %v3057_v13  ;;  %v3058_v35 = vld [vmem:[%s3956_s4 + $0x10] sm:$0xff]   ;;  %v3621_v52 = vld [vmem:[#allocation2 + $0x5c] ss:$0 sps:$4 sm:$0x11]  }
  0x96   : > { %1156 = vrot.lane.b32.xlu0 %v1137_v7, %s3110_s20  ;;  %v1516_v7 = vrot.slane %v1514_v11, 1  ;;  %v1545_v15 = vshll.u32 %v3570_v41, 16  ;;  %v1942_v17 = vshrl.u32 %v3559_v22, 16  ;;  %v2038_v18 = vrot.slane %v3531_v57, 1  ;;  %2896 = vmatprep.subr.bf16.mxu0 %v3057_v13 }
  0x97   : > { %v843_v21 = vmax.f32 %v839_v42, 0.0  ;;  %v1946_v23 = vrot.slane %v1944_v59, 1  ;;  %v1543_v32 = vshrl.u32 %v3570_v41, 16  ;;  %v1550_v26 = vshll.u32 %v3585_v58, 16 }
  0x98   : > { %2015 = vrot.lane.b32.xlu1 %v1940_v60, %s3111_s22  ;;  %v1949_v60 = vshll.u32 %v3568_v39, 16  ;;  %vm854_vm12 = vcmp.eq.s32.totalorder %v853_v62, 1  ;;  %2964 = vmatpush3.bf16.msra.mxu1 %v3057_v13  ;;  %v2031_v28 = vsel %vm1125_vm9, %v2029_v37, %v2030_v38  ;;  %v1964_v11 = vsel %vm1012_vm11, %v1959_v5, %v1963_v12 }
  0x99   : > { %v1547_v46 = vrot.slane %v1545_v15, 1  ;;  %v855_v47 = vsel %vm854_vm12, %v843_v21, 0.0  ;;  %2962 = vmatprep.subr.bf16.mxu1 %v3058_v35  ;;  %v1533_v49 = vshll.u32 %v3605_v1, 16  ;;  %2897 = vmatpush3.bf16.msra.mxu0 %v3057_v13  ;;  %v1591_v37 = vrot.slane %v3570_v41, 1  ;;  %v921_v15 = vld [vmem:[#allocation2 + $0x74] sm:$0x1] }
  0x9a   : > { %1558 = vrot.lane.b32.xlu0 %v1493_v25, %s3111_s22  ;;  %v3607_v25 = vrot.slane %v1949_v60, 1  ;;  %v2804_v54 = vpack.c.bf16 %v855_v47, %v855_v47  ;;  %v1592_v38 = vrot.slane %v3585_v58, 1  ;;  %2898 = vmatprep.subr.bf16.mxu0 %v3058_v35  ;;  %v1978_v5 = vshrl.u32 %v3611_v30, 16  ;;  %v3637_v21 = vld [vmem:[#allocation2 + $0x5c] ss:$0 sps:$4 sm:$0x11]  }
  0x9b   : > { %v1548_v62 = vor.u32 %v1547_v46, %v1543_v32  ;;  %v3644_v32 = vld [vmem:[%s3956_s4 + $0x30] sm:$0xff]   ;;  %v1584_v46 = vsel %vm1125_vm9, %v1582_v8, %v1583_v9  ;;  %v1947_v47 = vor.u32 %v1946_v23, %v1942_v17  ;;  %v2035_v36 = vrot.slane %v3559_v22, 1 }
  0x9c   : > { %2055 = vrot.lane.b32.xlu1 %v2034_v19, %s3110_s20  ;;  %v2039_v19 = vrot.slane %v3556_v20, 1  ;;  %v844_v20 = vmax.f32 %v840_v61, 0.0  ;;  %v897_v59 = vshrl.u32 %v2804_v54, 16  ;;  %v900_v60 = vshll.u32 %v2804_v54, 16  ;;  %2965 = vmatpush3.bf16.msra.mxu1 %v3058_v35 }
  0x9d   : > { %2899 = vmatpush3.bf16.msra.mxu0 %v3058_v35  ;;  %v1538_v29 = vshll.u32 %v3637_v21, 16  ;;  %v1593_v8 = vsel %vm1125_vm9, %v1591_v37, %v1592_v38  ;;  %v1952_v17 = vsel %vm1012_vm11, %v1947_v47, %v3607_v25  ;;  %v2036_v3 = vrot.slane %v3568_v39, 1  ;;  %v3051_v39 = vld [vmem:[#allocation2 + $0x50] ss:$0 sps:$4 sm:$0x11]  }
  0x9e   : > { %1598 = vrot.lane.b32.xlu0 %v1578_v55, %s3110_s20  ;;  %v856_v53 = vsel %vm854_vm12, %v844_v20, 0.0  ;;  %v3626_v55 = vld [vmem:[%s3956_s4 + $0x18] sm:$0xff]   ;;  %v2040_v61 = vsel %vm1125_vm9, %v2038_v18, %v2039_v19  ;;  %v899_v12 = vrot.slane %v897_v59, 7  ;;  %2938 = vmatprep.subr.bf16.mxu0 %v3644_v32  ;;  %v1531_v23 = vshrl.u32 %v3605_v1, 16 }
  0x9f   : > { %v2805_v42 = vpack.c.bf16 %v856_v53, %v856_v53  ;;  %2916 = vmatprep.subr.bf16.mxu1 %v3626_v55  ;;  %v2044_v37 = vrot.slane %v3611_v30, 1  ;;  %v2045_v38 = vrot.slane %v3621_v52, 1  ;;  %v2037_v25 = vsel %vm1125_vm9, %v2035_v36, %v2036_v3 }
  0xa0   : > { %1564 = vrot.lane.b32.xlu1 %v1529_v48, %s3111_s22  ;;  %v1512_v48 = vor.u32 %v1511_v56, %v1507_v45  ;;  %v1552_v45 = vrot.slane %v1550_v26, 1  ;;  %v1980_v56 = vshll.u32 %v3611_v30, 16  ;;  %v1985_v26 = vshll.u32 %v3621_v52, 16 }
  0xa1   : > { %v908_v13 = vshll.u32 %v2805_v42, 16  ;;  %v902_v18 = vor.u32 %v900_v60, %v899_v12  ;;  %v903_v19 = vrot.slane %v899_v12, 4  ;;  %v2046_v52 = vsel %vm1125_vm9, %v2044_v37, %v2045_v38 }
  0xa2   : > { %2013 = vrot.lane.b32.xlu0 %v1928_v63, %s3111_s22  ;;  %v905_v63 = vshrl.u32 %v2805_v42, 16  ;;  %v1517_v58 = vsel %vm1012_vm11, %v1512_v48, %v1516_v7  ;;  %v1553_v7 = vsel %vm1012_vm11, %v1548_v62, %v1552_v45  ;;  %v1987_v34 = vrot.slane %v1985_v26, 1  ;;  %v3672_v45 = vld [vmem:[#allocation2 + $0x48] sm:$0xff]  }
  0xa3   : > { %v1535_v42 = vrot.slane %v1533_v49, 1  ;;  %v1588_v62 = vrot.slane %v3605_v1, 1  ;;  %v1973_v26 = vshll.u32 %v3051_v39, 16  ;;  %v2041_v36 = vrot.slane %v3672_v45, 1 }
  0xa4   : > { %1604 = vrot.lane.b32.xlu1 %v1587_v51, %s3110_s20  ;;  %v917_v51 = vld [vmem:[#allocation2 + $0x6c] sm:$0xf]  ;;  %v907_v20 = vrot.slane %v905_v63, 7  ;;  %v1589_v63 = vrot.slane %v3637_v21, 1  ;;  %vm1166_vm13 = vcmask 130048   ;;  %vm1183_vm14 = vcmask 261120  }
  0xa5   : > { %v918_v48 = vsel %vm3288_vm7, %v902_v18, %v917_v51  ;;  %v1536_v60 = vor.u32 %v1535_v42, %v1531_v23  ;;  %v1966_v51 = vshrl.u32 %v3672_v45, 16  ;;  %v3692_v18 = vld [vmem:[#allocation2 + $0x60] sm:$0xff]   ;;  %v1975_v47 = vrot.slane %v1973_v26, 1 }
  0xa6   : > { %2053 = vrot.lane.b32.xlu0 %v2031_v28, %s3110_s20  ;;  %v1982_v28 = vrot.slane %v1980_v56, 1  ;;  %v910_v35 = vor.u32 %v908_v13, %v907_v20  ;;  %919 = vst [vmem:[#allocation2 + $0x6c] sm:$0xf] %v918_v48  ;;  %v1540_v56 = vrot.slane %v1538_v29, 1  ;;  %v2042_v29 = vrot.slane %v3051_v39, 1 }
  0xa7   : > { %v3055_v48 = vld [vmem:[#allocation2 + $0x68] ss:$0 sps:$4 sm:$0x11]   ;;  %v2047_v37 = vrot.slane %v3692_v18, 1  ;;  %vm1224_vm15 = vcmask 392192   ;;  %vm2473_vm0 = vcmask 1040384  }
  0xa8   : > { %2019 = vrot.lane.b32.xlu1 %v1964_v11, %s3111_s22  ;;  %v912_v11 = vrot.slane %v907_v20, 4  ;;  %v911_v53 = vsel %vm3294_vm8, %v903_v19, %v910_v35  ;;  %v1983_v9 = vor.u32 %v1982_v28, %v1978_v5  ;;  %v1541_v12 = vsel %vm1012_vm11, %v1536_v60, %v1540_v56 }
  0xa9   : > { %920 = vst.msk [vmem:[#allocation2 + $0x70] sm:$0xf] %vm762_vm5, %v911_v53  ;;  %v1992_v53 = vshll.u32 %v3692_v18, 16  ;;  %v1997_v3 = vshll.u32 %v3055_v48, 16  ;;  %v2043_v23 = vsel %vm1125_vm9, %v2041_v36, %v2042_v29  ;;  %v2048_v38 = vrot.slane %v3055_v48, 1 }
  0xaa   : > { %1562 = vrot.lane.b32.xlu0 %v1517_v58, %s3111_s22  ;;  %v922_v54 = vsel %vm3208_vm2, %v912_v11, %v921_v15  ;;  %v1988_v59 = vsel %vm1012_vm11, %v1983_v9, %v1987_v34  ;;  %v1590_v11 = vsel %vm1125_vm9, %v1588_v62, %v1589_v63  ;;  %v1990_v34 = vshrl.u32 %v3692_v18, 16 }
  0xab   : > { %923 = vst [vmem:[#allocation2 + $0x74] sm:$0x1] %v922_v54  ;;  %v1999_v56 = vrot.slane %v1997_v3, 1  ;;  %vm2475_vm1 = vcmask 123904  }
  0xac   : > { %2059 = vrot.lane.b32.xlu1 %v2040_v61, %s3110_s20  ;;  %v1968_v61 = vshll.u32 %v3672_v45, 16 }
  0xae   : > { %1602 = vrot.lane.b32.xlu0 %v1584_v46, %s3110_s20  ;;  %v1970_v15 = vrot.slane %v1968_v61, 1 }
  0xb0   : > { %1568 = vrot.lane.b32.xlu1 %v1553_v7, %s3111_s22  ;;  %v3681_v49 = vld [vmem:[#allocation2 + $0x6c] sm:$0xff]   ;;  %v1971_v46 = vor.u32 %v1970_v15, %v1966_v51 }
  0xb1   : > { %v2002_v58 = vshrl.u32 %v3681_v49, 16  ;;  %v2004_v5 = vshll.u32 %v3681_v49, 16  ;;  %v2050_v28 = vrot.slane %v3681_v49, 1 }
  0xb2   : > { %2017 = vrot.lane.b32.xlu0 %v1952_v17, %s3111_s22  ;;  %v3053_v13 = vld [vmem:[#allocation2 + $0x74] ss:$0 sps:$4 sm:$0x11]   ;;  %v1976_v9 = vsel %vm1012_vm11, %v1971_v46, %v1975_v47  ;;  %v1994_v17 = vrot.slane %v1992_v53, 1 }
  0xb3   : > { %v2009_v20 = vshll.u32 %v3053_v13, 16  ;;  %v2006_v21 = vrot.slane %v2004_v5, 1  ;;  %v2051_v35 = vrot.slane %v3053_v13, 1 }
  0xb4   : > { %1608 = vrot.lane.b32.xlu1 %v1593_v8, %s3110_s20  ;;  %v1995_v42 = vor.u32 %v1994_v17, %v1990_v34  ;;  %v3065_v34 = vld [vmem:[#allocation2 + $0xc] sm:$0xff]  }
  0xb5   : > { %v2011_v19 = vrot.slane %v2009_v20, 1  ;;  %v2007_v7 = vor.u32 %v2006_v21, %v2002_v58  ;;  %v2052_v8 = vsel %vm1125_vm9, %v2050_v28, %v2051_v35  ;;  %v3061_v21 = vld [vmem:[%s3956_s4 + $0x28] sm:$0xff]  }
  0xb6   : > { %2057 = vrot.lane.b32.xlu0 %v2037_v25, %s3110_s20  ;;  %v2049_v25 = vsel %vm1125_vm9, %v2047_v37, %v2048_v38 }
  0xb7   : > { %v2012_v54 = vsel %vm1012_vm11, %v2007_v7, %v2011_v19 }
  0xb8   : > { %2023 = vrot.lane.b32.xlu1 %v1988_v59, %s3111_s22  ;;  %v2000_v59 = vsel %vm1012_vm11, %v1995_v42, %v1999_v56 }
  0xba   : > { %1566 = vrot.lane.b32.xlu0 %v1541_v12, %s3111_s22  ;;  %v3060_v12 = vld [vmem:[%s3956_s4 + $0x20] sm:$0xff]  }
  0xbc   : > { %2063 = vrot.lane.b32.xlu1 %v2046_v52, %s3110_s20 }
  0xbe   : > { %1606 = vrot.lane.b32.xlu0 %v1590_v11, %s3110_s20 }
  0xc0   : > { %2027 = vrot.lane.b32.xlu1 %v2012_v54, %s3111_s22 }
  0xc2   : > { %2021 = vrot.lane.b32.xlu0 %v1976_v9, %s3111_s22 }
  0xc4   : > { %2067 = vrot.lane.b32.xlu1 %v2052_v8, %s3110_s20 }
  0xc6   : > { %2061 = vrot.lane.b32.xlu0 %v2043_v23, %s3110_s20 }
  0xca   : > { %2025 = vrot.lane.b32.xlu0 %v2000_v59, %s3111_s22 }
  0xce   : > { %2065 = vrot.lane.b32.xlu0 %v2049_v25, %s3110_s20 }
  0xda   : > { %v1159_v60 = vpop.permute.xlu1 %1158 }
  0xdd   : > { %v1153_v39 = vpop.permute.xlu0 %1152 }
  0xde   : > { %v1161_v61 = vpop.permute.xlu1 %1160 }
  0xe1   : > { %v1118_v62 = vpop.permute.xlu0 %1117 }
  0xe2   : > { %v1176_v63 = vsel %vm1166_vm13, %v3390_v0, %v1118_v62  ;;  %v1163_v13 = vpop.permute.xlu1 %1162 }
  0xe3   : > { %v1193_v51 = vsel %vm1183_vm14, %v1176_v63, %v1159_v60 }
  0xe4   : > { %2908 = vmatprep.mubr.msk.bf16.mxu1 %vm1224_vm15, %v1193_v51 }
  0xe5   : > { %v1120_v52 = vpop.permute.xlu0 %1119 }
  0xe6   : > { %v1178_v58 = vsel %vm1166_vm13, %v3397_v40, %v1120_v52  ;;  %v1122_v5 = vpop.permute.xlu1 %1121 }
  0xe7   : > { %v1195_v15 = vsel %vm1183_vm14, %v1178_v58, %v1161_v61  ;;  %v1180_v26 = vsel %vm1166_vm13, %v3404_v50, %v1122_v5 }
  0xe8   : > { %2909 = vmatmul.mubr.msk.bf16.vlgmr.msra.gmra.mrb[0].mxu1 %vm1224_vm15, %v1195_v15  ;;  %v1197_v0 = vsel %vm1183_vm14, %v1180_v26, %v1163_v13 }
  0xe9   : > { %v1112_v20 = vpop.permute.xlu0 %1111  ;;  %2912 = vmatprep.mubr.msk.bf16.mxu1 %vm1224_vm15, %v1197_v0  ;;  %2917 = vmatpush3.bf16.msra.mxu1 %v3626_v55 }
  0xea   : > { %v1124_v40 = vpop.permute.xlu1 %1123  ;;  %2918 = vmatprep.subr.bf16.mxu1 %v3060_v12 }
  0xeb   : > { %v1182_v19 = vsel %vm1166_vm13, %v3415_v6, %v1124_v40 }
  0xed   : > { %2919 = vmatpush3.bf16.msra.mxu1 %v3060_v12  ;;  %v1114_v7 = vpop.permute.xlu0 %1113 }
  0xee   : > { %v1165_v50 = vpop.permute.xlu1 %1164  ;;  %2920 = vmatprep.subr.bf16.mxu1 %v3061_v21  ;;  %v1172_v42 = vsel %vm1166_vm13, %v3419_v16, %v1114_v7 }
  0xef   : > { %v1199_v28 = vsel %vm1183_vm14, %v1182_v19, %v1165_v50 }
  0xf0   : > { %2913 = vmatmul.mubr.msk.bf16.gmra.mrb[4].mxu1 %vm1224_vm15, %v1199_v28 }
  0xf1   : > { %2921 = vmatpush3.bf16.msra.mxu1 %v3061_v21  ;;  %v1116_v55 = vpop.permute.xlu0 %1115 }
  0xf2   : > { %v1555_v35 = vpop.permute.xlu1 %1554  ;;  %v1174_v60 = vsel %vm1166_vm13, %v3429_v33, %v1116_v55 }
  0xf3   : > { %v1611_v46 = vsel %vm1166_vm13, %v3436_v43, %v1555_v35  ;;  %v1170_v43 = vsel %vm1166_vm13, %v3065_v34, %v1112_v20 }
  0xf4   : > { %v1187_v56 = vsel %vm1183_vm14, %v1170_v43, %v1153_v39 }
  0xf5   : > { %v1557_v48 = vpop.permute.xlu0 %1556 }
  0xf6   : > { %v1155_v11 = vpop.permute.xlu1 %1154  ;;  %v1613_v6 = vsel %vm1166_vm13, %v3438_v44, %v1557_v48  ;;  %v3063_v44 = vld [vmem:[%s3956_s4 + $0x38] sm:$0xff]  }
  0xf7   : > { %v1189_v37 = vsel %vm1183_vm14, %v1172_v42, %v1155_v11 }
  0xfa   : > { %v1595_v47 = vpop.permute.xlu1 %1594 }
  0xfb   : > { %v1627_v53 = vsel %vm1183_vm14, %v1611_v46, %v1595_v47 }
  0xfc   : > { %2922 = vmatprep.mubr.msk.bf16.mxu1 %vm1224_vm15, %v1627_v53 }
  0xfe   : > { %v1597_v54 = vpop.permute.xlu1 %1596 }
  0xff   : > { %v1629_v36 = vsel %vm1183_vm14, %v1613_v6, %v1597_v54 }
 0x100   : > { %2923 = vmatmul.mubr.msk.bf16.vlgmr.msra.gmra.mrb[8].mxu1 %vm1224_vm15, %v1629_v36  ;;  %v1151_v8 = vpop.permute.xlu0 %1150 }
 0x102   : > { %v1561_v29 = vpop.permute.xlu1 %1560 }
 0x103   : > { %v1617_v61 = vsel %vm1166_vm13, %v3468_v31, %v1561_v29 }
 0x104   : > { %v1110_v17 = vpop.permute.xlu0 %1109 }
 0x105   : > { %v1168_v3 = vsel %vm1166_vm13, %v3500_v14, %v1110_v17  ;;  %v3064_v14 = vld [vmem:[%s3956_s4 + $0x40] sm:$0xff]  }
 0x106   : > { %v1601_v9 = vpop.permute.xlu1 %1600  ;;  %v1185_v23 = vsel %vm1183_vm14, %v1168_v3, %v1151_v8 }
 0x107   : > { %2900 = vmatprep.mubr.msk.bf16.mxu0 %vm1224_vm15, %v1185_v23  ;;  %v1633_v63 = vsel %vm1183_vm14, %v1617_v61, %v1601_v9 }
 0x108   : > { %2901 = vmatmul.mubr.msk.bf16.vlgmr.msra.gmra.mrb[0].mxu0 %vm1224_vm15, %v1187_v56  ;;  %v1157_v38 = vpop.permute.xlu0 %1156 }
 0x109   : > { %2904 = vmatprep.mubr.msk.bf16.mxu0 %vm1224_vm15, %v1189_v37  ;;  %2939 = vmatpush3.bf16.msra.mxu0 %v3644_v32  ;;  %v1191_v39 = vsel %vm1183_vm14, %v1174_v60, %v1157_v38 }
 0x10a   : > { %v2016_v59 = vpop.permute.xlu1 %2015  ;;  %2940 = vmatprep.subr.bf16.mxu0 %v3063_v44 }
 0x10b   : > { %v2072_v31 = vsel %vm1166_vm13, %v3488_v2, %v2016_v59 }
 0x10c   : > { %v1559_v25 = vpop.permute.xlu0 %1558 }
 0x10d   : > { %2941 = vmatpush3.bf16.msra.mxu0 %v3063_v44  ;;  %v1615_v32 = vsel %vm1166_vm13, %v3490_v4, %v1559_v25 }
 0x10e   : > { %v2056_v16 = vpop.permute.xlu1 %2055  ;;  %2942 = vmatprep.subr.bf16.mxu0 %v3064_v14 }
 0x10f   : > { %v2088_v5 = vsel %vm1183_vm14, %v2072_v31, %v2056_v16 }
 0x110   : > { %2905 = vmatmul.mubr.msk.bf16.gmra.mrb[4].mxu0 %vm1224_vm15, %v1191_v39  ;;  %v1599_v13 = vpop.permute.xlu0 %1598 }
 0x111   : > { %v1631_v51 = vsel %vm1183_vm14, %v1615_v32, %v1599_v13  ;;  %2943 = vmatpush3.bf16.msra.mxu0 %v3064_v14 }
 0x112   : > { %v1565_v62 = vpop.permute.xlu1 %1564  ;;  %2926 = vmatprep.mubr.msk.bf16.mxu1 %vm1224_vm15, %v1631_v51 }
 0x113   : > { %2927 = vmatmul.mubr.msk.bf16.gmra.mrb[12].mxu1 %vm1224_vm15, %v1633_v63  ;;  %v1621_v20 = vsel %vm1166_vm13, %v3512_v27, %v1565_v62 }
 0x114   : > { %v2014_v52 = vpop.permute.xlu0 %2013 }
 0x115   : > { %v2070_v4 = vsel %vm1166_vm13, %v3510_v24, %v2014_v52 }
 0x116   : > { %v1605_v33 = vpop.permute.xlu1 %1604 }
 0x117   : > { %v1637_v24 = vsel %vm1183_vm14, %v1621_v20, %v1605_v33 }
 0x118   : > { %v2054_v12 = vpop.permute.xlu0 %2053 }
 0x119   : > { %v2086_v15 = vsel %vm1183_vm14, %v2070_v4, %v2054_v12 }
 0x11a   : > { %v2020_v58 = vpop.permute.xlu1 %2019  ;;  %2944 = vmatprep.mubr.msk.bf16.mxu0 %vm1224_vm15, %v2086_v15 }
 0x11b   : > { %2945 = vmatmul.mubr.msk.bf16.vlgmr.msra.gmra.mrb[8].mxu0 %vm1224_vm15, %v2088_v5  ;;  %v2076_v28 = vsel %vm1166_vm13, %v3531_v57, %v2020_v58 }
 0x11c   : > { %v1563_v0 = vpop.permute.xlu0 %1562 }
 0x11d   : > { %v1619_v2 = vsel %vm1166_vm13, %v3541_v10, %v1563_v0 }
 0x11e   : > { %v2060_v26 = vpop.permute.xlu1 %2059 }
 0x11f   : > { %v2092_v35 = vsel %vm1183_vm14, %v2076_v28, %v2060_v26 }
 0x120   : > { %v1603_v21 = vpop.permute.xlu0 %1602 }
 0x121   : > { %v1635_v19 = vsel %vm1183_vm14, %v1619_v2, %v1603_v21 }
 0x122   : > { %v1569_v40 = vpop.permute.xlu1 %1568  ;;  %2930 = vmatprep.mubr.msk.bf16.mxu1 %vm1224_vm15, %v1635_v19 }
 0x123   : > { %2931 = vmatmul.mubr.msk.bf16.gmra.mrb[16].mxu1 %vm1224_vm15, %v1637_v24  ;;  %v1625_v47 = vsel %vm1166_vm13, %v3570_v41, %v1569_v40 }
 0x124   : > { %v2018_v50 = vpop.permute.xlu0 %2017 }
 0x125   : > { %v2074_v27 = vsel %vm1166_vm13, %v3559_v22, %v2018_v50 }
 0x126   : > { %v1609_v7 = vpop.permute.xlu1 %1608 }
 0x127   : > { %v1641_v48 = vsel %vm1183_vm14, %v1625_v47, %v1609_v7 }
 0x128   : > { %v2058_v10 = vpop.permute.xlu0 %2057 }
 0x129   : > { %v2090_v55 = vsel %vm1183_vm14, %v2074_v27, %v2058_v10 }
 0x12a   : > { %2948 = vmatprep.mubr.msk.bf16.mxu0 %vm1224_vm15, %v2090_v55  ;;  %v2024_v11 = vpop.permute.xlu1 %2023 }
 0x12b   : > { %2949 = vmatmul.mubr.msk.bf16.gmra.mrb[12].mxu0 %vm1224_vm15, %v2092_v35  ;;  %v2080_v36 = vsel %vm1166_vm13, %v3611_v30, %v2024_v11 }
 0x12c   : > { %v1567_v46 = vpop.permute.xlu0 %1566 }
 0x12d   : > { %v1623_v57 = vsel %vm1166_vm13, %v3605_v1, %v1567_v46 }
 0x12e   : > { %v2064_v6 = vpop.permute.xlu1 %2063 }
 0x12f   : > { %v2096_v1 = vsel %vm1183_vm14, %v2080_v36, %v2064_v6 }
 0x130   : > { %v1607_v22 = vpop.permute.xlu0 %1606 }
 0x131   : > { %v1639_v53 = vsel %vm1183_vm14, %v1623_v57, %v1607_v22 }
 0x132   : > { %2934 = vmatprep.mubr.msk.bf16.mxu1 %vm1224_vm15, %v1639_v53  ;;  %v2028_v29 = vpop.permute.xlu1 %2027 }
 0x133   : > { %2935 = vmatmul.mubr.msk.bf16.gmra.mrb[20].mxu1 %vm1224_vm15, %v1641_v48  ;;  %v2084_v17 = vsel %vm1166_vm13, %v3681_v49, %v2028_v29 }
 0x134   : > { %v2022_v54 = vpop.permute.xlu0 %2021 }
 0x135   : > { %v2078_v41 = vsel %vm1166_vm13, %v3672_v45, %v2022_v54 }
 0x136   : > { %v2068_v43 = vpop.permute.xlu1 %2067 }
 0x137   : > { %v2100_v3 = vsel %vm1183_vm14, %v2084_v17, %v2068_v43 }
 0x138   : > { %v2062_v8 = vpop.permute.xlu0 %2061 }
 0x139   : > { %v2094_v9 = vsel %vm1183_vm14, %v2078_v41, %v2062_v8 }
 0x13a   : > { %2952 = vmatprep.mubr.msk.bf16.mxu0 %vm1224_vm15, %v2094_v9 }
 0x13b   : > { %2953 = vmatmul.mubr.msk.bf16.gmra.mrb[16].mxu0 %vm1224_vm15, %v2096_v1 }
 0x13c   : > { %v2026_v34 = vpop.permute.xlu0 %2025 }
 0x13d   : > { %v2082_v30 = vsel %vm1166_vm13, %v3692_v18, %v2026_v34 }
 0x140   : > { %v2066_v45 = vpop.permute.xlu0 %2065 }
 0x141   : > { %v2098_v23 = vsel %vm1183_vm14, %v2082_v30, %v2066_v45 }
 0x142   : > { %2956 = vmatprep.mubr.msk.bf16.mxu0 %vm1224_vm15, %v2098_v23 }
 0x143   : > { %2957 = vmatmul.mubr.msk.bf16.gmra.mrb[20].mxu0 %vm1224_vm15, %v2100_v3 }
 0x1bb   : > { %v2910_v44 = vpop.f32.mrb[0].mxu1 }
 0x1bc   : > { %1348 = vst.msk [vmem:[#allocation4 + $0x50] sm:$0xff] %vm1166_vm13, %v2910_v44  ;;  %v1307_v42 = vpop.f32.mrb[1].mxu1 }
 0x1bd   : > { %1346 = vst.msk [vmem:[#allocation4 + $0x40] sm:$0xff] %vm1166_vm13, %v1307_v42  ;;  %v2911_v56 = vpop.f32.mrb[2].mxu1 }
 0x1be   : > { %1349 = vst.msk [vmem:[#allocation4 + $0x58] sm:$0xff] %vm1166_vm13, %v2911_v56  ;;  %v1310_v49 = vpop.f32.mrb[3].mxu1 }
 0x1bf   : > { %1347 = vst.msk [vmem:[#allocation4 + $0x48] sm:$0xff] %vm1166_vm13, %v1310_v49 }
 0x1c3   : > { %v2914_v18 = vpop.f32.mrb[4].mxu1  ;;  %v1364_v29 = vld [vmem:[#allocation4 + $0x50] sm:$0xff] }
 0x1c4   : > { %1352 = vst.msk [vmem:[#allocation4 + $0x70] sm:$0xff] %vm1166_vm13, %v2914_v18  ;;  %v1323_v59 = vpop.f32.mrb[5].mxu1  ;;  %v1362_v8 = vld [vmem:[#allocation4 + $0x40] sm:$0xff] }
 0x1c5   : > { %1350 = vst.msk [vmem:[#allocation4 + $0x60] sm:$0xff] %vm1166_vm13, %v1323_v59  ;;  %v2915_v37 = vpop.f32.mrb[6].mxu1  ;;  %v1365_v17 = vld [vmem:[#allocation4 + $0x58] sm:$0xff] }
 0x1c6   : > { %1353 = vst.msk [vmem:[#allocation4 + $0x78] sm:$0xff] %vm1166_vm13, %v2915_v37  ;;  %v1326_v38 = vpop.f32.mrb[7].mxu1  ;;  %v1363_v44 = vld [vmem:[#allocation4 + $0x48] sm:$0xff] }
 0x1c7   : > { %1351 = vst.msk [vmem:[#allocation4 + $0x68] sm:$0xff] %vm1166_vm13, %v1326_v38 }
 0x1d3   : > { %v2924_v14 = vpop.f32.mrb[8].mxu1 }
 0x1d4   : > { %v1717_v16 = vpop.f32.mrb[9].mxu1 }
 0x1d5   : > { %v2925_v25 = vpop.f32.mrb[10].mxu1 }
 0x1d6   : > { %v1720_v60 = vpop.f32.mrb[11].mxu1 }
 0x1db   : > { %v2902_v39 = vpop.f32.mrb[0].mxu0 }
 0x1dc   : > { %1340 = vst.msk [vmem:[#allocation4 + $0x10] sm:$0xff] %vm1166_vm13, %v2902_v39  ;;  %v1275_v61 = vpop.f32.mrb[1].mxu0 }
 0x1dd   : > { %1338 = vst.msk [vmem:[#allocation4] sm:$0xff] %vm1166_vm13, %v1275_v61  ;;  %v2903_v62 = vpop.f32.mrb[2].mxu0 }
 0x1de   : > { %1341 = vst.msk [vmem:[#allocation4 + $0x18] sm:$0xff] %vm1166_vm13, %v2903_v62  ;;  %v1278_v32 = vpop.f32.mrb[3].mxu0 }
 0x1df   : > { %1339 = vst.msk [vmem:[#allocation4 + $0x8] sm:$0xff] %vm1166_vm13, %v1278_v32 }
 0x1e3   : > { %v1356_v63 = vld [vmem:[#allocation4 + $0x10] sm:$0xff]  ;;  %v2906_v13 = vpop.f32.mrb[4].mxu0 }
 0x1e4   : > { %v1782_v51 = vadd.f32 %v2924_v14, %v1356_v63  ;;  %v1354_v33 = vld [vmem:[#allocation4] sm:$0xff]  ;;  %1344 = vst.msk [vmem:[#allocation4 + $0x30] sm:$0xff] %vm1166_vm13, %v2906_v13  ;;  %v1291_v52 = vpop.f32.mrb[5].mxu0 }
 0x1e5   : > { %v1780_v31 = vadd.f32 %v1717_v16, %v1354_v33  ;;  %v1357_v58 = vld [vmem:[#allocation4 + $0x18] sm:$0xff]  ;;  %1342 = vst.msk [vmem:[#allocation4 + $0x20] sm:$0xff] %vm1166_vm13, %v1291_v52  ;;  %v2907_v4 = vpop.f32.mrb[6].mxu0 }
 0x1e6   : > { %1798 = vst.msk [vmem:[#allocation4 + $0x10] sm:$0xff] %vm1166_vm13, %v1782_v51  ;;  %v1783_v5 = vadd.f32 %v2925_v25, %v1357_v58  ;;  %v1355_v12 = vld [vmem:[#allocation4 + $0x8] sm:$0xff]  ;;  %1345 = vst.msk [vmem:[#allocation4 + $0x38] sm:$0xff] %vm1166_vm13, %v2907_v4  ;;  %v1294_v15 = vpop.f32.mrb[7].mxu0  ;;  %v2928_v26 = vpop.f32.mrb[12].mxu1 }
 0x1e7   : > { %1796 = vst.msk [vmem:[#allocation4] sm:$0xff] %vm1166_vm13, %v1780_v31  ;;  %v1781_v0 = vadd.f32 %v1720_v60, %v1355_v12  ;;  %1343 = vst.msk [vmem:[#allocation4 + $0x28] sm:$0xff] %vm1166_vm13, %v1294_v15  ;;  %v1733_v20 = vpop.f32.mrb[13].mxu1  ;;  %v1368_v15 = vld [vmem:[#allocation4 + $0x70] sm:$0xff] }
 0x1e8   : > { %1799 = vst.msk [vmem:[#allocation4 + $0x18] sm:$0xff] %vm1166_vm13, %v1783_v5  ;;  %v2929_v40 = vpop.f32.mrb[14].mxu1 }
 0x1e9   : > { %1797 = vst.msk [vmem:[#allocation4 + $0x8] sm:$0xff] %vm1166_vm13, %v1781_v0  ;;  %v1736_v2 = vpop.f32.mrb[15].mxu1 }
 0x1eb   : > { %v1360_v24 = vld [vmem:[#allocation4 + $0x30] sm:$0xff] }
 0x1ec   : > { %v1786_v21 = vadd.f32 %v2928_v26, %v1360_v24  ;;  %v1358_v19 = vld [vmem:[#allocation4 + $0x20] sm:$0xff] }
 0x1ed   : > { %v1784_v50 = vadd.f32 %v1733_v20, %v1358_v19  ;;  %v1361_v7 = vld [vmem:[#allocation4 + $0x38] sm:$0xff]  ;;  %v1814_v28 = vld [vmem:[#allocation4 + $0x10] sm:$0xff] }
 0x1ee   : > { %1802 = vst.msk [vmem:[#allocation4 + $0x30] sm:$0xff] %vm1166_vm13, %v1786_v21  ;;  %v1787_v27 = vadd.f32 %v2929_v40, %v1361_v7  ;;  %v1359_v35 = vld [vmem:[#allocation4 + $0x28] sm:$0xff]  ;;  %v2946_v10 = vpop.f32.mrb[8].mxu0  ;;  %v1812_v55 = vld [vmem:[#allocation4] sm:$0xff] }
 0x1ef   : > { %1800 = vst.msk [vmem:[#allocation4 + $0x20] sm:$0xff] %vm1166_vm13, %v1784_v50  ;;  %v1785_v11 = vadd.f32 %v1736_v2, %v1359_v35  ;;  %v2241_v46 = vadd.f32 %v2946_v10, %v1814_v28  ;;  %v2176_v47 = vpop.f32.mrb[9].mxu0  ;;  %v1815_v57 = vld [vmem:[#allocation4 + $0x18] sm:$0xff]  ;;  %v1366_v2 = vld [vmem:[#allocation4 + $0x60] sm:$0xff] }
 0x1f0   : > { %1803 = vst.msk [vmem:[#allocation4 + $0x38] sm:$0xff] %vm1166_vm13, %v1787_v27  ;;  %v2239_v48 = vadd.f32 %v2176_v47, %v1812_v55  ;;  %v2947_v22 = vpop.f32.mrb[10].mxu0  ;;  %v1813_v53 = vld [vmem:[#allocation4 + $0x8] sm:$0xff]  ;;  %v1369_v50 = vld [vmem:[#allocation4 + $0x78] sm:$0xff] }
 0x1f1   : > { %1801 = vst.msk [vmem:[#allocation4 + $0x28] sm:$0xff] %vm1166_vm13, %v1785_v11  ;;  %2257 = vst.msk [vmem:[#allocation4 + $0x10] sm:$0xff] %vm1166_vm13, %v2241_v46  ;;  %v2242_v6 = vadd.f32 %v2947_v22, %v1815_v57  ;;  %v2179_v54 = vpop.f32.mrb[11].mxu0  ;;  %v1367_v27 = vld [vmem:[#allocation4 + $0x68] sm:$0xff] }
 0x1f2   : > { %2255 = vst.msk [vmem:[#allocation4] sm:$0xff] %vm1166_vm13, %v2239_v48  ;;  %v2240_v36 = vadd.f32 %v2179_v54, %v1813_v53 }
 0x1f3   : > { %2258 = vst.msk [vmem:[#allocation4 + $0x18] sm:$0xff] %vm1166_vm13, %v2242_v6 }
 0x1f4   : > { %2256 = vst.msk [vmem:[#allocation4 + $0x8] sm:$0xff] %vm1166_vm13, %v2240_v36 }
 0x1f5   : > { %v1818_v60 = vld [vmem:[#allocation4 + $0x30] sm:$0xff] }
 0x1f6   : > { %v2932_v41 = vpop.f32.mrb[16].mxu1  ;;  %v1816_v62 = vld [vmem:[#allocation4 + $0x20] sm:$0xff] }
 0x1f7   : > { %v1790_v1 = vadd.f32 %v2932_v41, %v1364_v29  ;;  %v1749_v9 = vpop.f32.mrb[17].mxu1  ;;  %v1819_v32 = vld [vmem:[#allocation4 + $0x38] sm:$0xff] }
 0x1f8   : > { %v2273_v34 = vld [vmem:[#allocation4 + $0x10] sm:$0xff]  ;;  %v1788_v43 = vadd.f32 %v1749_v9, %v1362_v8  ;;  %v2933_v30 = vpop.f32.mrb[18].mxu1  ;;  %v1817_v31 = vld [vmem:[#allocation4 + $0x28] sm:$0xff] }
 0x1f9   : > { %v2808_v3 = vpack.c.bf16 %v2273_v34, %v2273_v34  ;;  %v2271_v45 = vld [vmem:[#allocation4] sm:$0xff]  ;;  %1806 = vst.msk [vmem:[#allocation4 + $0x50] sm:$0xff] %vm1166_vm13, %v1790_v1  ;;  %v1791_v23 = vadd.f32 %v2933_v30, %v1365_v17  ;;  %v1752_v42 = vpop.f32.mrb[19].mxu1 }
 0x1fa   : > { %v2806_v56 = vpack.c.bf16 %v2271_v45, %v2271_v45  ;;  %v2274_v49 = vld [vmem:[#allocation4 + $0x18] sm:$0xff]  ;;  %1804 = vst.msk [vmem:[#allocation4 + $0x40] sm:$0xff] %vm1166_vm13, %v1788_v43  ;;  %v1789_v18 = vadd.f32 %v1752_v42, %v1363_v44 }
 0x1fb   : > { %2353 = vst.msk [vmem:[%s3189_s19 + $0x8] sm:$0xf] %vm762_vm5, %v2808_v3  ;;  %v2809_v59 = vpack.c.bf16 %v2274_v49, %v2274_v49  ;;  %v2272_v37 = vld [vmem:[#allocation4 + $0x8] sm:$0xff]  ;;  %v2288_v4 = vpack.c.bf16 %v2274_v49, %v2273_v34 }
 0x1fc   : > { %1807 = vst.msk [vmem:[#allocation4 + $0x58] sm:$0xff] %vm1166_vm13, %v1791_v23  ;;  %v2807_v38 = vpack.c.bf16 %v2272_v37, %v2272_v37  ;;  %1805 = vst.msk [vmem:[#allocation4 + $0x48] sm:$0xff] %vm1166_vm13, %v1789_v18  ;;  %v2287_v14 = vpack.c.bf16 %v2272_v37, %v2271_v45 }
 0x1fd   : > { %2351 = vst.msk [vmem:[%s3189_s19] sm:$0xf] %vm762_vm5, %v2806_v56  ;;  %2354 = vst.msk [vmem:[%s3189_s19 + $0xc] sm:$0xf] %vm762_vm5, %v2809_v59  ;;  %v2369_v21 = vunpack.c.l.bf16 %v2288_v4  ;;  %v2370_v53 = vunpack.c.h.bf16 %v2288_v4 }
 0x1fe   : > { %2352 = vst.msk [vmem:[%s3189_s19 + $0x4] sm:$0xf] %vm762_vm5, %v2807_v38  ;;  %v2950_v16 = vpop.f32.mrb[12].mxu0  ;;  %v2367_v13 = vunpack.c.l.bf16 %v2287_v14  ;;  %v2368_v51 = vunpack.c.h.bf16 %v2287_v14 }
 0x1ff   : > { %v2192_v25 = vpop.f32.mrb[13].mxu0  ;;  %v2245_v61 = vadd.f32 %v2950_v16, %v1818_v60  ;;  %v2422_v6 = vmul.f32 %v2369_v21, %v2369_v21  ;;  %v2386_v41 = vsel %vm1166_vm13, %v2369_v21, 0.0  ;;  %v2423_v23 = vmul.f32 %v2370_v53, %v2370_v53 }
 0x200   : > { %v2951_v39 = vpop.f32.mrb[14].mxu0  ;;  %v2243_v33 = vadd.f32 %v2192_v25, %v1816_v62  ;;  %v2420_v5 = vmul.f32 %v2367_v13, %v2367_v13  ;;  %v2421_v12 = vmul.f32 %v2368_v51, %v2368_v51  ;;  %v2383_v0 = vsel %vm1166_vm13, %v2367_v13, 0.0  ;;  %v1822_v43 = vld [vmem:[#allocation4 + $0x50] sm:$0xff] }
 0x201   : > { %v2195_v63 = vpop.f32.mrb[15].mxu0  ;;  %v2246_v52 = vadd.f32 %v2951_v39, %v1819_v32  ;;  %2261 = vst.msk [vmem:[#allocation4 + $0x30] sm:$0xff] %vm1166_vm13, %v2245_v61  ;;  %v2384_v20 = vsel %vm1166_vm13, %v2368_v51, 0.0  ;;  %v2439_v44 = vsel %vm1166_vm13, %v2422_v6, 0.0  ;;  %v2388_v56 = vsel %vm1166_vm13, %v2370_v53, 0.0  ;;  %v1820_v37 = vld [vmem:[#allocation4 + $0x40] sm:$0xff] }
 0x202   : > { %v2244_v58 = vadd.f32 %v2195_v63, %v1817_v31  ;;  %2259 = vst.msk [vmem:[#allocation4 + $0x20] sm:$0xff] %vm1166_vm13, %v2243_v33  ;;  %v2385_v10 = vadd.f32 %v2384_v20, %v2383_v0  ;;  %v2436_v55 = vsel %vm1166_vm13, %v2420_v5, 0.0  ;;  %v2437_v11 = vsel %vm1166_vm13, %v2421_v12, 0.0 }
 0x203   : > { %2262 = vst.msk [vmem:[#allocation4 + $0x38] sm:$0xff] %vm1166_vm13, %v2246_v52  ;;  %v2438_v1 = vadd.f32 %v2437_v11, %v2436_v55  ;;  %v1823_v39 = vld [vmem:[#allocation4 + $0x58] sm:$0xff]  ;;  %v1821_v61 = vld [vmem:[#allocation4 + $0x48] sm:$0xff]  ;;  %v2441_v63 = vsel %vm1166_vm13, %v2423_v23, 0.0 }
 0x204   : > { %2260 = vst.msk [vmem:[#allocation4 + $0x28] sm:$0xff] %vm1166_vm13, %v2244_v58  ;;  %v2387_v34 = vadd.f32 %v2386_v41, %v2385_v10 }
 0x205   : > { %v2440_v49 = vadd.f32 %v2439_v44, %v2438_v1 }
 0x206   : > { %v2936_v26 = vpop.f32.mrb[20].mxu1  ;;  %v2389_v25 = vadd.f32 %v2388_v56, %v2387_v34 }
 0x207   : > { %v1794_v40 = vadd.f32 %v2936_v26, %v1368_v15  ;;  %v1765_v24 = vpop.f32.mrb[21].mxu1  ;;  %v2442_v33 = vadd.f32 %v2441_v63, %v2440_v49 }
 0x208   : > { %v1792_v19 = vadd.f32 %v1765_v24, %v1366_v2  ;;  %v2937_v7 = vpop.f32.mrb[22].mxu1  ;;  %v2277_v46 = vld [vmem:[#allocation4 + $0x30] sm:$0xff] }
 0x209   : > { %1810 = vst.msk [vmem:[#allocation4 + $0x70] sm:$0xff] %vm1166_vm13, %v1794_v40  ;;  %v1795_v28 = vadd.f32 %v2937_v7, %v1369_v50  ;;  %v1768_v35 = vpop.f32.mrb[23].mxu1  ;;  %v2812_v57 = vpack.c.bf16 %v2277_v46, %v2277_v46  ;;  %v2275_v48 = vld [vmem:[#allocation4 + $0x20] sm:$0xff] }
 0x20a   : > { %1808 = vst.msk [vmem:[#allocation4 + $0x60] sm:$0xff] %vm1166_vm13, %v1792_v19  ;;  %v1793_v47 = vadd.f32 %v1768_v35, %v1367_v27  ;;  %v2278_v22 = vld [vmem:[#allocation4 + $0x38] sm:$0xff]  ;;  %v2810_v54 = vpack.c.bf16 %v2275_v48, %v2275_v48 }
 0x20b   : > { %1811 = vst.msk [vmem:[#allocation4 + $0x78] sm:$0xff] %vm1166_vm13, %v1795_v28  ;;  %v2813_v36 = vpack.c.bf16 %v2278_v22, %v2278_v22  ;;  %v2276_v29 = vld [vmem:[#allocation4 + $0x28] sm:$0xff]  ;;  %v2290_v14 = vpack.c.bf16 %v2278_v22, %v2277_v46 }
 0x20c   : > { %1809 = vst.msk [vmem:[#allocation4 + $0x68] sm:$0xff] %vm1166_vm13, %v1793_v47  ;;  %v2289_v8 = vpack.c.bf16 %v2276_v29, %v2275_v48  ;;  %v2811_v9 = vpack.c.bf16 %v2276_v29, %v2276_v29 }
 0x20d   : > { %2357 = vst.msk [vmem:[%s3189_s19 + $0x18] sm:$0xf] %vm762_vm5, %v2812_v57  ;;  %2355 = vst.msk [vmem:[%s3189_s19 + $0x10] sm:$0xf] %vm762_vm5, %v2810_v54  ;;  %v2373_v52 = vunpack.c.l.bf16 %v2290_v14  ;;  %v2374_v20 = vunpack.c.h.bf16 %v2290_v14 }
 0x20e   : > { %2358 = vst.msk [vmem:[%s3189_s19 + $0x1c] sm:$0xf] %vm762_vm5, %v2813_v36  ;;  %v2954_v17 = vpop.f32.mrb[16].mxu0  ;;  %2356 = vst.msk [vmem:[%s3189_s19 + $0x14] sm:$0xf] %vm762_vm5, %v2811_v9  ;;  %v2371_v30 = vunpack.c.l.bf16 %v2289_v8  ;;  %v2372_v16 = vunpack.c.h.bf16 %v2289_v8 }
 0x20f   : > { %v2249_v3 = vadd.f32 %v2954_v17, %v1822_v43  ;;  %v2208_v45 = vpop.f32.mrb[17].mxu0  ;;  %v2426_v35 = vmul.f32 %v2373_v52, %v2373_v52  ;;  %v2394_v11 = vsel %vm1166_vm13, %v2373_v52, 0.0  ;;  %v2427_v57 = vmul.f32 %v2374_v20, %v2374_v20 }
 0x210   : > { %v2955_v42 = vpop.f32.mrb[18].mxu0  ;;  %v2390_v18 = vsel %vm1166_vm13, %v2371_v30, 0.0  ;;  %v2424_v59 = vmul.f32 %v2371_v30, %v2371_v30  ;;  %v2247_v60 = vadd.f32 %v2208_v45, %v1820_v37  ;;  %v2425_v31 = vmul.f32 %v2372_v16, %v2372_v16  ;;  %v1826_v58 = vld [vmem:[#allocation4 + $0x70] sm:$0xff] }
 0x211   : > { %2265 = vst.msk [vmem:[#allocation4 + $0x50] sm:$0xff] %vm1166_vm13, %v2249_v3  ;;  %v2211_v38 = vpop.f32.mrb[19].mxu0  ;;  %v2250_v62 = vadd.f32 %v2955_v42, %v1823_v39  ;;  %v2391_v13 = vadd.f32 %v2390_v18, %v2389_v25  ;;  %v2392_v5 = vsel %vm1166_vm13, %v2372_v16, 0.0  ;;  %v1824_v26 = vld [vmem:[#allocation4 + $0x60] sm:$0xff]  ;;  %v2447_v1 = vsel %vm1166_vm13, %v2426_v35, 0.0 }
 0x212   : > { %v2248_v32 = vadd.f32 %v2211_v38, %v1821_v61  ;;  %v2443_v51 = vsel %vm1166_vm13, %v2424_v59, 0.0  ;;  %2263 = vst.msk [vmem:[#allocation4 + $0x40] sm:$0xff] %vm1166_vm13, %v2247_v60  ;;  %v1827_v21 = vld [vmem:[#allocation4 + $0x78] sm:$0xff]  ;;  %v2445_v10 = vsel %vm1166_vm13, %v2425_v31, 0.0  ;;  %v2396_v17 = vsel %vm1166_vm13, %v2374_v20, 0.0 }
 0x213   : > { %2266 = vst.msk [vmem:[#allocation4 + $0x58] sm:$0xff] %vm1166_vm13, %v2250_v62  ;;  %v2444_v12 = vadd.f32 %v2443_v51, %v2442_v33  ;;  %v2393_v40 = vadd.f32 %v2392_v5, %v2391_v13  ;;  %v1825_v28 = vld [vmem:[#allocation4 + $0x68] sm:$0xff]  ;;  %v2449_v3 = vsel %vm1166_vm13, %v2427_v57, 0.0 }
 0x214   : > { %2264 = vst.msk [vmem:[#allocation4 + $0x48] sm:$0xff] %vm1166_vm13, %v2248_v32 }
 0x215   : > { %v2446_v46 = vadd.f32 %v2445_v10, %v2444_v12  ;;  %v2395_v48 = vadd.f32 %v2394_v11, %v2393_v40 }
 0x216   : > { %v2958_v4 = vpop.f32.mrb[20].mxu0 }
 0x217   : > { %v2253_v15 = vadd.f32 %v2958_v4, %v1826_v58  ;;  %v2224_v0 = vpop.f32.mrb[21].mxu0  ;;  %v2448_v8 = vadd.f32 %v2447_v1, %v2446_v46  ;;  %v2397_v45 = vadd.f32 %v2396_v17, %v2395_v48 }
 0x218   : > { %v2281_v2 = vld [vmem:[#allocation4 + $0x50] sm:$0xff]  ;;  %v2251_v24 = vadd.f32 %v2224_v0, %v1824_v26  ;;  %v2959_v19 = vpop.f32.mrb[22].mxu0 }
 0x219   : > { %v2816_v50 = vpack.c.bf16 %v2281_v2, %v2281_v2  ;;  %2269 = vst.msk [vmem:[#allocation4 + $0x70] sm:$0xff] %vm1166_vm13, %v2253_v15  ;;  %v2254_v7 = vadd.f32 %v2959_v19, %v1827_v21  ;;  %v2227_v27 = vpop.f32.mrb[23].mxu0  ;;  %v2279_v47 = vld [vmem:[#allocation4 + $0x40] sm:$0xff]  ;;  %v2450_v38 = vadd.f32 %v2449_v3, %v2448_v8 }
 0x21a   : > { %2267 = vst.msk [vmem:[#allocation4 + $0x60] sm:$0xff] %vm1166_vm13, %v2251_v24  ;;  %v2252_v55 = vadd.f32 %v2227_v27, %v1825_v28  ;;  %v2814_v22 = vpack.c.bf16 %v2279_v47, %v2279_v47  ;;  %v2282_v53 = vld [vmem:[#allocation4 + $0x58] sm:$0xff] }
 0x21b   : > { %2361 = vst.msk [vmem:[%s3189_s19 + $0x28] sm:$0xf] %vm762_vm5, %v2816_v50  ;;  %v2280_v6 = vld [vmem:[#allocation4 + $0x48] sm:$0xff]  ;;  %v2292_v54 = vpack.c.bf16 %v2282_v53, %v2281_v2  ;;  %v2817_v36 = vpack.c.bf16 %v2282_v53, %v2282_v53 }
 0x21c   : > { %2270 = vst.msk [vmem:[#allocation4 + $0x78] sm:$0xff] %vm1166_vm13, %v2254_v7  ;;  %2268 = vst.msk [vmem:[#allocation4 + $0x68] sm:$0xff] %vm1166_vm13, %v2252_v55  ;;  %v2291_v29 = vpack.c.bf16 %v2280_v6, %v2279_v47  ;;  %v2815_v41 = vpack.c.bf16 %v2280_v6, %v2280_v6 }
 0x21d   : > { %2359 = vst.msk [vmem:[%s3189_s19 + $0x20] sm:$0xf] %vm762_vm5, %v2814_v22  ;;  %2362 = vst.msk [vmem:[%s3189_s19 + $0x2c] sm:$0xf] %vm762_vm5, %v2817_v36  ;;  %v2377_v9 = vunpack.c.l.bf16 %v2292_v54  ;;  %v2378_v44 = vunpack.c.h.bf16 %v2292_v54 }
 0x21e   : > { %2360 = vst.msk [vmem:[%s3189_s19 + $0x24] sm:$0xf] %vm762_vm5, %v2815_v41  ;;  %v2375_v34 = vunpack.c.l.bf16 %v2291_v29  ;;  %v2376_v43 = vunpack.c.h.bf16 %v2291_v29 }
 0x21f   : > { %v2430_v59 = vmul.f32 %v2377_v9, %v2377_v9  ;;  %v2402_v51 = vsel %vm1166_vm13, %v2377_v9, 0.0  ;;  %v2431_v33 = vmul.f32 %v2378_v44, %v2378_v44  ;;  %v2404_v15 = vsel %vm1166_vm13, %v2378_v44, 0.0 }
 0x220   : > { %v2285_v30 = vld [vmem:[#allocation4 + $0x70] sm:$0xff]  ;;  %v2398_v42 = vsel %vm1166_vm13, %v2375_v34, 0.0  ;;  %v2428_v56 = vmul.f32 %v2375_v34, %v2375_v34  ;;  %v2429_v49 = vmul.f32 %v2376_v43, %v2376_v43  ;;  %v2400_v25 = vsel %vm1166_vm13, %v2376_v43, 0.0 }
 0x221   : > { %v2283_v23 = vld [vmem:[#allocation4 + $0x60] sm:$0xff]  ;;  %v2399_v37 = vadd.f32 %v2398_v42, %v2397_v45  ;;  %v2820_v14 = vpack.c.bf16 %v2285_v30, %v2285_v30  ;;  %v2455_v26 = vsel %vm1166_vm13, %v2430_v59, 0.0  ;;  %v2457_v24 = vsel %vm1166_vm13, %v2431_v33, 0.0 }
 0x222   : > { %v2451_v60 = vsel %vm1166_vm13, %v2428_v56, 0.0  ;;  %v2818_v39 = vpack.c.bf16 %v2283_v23, %v2283_v23  ;;  %v2453_v52 = vsel %vm1166_vm13, %v2429_v49, 0.0 }
 0x223   : > { %v2286_v18 = vld [vmem:[#allocation4 + $0x78] sm:$0xff]  ;;  %v2284_v16 = vld [vmem:[#allocation4 + $0x68] sm:$0xff]  ;;  %v2401_v62 = vadd.f32 %v2400_v25, %v2399_v37  ;;  %v2452_v32 = vadd.f32 %v2451_v60, %v2450_v38  ;;  %2365 = vst.msk [vmem:[%s3189_s19 + $0x38] sm:$0xf] %vm762_vm5, %v2820_v14 }
 0x224   : > { %v2294_v61 = vpack.c.bf16 %v2286_v18, %v2285_v30  ;;  %v2821_v63 = vpack.c.bf16 %v2286_v18, %v2286_v18  ;;  %v2293_v13 = vpack.c.bf16 %v2284_v16, %v2283_v23  ;;  %2363 = vst.msk [vmem:[%s3189_s19 + $0x30] sm:$0xf] %vm762_vm5, %v2818_v39  ;;  %v2819_v31 = vpack.c.bf16 %v2284_v16, %v2284_v16 }
 0x225   : > { %v2403_v58 = vadd.f32 %v2402_v51, %v2401_v62  ;;  %v2454_v4 = vadd.f32 %v2453_v52, %v2452_v32 }
 0x226   : > { %2366 = vst.msk [vmem:[%s3189_s19 + $0x3c] sm:$0xf] %vm762_vm5, %v2821_v63  ;;  %v2379_v5 = vunpack.c.l.bf16 %v2293_v13  ;;  %v2380_v12 = vunpack.c.h.bf16 %v2293_v13  ;;  %v2381_v0 = vunpack.c.l.bf16 %v2294_v61  ;;  %2364 = vst.msk [vmem:[%s3189_s19 + $0x34] sm:$0xf] %vm762_vm5, %v2819_v31  ;;  %v2382_v21 = vunpack.c.h.bf16 %v2294_v61 }
 0x227   : > { %v2456_v20 = vadd.f32 %v2455_v26, %v2454_v4  ;;  %v2405_v40 = vadd.f32 %v2404_v15, %v2403_v58 }
 0x228   : > { %v2406_v2 = vsel %vm1166_vm13, %v2379_v5, 0.0  ;;  %v2432_v19 = vmul.f32 %v2379_v5, %v2379_v5  ;;  %v2433_v50 = vmul.f32 %v2380_v12, %v2380_v12  ;;  %v2434_v27 = vmul.f32 %v2381_v0, %v2381_v0 }
 0x229   : > { %v2407_v7 = vadd.f32 %v2406_v2, %v2405_v40  ;;  %v2458_v28 = vadd.f32 %v2457_v24, %v2456_v20  ;;  %v2408_v35 = vsel %vm1166_vm13, %v2380_v12, 0.0  ;;  %v2410_v46 = vsel %vm1166_vm13, %v2381_v0, 0.0 }
 0x22a   : > { %v2459_v10 = vsel %vm1166_vm13, %v2432_v19, 0.0  ;;  %v2435_v47 = vmul.f32 %v2382_v21, %v2382_v21  ;;  %v2461_v57 = vsel %vm1166_vm13, %v2433_v50, 0.0  ;;  %v2412_v53 = vsel %vm1166_vm13, %v2382_v21, 0.0 }
 0x22b   : > { %v2409_v55 = vadd.f32 %v2408_v35, %v2407_v7  ;;  %v2460_v11 = vadd.f32 %v2459_v10, %v2458_v28  ;;  %v2463_v6 = vsel %vm1166_vm13, %v2434_v27, 0.0 }
 0x22c   : > { %v2465_v29 = vsel %vm1166_vm13, %v2435_v47, 0.0 }
 0x22d   : > { %v2411_v48 = vadd.f32 %v2410_v46, %v2409_v55  ;;  %v2462_v22 = vadd.f32 %v2461_v57, %v2460_v11 }
 0x22f   : > { %v2413_v54 = vadd.f32 %v2412_v53, %v2411_v48  ;;  %v2464_v36 = vadd.f32 %v2463_v6, %v2462_v22 }
 0x231   : > { %v2414_v41 = vrot.slane %v2413_v54, 4  ;;  %v2466_v1 = vadd.f32 %v2465_v29, %v2464_v36 }
 0x233   : > { %v2415_v8 = vadd.f32 %v2414_v41, %v2413_v54  ;;  %v2467_v9 = vrot.slane %v2466_v1, 4 }
 0x235   : > { %v2416_v34 = vrot.slane %v2415_v8, 2  ;;  %v2468_v43 = vadd.f32 %v2467_v9, %v2466_v1 }
 0x237   : > { %v2417_v17 = vadd.f32 %v2416_v34, %v2415_v8  ;;  %v2469_v30 = vrot.slane %v2468_v43, 2 }
 0x239   : > { %v2418_v3 = vrot.slane %v2417_v17, 1  ;;  %v2470_v45 = vadd.f32 %v2469_v30, %v2468_v43 }
 0x23b   : > { %v2471_v23 = vrot.slane %v2470_v45, 1  ;;  %v2419_v44 = vadd.f32 %v2418_v3, %v2417_v17 }
 0x23d   : > { %v2472_v42 = vadd.f32 %v2471_v23, %v2470_v45 }
 0x23f   : > { %v2474_v56 = vsel %vm2473_vm0, %v2419_v44, %v2472_v42 }
 0x240   : > { %2476 = vst.msk [vmem:[%s3194_s8] sm:$0x3] %vm2475_vm1, %v2474_v56 }
 0x241 PF: > { %s17_s25 = sadd.s32 1, %s3108_s25   ;;  %s3970_s19 = sld [smem:[#allocation10_spill]] }
 0x242   : > { %p14_p12 = scmp.ge.s32.totalorder %s17_s25, 6   ;;  %s3971_s21 = smov %s3100_s23 }
 0x243   : > { %s3972_s22 = smov %s3104_s24  ;;  %s3973_s23 = smov %s3976_s26 }
 0x244   :  { %16 = sbr.rel (!%p14_p12) target bundleno = 3 (0x3), region = 172 }
 0x247   : > { %s3974_s24 = smov %s3970_s19 }
 0x24b   :  { %2525 = vsyncmov [#allocation5] }
 0x24e   :  { %s2526_s8 = vpop.sfrf %2525 }
 0x24f   :  { %p2781_p13 = scmp.ne.s32.totalorder %s2526_s8, 0 }
 0x251   :  { %2530 = shalt.err (%p2781_p13)  }
 0x252   :  { %2532 = vsyncmov [#allocation5 + $0x1] }
 0x255   :  { %s2533_s7 = vpop.sfrf %2532 }
 0x256   :  { %p2782_p0 = scmp.ne.s32.totalorder %s2533_s7, 0 }
 0x258   :  { %2537 = shalt.err (%p2782_p0)  }

</bundles_post_ra>
